<compile_context>
chip_gen: v7x
topology: tpu7x:2x2x1
jax: 0.10.0
libtpu: 0.0.40
codegen_flags: <defaults>
</compile_context>

<pallas_src>
import math
import functools

import jax
import jax.numpy as jnp
from jax.experimental import pallas as pl
from jax.experimental.pallas import tpu as pltpu

BN_EPS = 1e-5


def _silu(y):
    # Same formulation in the kernel and in the pure-JAX reference.
    return y * (1.0 / (1.0 + jnp.exp(-y)))


# ---------------------------------------------------------------------------
# The single fused kernel: one grid step == one image, all channel-major.
# ---------------------------------------------------------------------------
def _fused_kernel(x_ref, w12_ref, b12_ref, wg1_ref, bg1_ref,
                  wd1_ref, bd1_ref, w3_ref, b3_ref, wd2_ref, bd2_ref,
                  wfin_ref, bfin_ref, mask_ref, o_ref, *, height, width):
    msz = height * width

    def shifted(a, oy, ox):
        # a[:, m] -> a[:, m + oy*width + ox], zero-masked at spatial borders.
        # Lane roll runs on the XLU; wrap-around garbage is killed by the mask.
        off = oy * width + ox
        s = (-off) % msz
        rolled = pltpu.roll(a, s, axis=1) if s else a
        t = (oy + 2) * 5 + (ox + 2)
        return rolled * mask_ref[t:t + 1, :]

    x = x_ref[0]                                         # (c1, M) f32

    # cv1 + cv2 share the input -> one MXU matmul, lane-dense output.
    xy = _silu(jnp.dot(w12_ref[...], x, preferred_element_type=jnp.float32)
               + b12_ref[...])
    c_ = wg1_ref.shape[1]
    xc1 = xy[:c_]                                        # (c_,  M)
    y = xy[c_:]                                          # (c_,  M)

    # GSConv1.cv1 (1x1, SiLU) fused in — no standalone 8-lane kernel.
    x1a = _silu(jnp.dot(wg1_ref[...], xc1, preferred_element_type=jnp.float32)
                + bg1_ref[...])                          # (c_/4, M)

    # GSConv1.cv2: 5x5 depthwise + SiLU (25 taps via lane rolls + masks).
    acc = jnp.zeros_like(x1a)
    for oy in range(-2, 3):
        for ox in range(-2, 3):
            t = (oy + 2) * 5 + (ox + 2)
            acc = acc + shifted(x1a, oy, ox) * wd1_ref[:, t:t + 1]
    x2a = _silu(acc + bd1_ref[...])                      # (c_/4, M)

    # GSConv2.cv1: 3x3 conv (no act). GSConv1's channel shuffle is folded into
    # w3's columns, so the un-shuffled cat feeds it directly. One fat im2col
    # MXU matmul: (c_/2, 9*c_/2) @ (9*c_/2, M).
    cat_a = jnp.concatenate([x1a, x2a], axis=0)          # (c_/2, M)
    patches = jnp.concatenate(
        [shifted(cat_a, oy, ox)
         for oy in range(-1, 2) for ox in range(-1, 2)], axis=0)
    x1b = (jnp.dot(w3_ref[...], patches, preferred_element_type=jnp.float32)
           + b3_ref[...])                                # (c_/2, M)

    # GSConv2.cv2: 5x5 depthwise (no act).
    acc2 = jnp.zeros_like(x1b)
    for oy in range(-2, 3):
        for ox in range(-2, 3):
            t = (oy + 2) * 5 + (ox + 2)
            acc2 = acc2 + shifted(x1b, oy, ox) * wd2_ref[:, t:t + 1]
    x2b = acc2 + bd2_ref[...]                            # (c_/2, M)

    # cv3 fused with GSConv2's shuffle, the shortcut conv, the residual add
    # and the channel concat:  out = SiLU([A|B1|B2|B@Ws] @ [y;x1b;x2b;xc1]+b).
    feats = jnp.concatenate([y, x1b, x2b, xc1], axis=0)  # (3c_, M)
    out = _silu(jnp.dot(wfin_ref[...], feats, preferred_element_type=jnp.float32)
                + bfin_ref[...])
    o_ref[0] = out.astype(o_ref.dtype)


# ---------------------------------------------------------------------------
# Weight preparation: fold BatchNorm, fold the GSConv channel shuffles into
# the next conv's input-channel axis, compose shortcut + residual + concat
# into cv3, flatten the 3x3 conv for a single im2col matmul.  All exact.
# ---------------------------------------------------------------------------
def _fold_bn(p):
    wt = p["w"]
    gamma, beta, mean, var = p["bn"]
    scale = gamma / jnp.sqrt(var + BN_EPS)
    return wt * scale.reshape(-1, 1, 1, 1), beta - mean * scale


def _shuffle_inv_perm(n):
    # GSConv shuffle: out[k] = cat[perm[k]], perm = [evens, odds].
    perm = jnp.concatenate([jnp.arange(0, n, 2), jnp.arange(1, n, 2)])
    return jnp.argsort(perm)


def prepare_params(raw):
    w1, b1 = _fold_bn(raw["cv1"])
    w2, b2 = _fold_bn(raw["cv2"])
    wg1, bg1 = _fold_bn(raw["gs1_cv1"])
    wd1, bd1 = _fold_bn(raw["gs1_cv2"])
    w3, b3 = _fold_bn(raw["gs2_cv1"])
    wd2, bd2 = _fold_bn(raw["gs2_cv2"])
    ws, bs = _fold_bn(raw["shortcut"])
    wc3, bc3 = _fold_bn(raw["cv3"])

    c_ = w1.shape[0]                                  # hidden width (c2 * e)
    quarter = wg1.shape[0]                            # c_ // 4
    half = w3.shape[0]                                # c_ // 2

    # cv1 + cv2 fused into one channel-major matmul over the shared input x.
    w12 = jnp.concatenate([w1[:, :, 0, 0], w2[:, :, 0, 0]], axis=0)
    b12 = jnp.concatenate([b1, b2]).reshape(-1, 1)

    wg1_m = wg1[:, :, 0, 0]                           # (c_/4, c_)

    # Depthwise 5x5 taps -> (C, 25), tap index = ky*5 + kx.
    wd1_t = wd1[:, 0].reshape(quarter, 25)
    wd2_t = wd2[:, 0].reshape(half, 25)

    # gs2.cv1 (3x3): fold gs1's shuffle into its input channels, then flatten
    # for one im2col matmul (column index = tap*cin + cin_idx).
    cin3 = w3.shape[1]
    inv_a = _shuffle_inv_perm(cin3)
    w3p = w3[:, inv_a, :, :]
    w3_flat = jnp.transpose(w3p, (0, 2, 3, 1)).reshape(half, 9 * cin3)

    # cv3: split for [y | gsb_out], fold gs2's shuffle into its columns,
    # compose the shortcut conv (B @ Ws) and absorb its bias.
    wc3_m = wc3[:, :, 0, 0]                           # (c2, 2c_)
    a_y = wc3_m[:, :c_]
    b_g = wc3_m[:, c_:]
    inv_b = _shuffle_inv_perm(c_)
    b_cat = b_g[:, inv_b]
    ws_m = ws[:, :, 0, 0]
    w_fin = jnp.concatenate(
        [a_y, b_cat[:, :half], b_cat[:, half:], b_g @ ws_m], axis=1)  # (c2,3c_)
    b_fin = (bc3 + b_g @ bs).reshape(-1, 1)

    return dict(W12=w12, b12=b12, Wg1=wg1_m, bg1=bg1.reshape(-1, 1),
                Wd1=wd1_t, bd1=bd1.reshape(-1, 1),
                W3=w3_flat, b3=b3.reshape(-1, 1),
                Wd2=wd2_t, bd2=bd2.reshape(-1, 1),
                Wfin=w_fin, bfin=b_fin)


def _full_spec(a):
    nd = a.ndim
    return pl.BlockSpec(a.shape, lambda b: (0,) * nd)


def vovgscsp_forward(x_nchw, wp):
    """Fused Pallas forward.  x_nchw: (B, C1, H, W) f32 -> (B, C2, H, W) f32."""
    bsz, c1, h, w = x_nchw.shape
    msz = h * w
    x = x_nchw.reshape(bsz, c1, msz)                  # native NCHW, free view
    c2 = wp["Wfin"].shape[0]

    # Spatial-validity masks for the roll-based tap shifts (constant-folded).
    yy = jnp.arange(h)[:, None]
    xx = jnp.arange(w)[None, :]
    masks = []
    for oy in range(-2, 3):
        for ox in range(-2, 3):
            valid = ((yy + oy >= 0) & (yy + oy < h)
                     & (xx + ox >= 0) & (xx + ox < w))
            masks.append(valid.reshape(msz))
    masks = jnp.stack(masks).astype(x.dtype)          # (25, H*W)

    weights = [wp["W12"], wp["b12"], wp["Wg1"], wp["bg1"], wp["Wd1"],
               wp["bd1"], wp["W3"], wp["b3"], wp["Wd2"], wp["bd2"],
               wp["Wfin"], wp["bfin"], masks]

    out = pl.pallas_call(
        functools.partial(_fused_kernel, height=h, width=w),
        out_shape=jax.ShapeDtypeStruct((bsz, c2, msz), x.dtype),
        grid_spec=pltpu.PrefetchScalarGridSpec(
            num_scalar_prefetch=0,
            grid=(bsz,),
            in_specs=[pl.BlockSpec((1, c1, msz), lambda b: (b, 0, 0))]
                     + [_full_spec(a) for a in weights],
            out_specs=pl.BlockSpec((1, c2, msz), lambda b: (b, 0, 0)),
        ),
        compiler_params=pltpu.CompilerParams(
            dimension_semantics=("parallel",)),
    )(x, *weights)
    return out.reshape(bsz, c2, h, w)


# ---------------------------------------------------------------------------
# Pure-JAX reference: literal transcription of the PyTorch module (NCHW).
# ---------------------------------------------------------------------------
def _conv_bn_act_ref(x, p, act, groups=1):
    wt = p["w"]
    k = wt.shape[2]
    pad = k // 2
    y = jax.lax.conv_general_dilated(
        x, wt, window_strides=(1, 1), padding=[(pad, pad), (pad, pad)],
        dimension_numbers=("NCHW", "OIHW", "NCHW"),
        feature_group_count=groups)
    gamma, beta, mean, var = p["bn"]
    scale = (gamma / jnp.sqrt(var + BN_EPS))[None, :, None, None]
    y = (y - mean[None, :, None, None]) * scale + beta[None, :, None, None]
    return _silu(y) if act else y


def _gsconv_ref(x, cv1p, cv2p, act):
    x1 = _conv_bn_act_ref(x, cv1p, act)
    x2 = _conv_bn_act_ref(x1, cv2p, act, groups=x1.shape[1])
    x2 = jnp.concatenate([x1, x2], axis=1)
    b, n, h, w = x2.shape
    yv = x2.reshape(b * n // 2, 2, h * w)
    yv = jnp.transpose(yv, (1, 0, 2))
    yv = yv.reshape(2, -1, n // 2, h, w)
    return jnp.concatenate([yv[0], yv[1]], axis=1)


def _vovgscsp_ref(x, raw):
    xc1 = _conv_bn_act_ref(x, raw["cv1"], True)
    y = _conv_bn_act_ref(x, raw["cv2"], True)
    g1 = _gsconv_ref(xc1, raw["gs1_cv1"], raw["gs1_cv2"], True)
    g2 = _gsconv_ref(g1, raw["gs2_cv1"], raw["gs2_cv2"], False)
    sc = _conv_bn_act_ref(xc1, raw["shortcut"], False)
    x1 = g2 + sc
    return _conv_bn_act_ref(jnp.concatenate([y, x1], axis=1), raw["cv3"], True)


def _make_conv_bn(key, cout, cin_per_group, k):
    kw_, kg, kb, km, kv = jax.random.split(key, 5)
    fan_in = cin_per_group * k * k
    return {
        "w": jax.random.normal(kw_, (cout, cin_per_group, k, k), jnp.float32)
             * (1.0 / math.sqrt(fan_in)),
        "bn": (
            jax.random.uniform(kg, (cout,), minval=0.5, maxval=1.5),
            jax.random.normal(kb, (cout,), jnp.float32) * 0.1,
            jax.random.normal(km, (cout,), jnp.float32) * 0.1,
            jax.random.uniform(kv, (cout,), minval=0.5, maxval=1.5),
        ),
    }


if __name__ == "__main__":
    c1, c2, e = 64, 64, 0.5
    bsz, height, width = 2, 16, 16
    c_ = int(c2 * e)

    key = jax.random.PRNGKey(0)
    ks = jax.random.split(key, 9)
    raw = {
        "cv1": _make_conv_bn(ks[0], c_, c1, 1),
        "cv2": _make_conv_bn(ks[1], c_, c1, 1),
        "gs1_cv1": _make_conv_bn(ks[2], c_ // 4, c_, 1),
        "gs1_cv2": _make_conv_bn(ks[3], c_ // 4, 1, 5),   # depthwise 5x5
        "gs2_cv1": _make_conv_bn(ks[4], c_ // 2, c_ // 2, 3),
        "gs2_cv2": _make_conv_bn(ks[5], c_ // 2, 1, 5),   # depthwise 5x5
        "shortcut": _make_conv_bn(ks[6], c_, c_, 1),
        "cv3": _make_conv_bn(ks[7], c2, 2 * c_, 1),
        # VoVGSCSP.res is defined in __init__ but never used in forward().
    }
    x = jax.random.normal(ks[8], (bsz, c1, height, width), jnp.float32)

    wp = prepare_params(raw)
    out = jax.jit(vovgscsp_forward)(x, wp)
    out = jax.block_until_ready(out)

    ref = _vovgscsp_ref(x, raw)
    assert out.shape == (bsz, c2, height, width)
    err = float(jnp.max(jnp.abs(out - ref)))
    assert jnp.allclose(out, ref, atol=1e-3, rtol=1e-3), f"mismatch: {err}"
    print("KERNEL_OK")
</pallas_src>

<mosaic_0001>
module attributes {stable_mosaic.version = 11 : i64} {
  func.func @_fused_kernel(%arg0: i32, %arg1: memref<1x64x256xf32, #tpu.memory_space<vmem>>, %arg2: memref<64x64xf32, #tpu.memory_space<vmem>>, %arg3: memref<64x1xf32, #tpu.memory_space<vmem>>, %arg4: memref<8x32xf32, #tpu.memory_space<vmem>>, %arg5: memref<8x1xf32, #tpu.memory_space<vmem>>, %arg6: memref<8x25xf32, #tpu.memory_space<vmem>>, %arg7: memref<8x1xf32, #tpu.memory_space<vmem>>, %arg8: memref<16x144xf32, #tpu.memory_space<vmem>>, %arg9: memref<16x1xf32, #tpu.memory_space<vmem>>, %arg10: memref<16x25xf32, #tpu.memory_space<vmem>>, %arg11: memref<16x1xf32, #tpu.memory_space<vmem>>, %arg12: memref<64x96xf32, #tpu.memory_space<vmem>>, %arg13: memref<64x1xf32, #tpu.memory_space<vmem>>, %arg14: memref<25x256xf32, #tpu.memory_space<vmem>>, %arg15: memref<1x64x256xf32, #tpu.memory_space<vmem>>) attributes {dimension_semantics = [#tpu.dimension_semantics<parallel>], iteration_bounds = array<i64: 2>, scalar_prefetch = 0 : i64, scratch_operands = 0 : i64, tpu.core_type = #tpu.core_type<tc>, window_params = [{transform_indices = @transform_0, window_bounds = array<i64: 1, 64, 256>}, {pipeline_mode = #tpu.pipeline_mode<synchronous>, transform_indices = @transform_1, window_bounds = array<i64: 64, 64>}, {pipeline_mode = #tpu.pipeline_mode<synchronous>, transform_indices = @transform_2, window_bounds = array<i64: 64, 1>}, {pipeline_mode = #tpu.pipeline_mode<synchronous>, transform_indices = @transform_3, window_bounds = array<i64: 8, 32>}, {pipeline_mode = #tpu.pipeline_mode<synchronous>, transform_indices = @transform_4, window_bounds = array<i64: 8, 1>}, {pipeline_mode = #tpu.pipeline_mode<synchronous>, transform_indices = @transform_5, window_bounds = array<i64: 8, 25>}, {pipeline_mode = #tpu.pipeline_mode<synchronous>, transform_indices = @transform_6, window_bounds = array<i64: 8, 1>}, {pipeline_mode = #tpu.pipeline_mode<synchronous>, transform_indices = @transform_7, window_bounds = array<i64: 16, 144>}, {pipeline_mode = #tpu.pipeline_mode<synchronous>, transform_indices = @transform_8, window_bounds = array<i64: 16, 1>}, {pipeline_mode = #tpu.pipeline_mode<synchronous>, transform_indices = @transform_9, window_bounds = array<i64: 16, 25>}, {pipeline_mode = #tpu.pipeline_mode<synchronous>, transform_indices = @transform_10, window_bounds = array<i64: 16, 1>}, {pipeline_mode = #tpu.pipeline_mode<synchronous>, transform_indices = @transform_11, window_bounds = array<i64: 64, 96>}, {pipeline_mode = #tpu.pipeline_mode<synchronous>, transform_indices = @transform_12, window_bounds = array<i64: 64, 1>}, {pipeline_mode = #tpu.pipeline_mode<synchronous>, transform_indices = @transform_13, window_bounds = array<i64: 25, 256>}, {transform_indices = @transform_14, window_bounds = array<i64: 1, 64, 256>}]} {
    %c0 = arith.constant 0 : index
    %c0_0 = arith.constant 0 : index
    %c0_1 = arith.constant 0 : index
    %0 = vector.load %arg1[%c0, %c0_0, %c0_1] : memref<1x64x256xf32, #tpu.memory_space<vmem>>, vector<1x64x256xf32>
    %1 = vector.shape_cast %0 : vector<1x64x256xf32> to vector<64x256xf32>
    %c0_2 = arith.constant 0 : index
    %c0_3 = arith.constant 0 : index
    %2 = vector.load %arg2[%c0_2, %c0_3] : memref<64x64xf32, #tpu.memory_space<vmem>>, vector<64x64xf32>
    %cst = arith.constant dense<0.000000e+00> : vector<64x256xf32>
    %3 = tpu.matmul %2, %1, %cst {dimension_numbers = #tpu.dot_dimension_numbers<[1], [0], [0], [1], [0, 0, 1, 1], [], []>} : vector<64x64xf32>, vector<64x256xf32>, vector<64x256xf32> -> vector<64x256xf32>
    %c0_4 = arith.constant 0 : index
    %c0_5 = arith.constant 0 : index
    %4 = vector.load %arg3[%c0_4, %c0_5] : memref<64x1xf32, #tpu.memory_space<vmem>>, vector<64x1xf32>
    %5 = vector.broadcast %4 : vector<64x1xf32> to vector<64x256xf32>
    %6 = arith.addf %3, %5 : vector<64x256xf32>
    %cst_6 = arith.constant 0.000000e+00 : f32
    %7 = vector.broadcast %cst_6 : f32 to vector<64x256xf32>
    %8 = arith.subf %7, %6 : vector<64x256xf32>
    %9 = math.exp %8 : vector<64x256xf32>
    %cst_7 = arith.constant 1.000000e+00 : f32
    %10 = vector.broadcast %cst_7 : f32 to vector<64x256xf32>
    %11 = arith.addf %10, %9 : vector<64x256xf32>
    %cst_8 = arith.constant 1.000000e+00 : f32
    %12 = vector.broadcast %cst_8 : f32 to vector<64x256xf32>
    %13 = arith.divf %12, %11 : vector<64x256xf32>
    %14 = arith.mulf %6, %13 : vector<64x256xf32>
    %15 = vector.extract_strided_slice %14 {offsets = [0, 0], sizes = [32, 256], strides = [1, 1]} : vector<64x256xf32> to vector<32x256xf32>
    %16 = vector.extract_strided_slice %14 {offsets = [32, 0], sizes = [32, 256], strides = [1, 1]} : vector<64x256xf32> to vector<32x256xf32>
    %c0_9 = arith.constant 0 : index
    %c0_10 = arith.constant 0 : index
    %17 = vector.load %arg4[%c0_9, %c0_10] : memref<8x32xf32, #tpu.memory_space<vmem>>, vector<8x32xf32>
    %cst_11 = arith.constant dense<0.000000e+00> : vector<8x256xf32>
    %18 = tpu.matmul %17, %15, %cst_11 {dimension_numbers = #tpu.dot_dimension_numbers<[1], [0], [0], [1], [0, 0, 1, 1], [], []>} : vector<8x32xf32>, vector<32x256xf32>, vector<8x256xf32> -> vector<8x256xf32>
    %c0_12 = arith.constant 0 : index
    %c0_13 = arith.constant 0 : index
    %19 = vector.load %arg5[%c0_12, %c0_13] : memref<8x1xf32, #tpu.memory_space<vmem>>, vector<8x1xf32>
    %20 = vector.broadcast %19 : vector<8x1xf32> to vector<8x256xf32>
    %21 = arith.addf %18, %20 : vector<8x256xf32>
    %cst_14 = arith.constant 0.000000e+00 : f32
    %22 = vector.broadcast %cst_14 : f32 to vector<8x256xf32>
    %23 = arith.subf %22, %21 : vector<8x256xf32>
    %24 = math.exp %23 : vector<8x256xf32>
    %cst_15 = arith.constant 1.000000e+00 : f32
    %25 = vector.broadcast %cst_15 : f32 to vector<8x256xf32>
    %26 = arith.addf %25, %24 : vector<8x256xf32>
    %cst_16 = arith.constant 1.000000e+00 : f32
    %27 = vector.broadcast %cst_16 : f32 to vector<8x256xf32>
    %28 = arith.divf %27, %26 : vector<8x256xf32>
    %29 = arith.mulf %21, %28 : vector<8x256xf32>
    %cst_17 = arith.constant 0.000000e+00 : f32
    %30 = vector.broadcast %cst_17 : f32 to vector<8x256xf32>
    %c34_i32 = arith.constant 34 : i32
    %31 = tpu.dynamic_rotate %29 by %c34_i32 dim 1 : vector<8x256xf32>, i32 -> vector<8x256xf32>
    %c0_18 = arith.constant 0 : index
    %c0_19 = arith.constant 0 : index
    %32 = vector.load %arg14[%c0_18, %c0_19] : memref<25x256xf32, #tpu.memory_space<vmem>>, vector<1x256xf32>
    %33 = vector.broadcast %32 : vector<1x256xf32> to vector<8x256xf32>
    %34 = arith.mulf %31, %33 : vector<8x256xf32>
    %c0_20 = arith.constant 0 : index
    %c0_21 = arith.constant 0 : index
    %35 = vector.load %arg6[%c0_20, %c0_21] : memref<8x25xf32, #tpu.memory_space<vmem>>, vector<8x1xf32>
    %36 = vector.broadcast %35 : vector<8x1xf32> to vector<8x256xf32>
    %37 = arith.mulf %34, %36 : vector<8x256xf32>
    %38 = arith.addf %30, %37 : vector<8x256xf32>
    %c33_i32 = arith.constant 33 : i32
    %39 = tpu.dynamic_rotate %29 by %c33_i32 dim 1 : vector<8x256xf32>, i32 -> vector<8x256xf32>
    %c1 = arith.constant 1 : index
    %c0_22 = arith.constant 0 : index
    %40 = vector.load %arg14[%c1, %c0_22] : memref<25x256xf32, #tpu.memory_space<vmem>>, vector<1x256xf32>
    %41 = vector.broadcast %40 : vector<1x256xf32> to vector<8x256xf32>
    %42 = arith.mulf %39, %41 : vector<8x256xf32>
    %c0_23 = arith.constant 0 : index
    %c1_24 = arith.constant 1 : index
    %43 = vector.load %arg6[%c0_23, %c1_24] : memref<8x25xf32, #tpu.memory_space<vmem>>, vector<8x1xf32>
    %44 = vector.broadcast %43 : vector<8x1xf32> to vector<8x256xf32>
    %45 = arith.mulf %42, %44 : vector<8x256xf32>
    %46 = arith.addf %38, %45 : vector<8x256xf32>
    %c32_i32 = arith.constant 32 : i32
    %47 = tpu.dynamic_rotate %29 by %c32_i32 dim 1 : vector<8x256xf32>, i32 -> vector<8x256xf32>
    %c2 = arith.constant 2 : index
    %c0_25 = arith.constant 0 : index
    %48 = vector.load %arg14[%c2, %c0_25] : memref<25x256xf32, #tpu.memory_space<vmem>>, vector<1x256xf32>
    %49 = vector.broadcast %48 : vector<1x256xf32> to vector<8x256xf32>
    %50 = arith.mulf %47, %49 : vector<8x256xf32>
    %c0_26 = arith.constant 0 : index
    %c2_27 = arith.constant 2 : index
    %51 = vector.load %arg6[%c0_26, %c2_27] : memref<8x25xf32, #tpu.memory_space<vmem>>, vector<8x1xf32>
    %52 = vector.broadcast %51 : vector<8x1xf32> to vector<8x256xf32>
    %53 = arith.mulf %50, %52 : vector<8x256xf32>
    %54 = arith.addf %46, %53 : vector<8x256xf32>
    %c31_i32 = arith.constant 31 : i32
    %55 = tpu.dynamic_rotate %29 by %c31_i32 dim 1 : vector<8x256xf32>, i32 -> vector<8x256xf32>
    %c3 = arith.constant 3 : index
    %c0_28 = arith.constant 0 : index
    %56 = vector.load %arg14[%c3, %c0_28] : memref<25x256xf32, #tpu.memory_space<vmem>>, vector<1x256xf32>
    %57 = vector.broadcast %56 : vector<1x256xf32> to vector<8x256xf32>
    %58 = arith.mulf %55, %57 : vector<8x256xf32>
    %c0_29 = arith.constant 0 : index
    %c3_30 = arith.constant 3 : index
    %59 = vector.load %arg6[%c0_29, %c3_30] : memref<8x25xf32, #tpu.memory_space<vmem>>, vector<8x1xf32>
    %60 = vector.broadcast %59 : vector<8x1xf32> to vector<8x256xf32>
    %61 = arith.mulf %58, %60 : vector<8x256xf32>
    %62 = arith.addf %54, %61 : vector<8x256xf32>
    %c30_i32 = arith.constant 30 : i32
    %63 = tpu.dynamic_rotate %29 by %c30_i32 dim 1 : vector<8x256xf32>, i32 -> vector<8x256xf32>
    %c4 = arith.constant 4 : index
    %c0_31 = arith.constant 0 : index
    %64 = vector.load %arg14[%c4, %c0_31] : memref<25x256xf32, #tpu.memory_space<vmem>>, vector<1x256xf32>
    %65 = vector.broadcast %64 : vector<1x256xf32> to vector<8x256xf32>
    %66 = arith.mulf %63, %65 : vector<8x256xf32>
    %c0_32 = arith.constant 0 : index
    %c4_33 = arith.constant 4 : index
    %67 = vector.load %arg6[%c0_32, %c4_33] : memref<8x25xf32, #tpu.memory_space<vmem>>, vector<8x1xf32>
    %68 = vector.broadcast %67 : vector<8x1xf32> to vector<8x256xf32>
    %69 = arith.mulf %66, %68 : vector<8x256xf32>
    %70 = arith.addf %62, %69 : vector<8x256xf32>
    %c18_i32 = arith.constant 18 : i32
    %71 = tpu.dynamic_rotate %29 by %c18_i32 dim 1 : vector<8x256xf32>, i32 -> vector<8x256xf32>
    %c5 = arith.constant 5 : index
    %c0_34 = arith.constant 0 : index
    %72 = vector.load %arg14[%c5, %c0_34] : memref<25x256xf32, #tpu.memory_space<vmem>>, vector<1x256xf32>
    %73 = vector.broadcast %72 : vector<1x256xf32> to vector<8x256xf32>
    %74 = arith.mulf %71, %73 : vector<8x256xf32>
    %c0_35 = arith.constant 0 : index
    %c5_36 = arith.constant 5 : index
    %75 = vector.load %arg6[%c0_35, %c5_36] : memref<8x25xf32, #tpu.memory_space<vmem>>, vector<8x1xf32>
    %76 = vector.broadcast %75 : vector<8x1xf32> to vector<8x256xf32>
    %77 = arith.mulf %74, %76 : vector<8x256xf32>
    %78 = arith.addf %70, %77 : vector<8x256xf32>
    %c17_i32 = arith.constant 17 : i32
    %79 = tpu.dynamic_rotate %29 by %c17_i32 dim 1 : vector<8x256xf32>, i32 -> vector<8x256xf32>
    %c6 = arith.constant 6 : index
    %c0_37 = arith.constant 0 : index
    %80 = vector.load %arg14[%c6, %c0_37] : memref<25x256xf32, #tpu.memory_space<vmem>>, vector<1x256xf32>
    %81 = vector.broadcast %80 : vector<1x256xf32> to vector<8x256xf32>
    %82 = arith.mulf %79, %81 : vector<8x256xf32>
    %c0_38 = arith.constant 0 : index
    %c6_39 = arith.constant 6 : index
    %83 = vector.load %arg6[%c0_38, %c6_39] : memref<8x25xf32, #tpu.memory_space<vmem>>, vector<8x1xf32>
    %84 = vector.broadcast %83 : vector<8x1xf32> to vector<8x256xf32>
    %85 = arith.mulf %82, %84 : vector<8x256xf32>
    %86 = arith.addf %78, %85 : vector<8x256xf32>
    %c16_i32 = arith.constant 16 : i32
    %87 = tpu.dynamic_rotate %29 by %c16_i32 dim 1 : vector<8x256xf32>, i32 -> vector<8x256xf32>
    %c7 = arith.constant 7 : index
    %c0_40 = arith.constant 0 : index
    %88 = vector.load %arg14[%c7, %c0_40] : memref<25x256xf32, #tpu.memory_space<vmem>>, vector<1x256xf32>
    %89 = vector.broadcast %88 : vector<1x256xf32> to vector<8x256xf32>
    %90 = arith.mulf %87, %89 : vector<8x256xf32>
    %c0_41 = arith.constant 0 : index
    %c7_42 = arith.constant 7 : index
    %91 = vector.load %arg6[%c0_41, %c7_42] : memref<8x25xf32, #tpu.memory_space<vmem>>, vector<8x1xf32>
    %92 = vector.broadcast %91 : vector<8x1xf32> to vector<8x256xf32>
    %93 = arith.mulf %90, %92 : vector<8x256xf32>
    %94 = arith.addf %86, %93 : vector<8x256xf32>
    %c15_i32 = arith.constant 15 : i32
    %95 = tpu.dynamic_rotate %29 by %c15_i32 dim 1 : vector<8x256xf32>, i32 -> vector<8x256xf32>
    %c8 = arith.constant 8 : index
    %c0_43 = arith.constant 0 : index
    %96 = vector.load %arg14[%c8, %c0_43] : memref<25x256xf32, #tpu.memory_space<vmem>>, vector<1x256xf32>
    %97 = vector.broadcast %96 : vector<1x256xf32> to vector<8x256xf32>
    %98 = arith.mulf %95, %97 : vector<8x256xf32>
    %c0_44 = arith.constant 0 : index
    %c8_45 = arith.constant 8 : index
    %99 = vector.load %arg6[%c0_44, %c8_45] : memref<8x25xf32, #tpu.memory_space<vmem>>, vector<8x1xf32>
    %100 = vector.broadcast %99 : vector<8x1xf32> to vector<8x256xf32>
    %101 = arith.mulf %98, %100 : vector<8x256xf32>
    %102 = arith.addf %94, %101 : vector<8x256xf32>
    %c14_i32 = arith.constant 14 : i32
    %103 = tpu.dynamic_rotate %29 by %c14_i32 dim 1 : vector<8x256xf32>, i32 -> vector<8x256xf32>
    %c9 = arith.constant 9 : index
    %c0_46 = arith.constant 0 : index
    %104 = vector.load %arg14[%c9, %c0_46] : memref<25x256xf32, #tpu.memory_space<vmem>>, vector<1x256xf32>
    %105 = vector.broadcast %104 : vector<1x256xf32> to vector<8x256xf32>
    %106 = arith.mulf %103, %105 : vector<8x256xf32>
    %c0_47 = arith.constant 0 : index
    %c9_48 = arith.constant 9 : index
    %107 = vector.load %arg6[%c0_47, %c9_48] : memref<8x25xf32, #tpu.memory_space<vmem>>, vector<8x1xf32>
    %108 = vector.broadcast %107 : vector<8x1xf32> to vector<8x256xf32>
    %109 = arith.mulf %106, %108 : vector<8x256xf32>
    %110 = arith.addf %102, %109 : vector<8x256xf32>
    %c2_i32 = arith.constant 2 : i32
    %111 = tpu.dynamic_rotate %29 by %c2_i32 dim 1 : vector<8x256xf32>, i32 -> vector<8x256xf32>
    %c10 = arith.constant 10 : index
    %c0_49 = arith.constant 0 : index
    %112 = vector.load %arg14[%c10, %c0_49] : memref<25x256xf32, #tpu.memory_space<vmem>>, vector<1x256xf32>
    %113 = vector.broadcast %112 : vector<1x256xf32> to vector<8x256xf32>
    %114 = arith.mulf %111, %113 : vector<8x256xf32>
    %c0_50 = arith.constant 0 : index
    %c10_51 = arith.constant 10 : index
    %115 = vector.load %arg6[%c0_50, %c10_51] : memref<8x25xf32, #tpu.memory_space<vmem>>, vector<8x1xf32>
    %116 = vector.broadcast %115 : vector<8x1xf32> to vector<8x256xf32>
    %117 = arith.mulf %114, %116 : vector<8x256xf32>
    %118 = arith.addf %110, %117 : vector<8x256xf32>
    %c1_i32 = arith.constant 1 : i32
    %119 = tpu.dynamic_rotate %29 by %c1_i32 dim 1 : vector<8x256xf32>, i32 -> vector<8x256xf32>
    %c11 = arith.constant 11 : index
    %c0_52 = arith.constant 0 : index
    %120 = vector.load %arg14[%c11, %c0_52] : memref<25x256xf32, #tpu.memory_space<vmem>>, vector<1x256xf32>
    %121 = vector.broadcast %120 : vector<1x256xf32> to vector<8x256xf32>
    %122 = arith.mulf %119, %121 : vector<8x256xf32>
    %c0_53 = arith.constant 0 : index
    %c11_54 = arith.constant 11 : index
    %123 = vector.load %arg6[%c0_53, %c11_54] : memref<8x25xf32, #tpu.memory_space<vmem>>, vector<8x1xf32>
    %124 = vector.broadcast %123 : vector<8x1xf32> to vector<8x256xf32>
    %125 = arith.mulf %122, %124 : vector<8x256xf32>
    %126 = arith.addf %118, %125 : vector<8x256xf32>
    %c12 = arith.constant 12 : index
    %c0_55 = arith.constant 0 : index
    %127 = vector.load %arg14[%c12, %c0_55] : memref<25x256xf32, #tpu.memory_space<vmem>>, vector<1x256xf32>
    %128 = vector.broadcast %127 : vector<1x256xf32> to vector<8x256xf32>
    %129 = arith.mulf %29, %128 : vector<8x256xf32>
    %c0_56 = arith.constant 0 : index
    %c12_57 = arith.constant 12 : index
    %130 = vector.load %arg6[%c0_56, %c12_57] : memref<8x25xf32, #tpu.memory_space<vmem>>, vector<8x1xf32>
    %131 = vector.broadcast %130 : vector<8x1xf32> to vector<8x256xf32>
    %132 = arith.mulf %129, %131 : vector<8x256xf32>
    %133 = arith.addf %126, %132 : vector<8x256xf32>
    %c255_i32 = arith.constant 255 : i32
    %134 = tpu.dynamic_rotate %29 by %c255_i32 dim 1 : vector<8x256xf32>, i32 -> vector<8x256xf32>
    %c13 = arith.constant 13 : index
    %c0_58 = arith.constant 0 : index
    %135 = vector.load %arg14[%c13, %c0_58] : memref<25x256xf32, #tpu.memory_space<vmem>>, vector<1x256xf32>
    %136 = vector.broadcast %135 : vector<1x256xf32> to vector<8x256xf32>
    %137 = arith.mulf %134, %136 : vector<8x256xf32>
    %c0_59 = arith.constant 0 : index
    %c13_60 = arith.constant 13 : index
    %138 = vector.load %arg6[%c0_59, %c13_60] : memref<8x25xf32, #tpu.memory_space<vmem>>, vector<8x1xf32>
    %139 = vector.broadcast %138 : vector<8x1xf32> to vector<8x256xf32>
    %140 = arith.mulf %137, %139 : vector<8x256xf32>
    %141 = arith.addf %133, %140 : vector<8x256xf32>
    %c254_i32 = arith.constant 254 : i32
    %142 = tpu.dynamic_rotate %29 by %c254_i32 dim 1 : vector<8x256xf32>, i32 -> vector<8x256xf32>
    %c14 = arith.constant 14 : index
    %c0_61 = arith.constant 0 : index
    %143 = vector.load %arg14[%c14, %c0_61] : memref<25x256xf32, #tpu.memory_space<vmem>>, vector<1x256xf32>
    %144 = vector.broadcast %143 : vector<1x256xf32> to vector<8x256xf32>
    %145 = arith.mulf %142, %144 : vector<8x256xf32>
    %c0_62 = arith.constant 0 : index
    %c14_63 = arith.constant 14 : index
    %146 = vector.load %arg6[%c0_62, %c14_63] : memref<8x25xf32, #tpu.memory_space<vmem>>, vector<8x1xf32>
    %147 = vector.broadcast %146 : vector<8x1xf32> to vector<8x256xf32>
    %148 = arith.mulf %145, %147 : vector<8x256xf32>
    %149 = arith.addf %141, %148 : vector<8x256xf32>
    %c242_i32 = arith.constant 242 : i32
    %150 = tpu.dynamic_rotate %29 by %c242_i32 dim 1 : vector<8x256xf32>, i32 -> vector<8x256xf32>
    %c15 = arith.constant 15 : index
    %c0_64 = arith.constant 0 : index
    %151 = vector.load %arg14[%c15, %c0_64] : memref<25x256xf32, #tpu.memory_space<vmem>>, vector<1x256xf32>
    %152 = vector.broadcast %151 : vector<1x256xf32> to vector<8x256xf32>
    %153 = arith.mulf %150, %152 : vector<8x256xf32>
    %c0_65 = arith.constant 0 : index
    %c15_66 = arith.constant 15 : index
    %154 = vector.load %arg6[%c0_65, %c15_66] : memref<8x25xf32, #tpu.memory_space<vmem>>, vector<8x1xf32>
    %155 = vector.broadcast %154 : vector<8x1xf32> to vector<8x256xf32>
    %156 = arith.mulf %153, %155 : vector<8x256xf32>
    %157 = arith.addf %149, %156 : vector<8x256xf32>
    %c241_i32 = arith.constant 241 : i32
    %158 = tpu.dynamic_rotate %29 by %c241_i32 dim 1 : vector<8x256xf32>, i32 -> vector<8x256xf32>
    %c16 = arith.constant 16 : index
    %c0_67 = arith.constant 0 : index
    %159 = vector.load %arg14[%c16, %c0_67] : memref<25x256xf32, #tpu.memory_space<vmem>>, vector<1x256xf32>
    %160 = vector.broadcast %159 : vector<1x256xf32> to vector<8x256xf32>
    %161 = arith.mulf %158, %160 : vector<8x256xf32>
    %c0_68 = arith.constant 0 : index
    %c16_69 = arith.constant 16 : index
    %162 = vector.load %arg6[%c0_68, %c16_69] : memref<8x25xf32, #tpu.memory_space<vmem>>, vector<8x1xf32>
    %163 = vector.broadcast %162 : vector<8x1xf32> to vector<8x256xf32>
    %164 = arith.mulf %161, %163 : vector<8x256xf32>
    %165 = arith.addf %157, %164 : vector<8x256xf32>
    %c240_i32 = arith.constant 240 : i32
    %166 = tpu.dynamic_rotate %29 by %c240_i32 dim 1 : vector<8x256xf32>, i32 -> vector<8x256xf32>
    %c17 = arith.constant 17 : index
    %c0_70 = arith.constant 0 : index
    %167 = vector.load %arg14[%c17, %c0_70] : memref<25x256xf32, #tpu.memory_space<vmem>>, vector<1x256xf32>
    %168 = vector.broadcast %167 : vector<1x256xf32> to vector<8x256xf32>
    %169 = arith.mulf %166, %168 : vector<8x256xf32>
    %c0_71 = arith.constant 0 : index
    %c17_72 = arith.constant 17 : index
    %170 = vector.load %arg6[%c0_71, %c17_72] : memref<8x25xf32, #tpu.memory_space<vmem>>, vector<8x1xf32>
    %171 = vector.broadcast %170 : vector<8x1xf32> to vector<8x256xf32>
    %172 = arith.mulf %169, %171 : vector<8x256xf32>
    %173 = arith.addf %165, %172 : vector<8x256xf32>
    %c239_i32 = arith.constant 239 : i32
    %174 = tpu.dynamic_rotate %29 by %c239_i32 dim 1 : vector<8x256xf32>, i32 -> vector<8x256xf32>
    %c18 = arith.constant 18 : index
    %c0_73 = arith.constant 0 : index
    %175 = vector.load %arg14[%c18, %c0_73] : memref<25x256xf32, #tpu.memory_space<vmem>>, vector<1x256xf32>
    %176 = vector.broadcast %175 : vector<1x256xf32> to vector<8x256xf32>
    %177 = arith.mulf %174, %176 : vector<8x256xf32>
    %c0_74 = arith.constant 0 : index
    %c18_75 = arith.constant 18 : index
    %178 = vector.load %arg6[%c0_74, %c18_75] : memref<8x25xf32, #tpu.memory_space<vmem>>, vector<8x1xf32>
    %179 = vector.broadcast %178 : vector<8x1xf32> to vector<8x256xf32>
    %180 = arith.mulf %177, %179 : vector<8x256xf32>
    %181 = arith.addf %173, %180 : vector<8x256xf32>
    %c238_i32 = arith.constant 238 : i32
    %182 = tpu.dynamic_rotate %29 by %c238_i32 dim 1 : vector<8x256xf32>, i32 -> vector<8x256xf32>
    %c19 = arith.constant 19 : index
    %c0_76 = arith.constant 0 : index
    %183 = vector.load %arg14[%c19, %c0_76] : memref<25x256xf32, #tpu.memory_space<vmem>>, vector<1x256xf32>
    %184 = vector.broadcast %183 : vector<1x256xf32> to vector<8x256xf32>
    %185 = arith.mulf %182, %184 : vector<8x256xf32>
    %c0_77 = arith.constant 0 : index
    %c19_78 = arith.constant 19 : index
    %186 = vector.load %arg6[%c0_77, %c19_78] : memref<8x25xf32, #tpu.memory_space<vmem>>, vector<8x1xf32>
    %187 = vector.broadcast %186 : vector<8x1xf32> to vector<8x256xf32>
    %188 = arith.mulf %185, %187 : vector<8x256xf32>
    %189 = arith.addf %181, %188 : vector<8x256xf32>
    %c226_i32 = arith.constant 226 : i32
    %190 = tpu.dynamic_rotate %29 by %c226_i32 dim 1 : vector<8x256xf32>, i32 -> vector<8x256xf32>
    %c20 = arith.constant 20 : index
    %c0_79 = arith.constant 0 : index
    %191 = vector.load %arg14[%c20, %c0_79] : memref<25x256xf32, #tpu.memory_space<vmem>>, vector<1x256xf32>
    %192 = vector.broadcast %191 : vector<1x256xf32> to vector<8x256xf32>
    %193 = arith.mulf %190, %192 : vector<8x256xf32>
    %c0_80 = arith.constant 0 : index
    %c20_81 = arith.constant 20 : index
    %194 = vector.load %arg6[%c0_80, %c20_81] : memref<8x25xf32, #tpu.memory_space<vmem>>, vector<8x1xf32>
    %195 = vector.broadcast %194 : vector<8x1xf32> to vector<8x256xf32>
    %196 = arith.mulf %193, %195 : vector<8x256xf32>
    %197 = arith.addf %189, %196 : vector<8x256xf32>
    %c225_i32 = arith.constant 225 : i32
    %198 = tpu.dynamic_rotate %29 by %c225_i32 dim 1 : vector<8x256xf32>, i32 -> vector<8x256xf32>
    %c21 = arith.constant 21 : index
    %c0_82 = arith.constant 0 : index
    %199 = vector.load %arg14[%c21, %c0_82] : memref<25x256xf32, #tpu.memory_space<vmem>>, vector<1x256xf32>
    %200 = vector.broadcast %199 : vector<1x256xf32> to vector<8x256xf32>
    %201 = arith.mulf %198, %200 : vector<8x256xf32>
    %c0_83 = arith.constant 0 : index
    %c21_84 = arith.constant 21 : index
    %202 = vector.load %arg6[%c0_83, %c21_84] : memref<8x25xf32, #tpu.memory_space<vmem>>, vector<8x1xf32>
    %203 = vector.broadcast %202 : vector<8x1xf32> to vector<8x256xf32>
    %204 = arith.mulf %201, %203 : vector<8x256xf32>
    %205 = arith.addf %197, %204 : vector<8x256xf32>
    %c224_i32 = arith.constant 224 : i32
    %206 = tpu.dynamic_rotate %29 by %c224_i32 dim 1 : vector<8x256xf32>, i32 -> vector<8x256xf32>
    %c22 = arith.constant 22 : index
    %c0_85 = arith.constant 0 : index
    %207 = vector.load %arg14[%c22, %c0_85] : memref<25x256xf32, #tpu.memory_space<vmem>>, vector<1x256xf32>
    %208 = vector.broadcast %207 : vector<1x256xf32> to vector<8x256xf32>
    %209 = arith.mulf %206, %208 : vector<8x256xf32>
    %c0_86 = arith.constant 0 : index
    %c22_87 = arith.constant 22 : index
    %210 = vector.load %arg6[%c0_86, %c22_87] : memref<8x25xf32, #tpu.memory_space<vmem>>, vector<8x1xf32>
    %211 = vector.broadcast %210 : vector<8x1xf32> to vector<8x256xf32>
    %212 = arith.mulf %209, %211 : vector<8x256xf32>
    %213 = arith.addf %205, %212 : vector<8x256xf32>
    %c223_i32 = arith.constant 223 : i32
    %214 = tpu.dynamic_rotate %29 by %c223_i32 dim 1 : vector<8x256xf32>, i32 -> vector<8x256xf32>
    %c23 = arith.constant 23 : index
    %c0_88 = arith.constant 0 : index
    %215 = vector.load %arg14[%c23, %c0_88] : memref<25x256xf32, #tpu.memory_space<vmem>>, vector<1x256xf32>
    %216 = vector.broadcast %215 : vector<1x256xf32> to vector<8x256xf32>
    %217 = arith.mulf %214, %216 : vector<8x256xf32>
    %c0_89 = arith.constant 0 : index
    %c23_90 = arith.constant 23 : index
    %218 = vector.load %arg6[%c0_89, %c23_90] : memref<8x25xf32, #tpu.memory_space<vmem>>, vector<8x1xf32>
    %219 = vector.broadcast %218 : vector<8x1xf32> to vector<8x256xf32>
    %220 = arith.mulf %217, %219 : vector<8x256xf32>
    %221 = arith.addf %213, %220 : vector<8x256xf32>
    %c222_i32 = arith.constant 222 : i32
    %222 = tpu.dynamic_rotate %29 by %c222_i32 dim 1 : vector<8x256xf32>, i32 -> vector<8x256xf32>
    %c24 = arith.constant 24 : index
    %c0_91 = arith.constant 0 : index
    %223 = vector.load %arg14[%c24, %c0_91] : memref<25x256xf32, #tpu.memory_space<vmem>>, vector<1x256xf32>
    %224 = vector.broadcast %223 : vector<1x256xf32> to vector<8x256xf32>
    %225 = arith.mulf %222, %224 : vector<8x256xf32>
    %c0_92 = arith.constant 0 : index
    %c24_93 = arith.constant 24 : index
    %226 = vector.load %arg6[%c0_92, %c24_93] : memref<8x25xf32, #tpu.memory_space<vmem>>, vector<8x1xf32>
    %227 = vector.broadcast %226 : vector<8x1xf32> to vector<8x256xf32>
    %228 = arith.mulf %225, %227 : vector<8x256xf32>
    %229 = arith.addf %221, %228 : vector<8x256xf32>
    %c0_94 = arith.constant 0 : index
    %c0_95 = arith.constant 0 : index
    %230 = vector.load %arg7[%c0_94, %c0_95] : memref<8x1xf32, #tpu.memory_space<vmem>>, vector<8x1xf32>
    %231 = vector.broadcast %230 : vector<8x1xf32> to vector<8x256xf32>
    %232 = arith.addf %229, %231 : vector<8x256xf32>
    %cst_96 = arith.constant 0.000000e+00 : f32
    %233 = vector.broadcast %cst_96 : f32 to vector<8x256xf32>
    %234 = arith.subf %233, %232 : vector<8x256xf32>
    %235 = math.exp %234 : vector<8x256xf32>
    %cst_97 = arith.constant 1.000000e+00 : f32
    %236 = vector.broadcast %cst_97 : f32 to vector<8x256xf32>
    %237 = arith.addf %236, %235 : vector<8x256xf32>
    %cst_98 = arith.constant 1.000000e+00 : f32
    %238 = vector.broadcast %cst_98 : f32 to vector<8x256xf32>
    %239 = arith.divf %238, %237 : vector<8x256xf32>
    %240 = arith.mulf %232, %239 : vector<8x256xf32>
    %241 = tpu.concatenate %29, %240 in 0 : vector<8x256xf32>, vector<8x256xf32> -> vector<16x256xf32>
    %c17_i32_99 = arith.constant 17 : i32
    %242 = tpu.dynamic_rotate %241 by %c17_i32_99 dim 1 : vector<16x256xf32>, i32 -> vector<16x256xf32>
    %c6_100 = arith.constant 6 : index
    %c0_101 = arith.constant 0 : index
    %243 = vector.load %arg14[%c6_100, %c0_101] : memref<25x256xf32, #tpu.memory_space<vmem>>, vector<1x256xf32>
    %244 = vector.broadcast %243 : vector<1x256xf32> to vector<16x256xf32>
    %245 = arith.mulf %242, %244 : vector<16x256xf32>
    %c16_i32_102 = arith.constant 16 : i32
    %246 = tpu.dynamic_rotate %241 by %c16_i32_102 dim 1 : vector<16x256xf32>, i32 -> vector<16x256xf32>
    %c7_103 = arith.constant 7 : index
    %c0_104 = arith.constant 0 : index
    %247 = vector.load %arg14[%c7_103, %c0_104] : memref<25x256xf32, #tpu.memory_space<vmem>>, vector<1x256xf32>
    %248 = vector.broadcast %247 : vector<1x256xf32> to vector<16x256xf32>
    %249 = arith.mulf %246, %248 : vector<16x256xf32>
    %c15_i32_105 = arith.constant 15 : i32
    %250 = tpu.dynamic_rotate %241 by %c15_i32_105 dim 1 : vector<16x256xf32>, i32 -> vector<16x256xf32>
    %c8_106 = arith.constant 8 : index
    %c0_107 = arith.constant 0 : index
    %251 = vector.load %arg14[%c8_106, %c0_107] : memref<25x256xf32, #tpu.memory_space<vmem>>, vector<1x256xf32>
    %252 = vector.broadcast %251 : vector<1x256xf32> to vector<16x256xf32>
    %253 = arith.mulf %250, %252 : vector<16x256xf32>
    %c1_i32_108 = arith.constant 1 : i32
    %254 = tpu.dynamic_rotate %241 by %c1_i32_108 dim 1 : vector<16x256xf32>, i32 -> vector<16x256xf32>
    %c11_109 = arith.constant 11 : index
    %c0_110 = arith.constant 0 : index
    %255 = vector.load %arg14[%c11_109, %c0_110] : memref<25x256xf32, #tpu.memory_space<vmem>>, vector<1x256xf32>
    %256 = vector.broadcast %255 : vector<1x256xf32> to vector<16x256xf32>
    %257 = arith.mulf %254, %256 : vector<16x256xf32>
    %c12_111 = arith.constant 12 : index
    %c0_112 = arith.constant 0 : index
    %258 = vector.load %arg14[%c12_111, %c0_112] : memref<25x256xf32, #tpu.memory_space<vmem>>, vector<1x256xf32>
    %259 = vector.broadcast %258 : vector<1x256xf32> to vector<16x256xf32>
    %260 = arith.mulf %241, %259 : vector<16x256xf32>
    %c255_i32_113 = arith.constant 255 : i32
    %261 = tpu.dynamic_rotate %241 by %c255_i32_113 dim 1 : vector<16x256xf32>, i32 -> vector<16x256xf32>
    %c13_114 = arith.constant 13 : index
    %c0_115 = arith.constant 0 : index
    %262 = vector.load %arg14[%c13_114, %c0_115] : memref<25x256xf32, #tpu.memory_space<vmem>>, vector<1x256xf32>
    %263 = vector.broadcast %262 : vector<1x256xf32> to vector<16x256xf32>
    %264 = arith.mulf %261, %263 : vector<16x256xf32>
    %c241_i32_116 = arith.constant 241 : i32
    %265 = tpu.dynamic_rotate %241 by %c241_i32_116 dim 1 : vector<16x256xf32>, i32 -> vector<16x256xf32>
    %c16_117 = arith.constant 16 : index
    %c0_118 = arith.constant 0 : index
    %266 = vector.load %arg14[%c16_117, %c0_118] : memref<25x256xf32, #tpu.memory_space<vmem>>, vector<1x256xf32>
    %267 = vector.broadcast %266 : vector<1x256xf32> to vector<16x256xf32>
    %268 = arith.mulf %265, %267 : vector<16x256xf32>
    %c240_i32_119 = arith.constant 240 : i32
    %269 = tpu.dynamic_rotate %241 by %c240_i32_119 dim 1 : vector<16x256xf32>, i32 -> vector<16x256xf32>
    %c17_120 = arith.constant 17 : index
    %c0_121 = arith.constant 0 : index
    %270 = vector.load %arg14[%c17_120, %c0_121] : memref<25x256xf32, #tpu.memory_space<vmem>>, vector<1x256xf32>
    %271 = vector.broadcast %270 : vector<1x256xf32> to vector<16x256xf32>
    %272 = arith.mulf %269, %271 : vector<16x256xf32>
    %c239_i32_122 = arith.constant 239 : i32
    %273 = tpu.dynamic_rotate %241 by %c239_i32_122 dim 1 : vector<16x256xf32>, i32 -> vector<16x256xf32>
    %c18_123 = arith.constant 18 : index
    %c0_124 = arith.constant 0 : index
    %274 = vector.load %arg14[%c18_123, %c0_124] : memref<25x256xf32, #tpu.memory_space<vmem>>, vector<1x256xf32>
    %275 = vector.broadcast %274 : vector<1x256xf32> to vector<16x256xf32>
    %276 = arith.mulf %273, %275 : vector<16x256xf32>
    %277 = tpu.concatenate %245, %249, %253, %257, %260, %264, %268, %272, %276 in 0 : vector<16x256xf32>, vector<16x256xf32>, vector<16x256xf32>, vector<16x256xf32>, vector<16x256xf32>, vector<16x256xf32>, vector<16x256xf32>, vector<16x256xf32>, vector<16x256xf32> -> vector<144x256xf32>
    %c0_125 = arith.constant 0 : index
    %c0_126 = arith.constant 0 : index
    %278 = vector.load %arg8[%c0_125, %c0_126] : memref<16x144xf32, #tpu.memory_space<vmem>>, vector<16x144xf32>
    %cst_127 = arith.constant dense<0.000000e+00> : vector<16x256xf32>
    %279 = tpu.matmul %278, %277, %cst_127 {dimension_numbers = #tpu.dot_dimension_numbers<[1], [0], [0], [1], [0, 0, 1, 1], [], []>} : vector<16x144xf32>, vector<144x256xf32>, vector<16x256xf32> -> vector<16x256xf32>
    %c0_128 = arith.constant 0 : index
    %c0_129 = arith.constant 0 : index
    %280 = vector.load %arg9[%c0_128, %c0_129] : memref<16x1xf32, #tpu.memory_space<vmem>>, vector<16x1xf32>
    %281 = vector.broadcast %280 : vector<16x1xf32> to vector<16x256xf32>
    %282 = arith.addf %279, %281 : vector<16x256xf32>
    %cst_130 = arith.constant 0.000000e+00 : f32
    %283 = vector.broadcast %cst_130 : f32 to vector<16x256xf32>
    %c34_i32_131 = arith.constant 34 : i32
    %284 = tpu.dynamic_rotate %282 by %c34_i32_131 dim 1 : vector<16x256xf32>, i32 -> vector<16x256xf32>
    %c0_132 = arith.constant 0 : index
    %c0_133 = arith.constant 0 : index
    %285 = vector.load %arg14[%c0_132, %c0_133] : memref<25x256xf32, #tpu.memory_space<vmem>>, vector<1x256xf32>
    %286 = vector.broadcast %285 : vector<1x256xf32> to vector<16x256xf32>
    %287 = arith.mulf %284, %286 : vector<16x256xf32>
    %c0_134 = arith.constant 0 : index
    %c0_135 = arith.constant 0 : index
    %288 = vector.load %arg10[%c0_134, %c0_135] : memref<16x25xf32, #tpu.memory_space<vmem>>, vector<16x1xf32>
    %289 = vector.broadcast %288 : vector<16x1xf32> to vector<16x256xf32>
    %290 = arith.mulf %287, %289 : vector<16x256xf32>
    %291 = arith.addf %283, %290 : vector<16x256xf32>
    %c33_i32_136 = arith.constant 33 : i32
    %292 = tpu.dynamic_rotate %282 by %c33_i32_136 dim 1 : vector<16x256xf32>, i32 -> vector<16x256xf32>
    %c1_137 = arith.constant 1 : index
    %c0_138 = arith.constant 0 : index
    %293 = vector.load %arg14[%c1_137, %c0_138] : memref<25x256xf32, #tpu.memory_space<vmem>>, vector<1x256xf32>
    %294 = vector.broadcast %293 : vector<1x256xf32> to vector<16x256xf32>
    %295 = arith.mulf %292, %294 : vector<16x256xf32>
    %c0_139 = arith.constant 0 : index
    %c1_140 = arith.constant 1 : index
    %296 = vector.load %arg10[%c0_139, %c1_140] : memref<16x25xf32, #tpu.memory_space<vmem>>, vector<16x1xf32>
    %297 = vector.broadcast %296 : vector<16x1xf32> to vector<16x256xf32>
    %298 = arith.mulf %295, %297 : vector<16x256xf32>
    %299 = arith.addf %291, %298 : vector<16x256xf32>
    %c32_i32_141 = arith.constant 32 : i32
    %300 = tpu.dynamic_rotate %282 by %c32_i32_141 dim 1 : vector<16x256xf32>, i32 -> vector<16x256xf32>
    %c2_142 = arith.constant 2 : index
    %c0_143 = arith.constant 0 : index
    %301 = vector.load %arg14[%c2_142, %c0_143] : memref<25x256xf32, #tpu.memory_space<vmem>>, vector<1x256xf32>
    %302 = vector.broadcast %301 : vector<1x256xf32> to vector<16x256xf32>
    %303 = arith.mulf %300, %302 : vector<16x256xf32>
    %c0_144 = arith.constant 0 : index
    %c2_145 = arith.constant 2 : index
    %304 = vector.load %arg10[%c0_144, %c2_145] : memref<16x25xf32, #tpu.memory_space<vmem>>, vector<16x1xf32>
    %305 = vector.broadcast %304 : vector<16x1xf32> to vector<16x256xf32>
    %306 = arith.mulf %303, %305 : vector<16x256xf32>
    %307 = arith.addf %299, %306 : vector<16x256xf32>
    %c31_i32_146 = arith.constant 31 : i32
    %308 = tpu.dynamic_rotate %282 by %c31_i32_146 dim 1 : vector<16x256xf32>, i32 -> vector<16x256xf32>
    %c3_147 = arith.constant 3 : index
    %c0_148 = arith.constant 0 : index
    %309 = vector.load %arg14[%c3_147, %c0_148] : memref<25x256xf32, #tpu.memory_space<vmem>>, vector<1x256xf32>
    %310 = vector.broadcast %309 : vector<1x256xf32> to vector<16x256xf32>
    %311 = arith.mulf %308, %310 : vector<16x256xf32>
    %c0_149 = arith.constant 0 : index
    %c3_150 = arith.constant 3 : index
    %312 = vector.load %arg10[%c0_149, %c3_150] : memref<16x25xf32, #tpu.memory_space<vmem>>, vector<16x1xf32>
    %313 = vector.broadcast %312 : vector<16x1xf32> to vector<16x256xf32>
    %314 = arith.mulf %311, %313 : vector<16x256xf32>
    %315 = arith.addf %307, %314 : vector<16x256xf32>
    %c30_i32_151 = arith.constant 30 : i32
    %316 = tpu.dynamic_rotate %282 by %c30_i32_151 dim 1 : vector<16x256xf32>, i32 -> vector<16x256xf32>
    %c4_152 = arith.constant 4 : index
    %c0_153 = arith.constant 0 : index
    %317 = vector.load %arg14[%c4_152, %c0_153] : memref<25x256xf32, #tpu.memory_space<vmem>>, vector<1x256xf32>
    %318 = vector.broadcast %317 : vector<1x256xf32> to vector<16x256xf32>
    %319 = arith.mulf %316, %318 : vector<16x256xf32>
    %c0_154 = arith.constant 0 : index
    %c4_155 = arith.constant 4 : index
    %320 = vector.load %arg10[%c0_154, %c4_155] : memref<16x25xf32, #tpu.memory_space<vmem>>, vector<16x1xf32>
    %321 = vector.broadcast %320 : vector<16x1xf32> to vector<16x256xf32>
    %322 = arith.mulf %319, %321 : vector<16x256xf32>
    %323 = arith.addf %315, %322 : vector<16x256xf32>
    %c18_i32_156 = arith.constant 18 : i32
    %324 = tpu.dynamic_rotate %282 by %c18_i32_156 dim 1 : vector<16x256xf32>, i32 -> vector<16x256xf32>
    %c5_157 = arith.constant 5 : index
    %c0_158 = arith.constant 0 : index
    %325 = vector.load %arg14[%c5_157, %c0_158] : memref<25x256xf32, #tpu.memory_space<vmem>>, vector<1x256xf32>
    %326 = vector.broadcast %325 : vector<1x256xf32> to vector<16x256xf32>
    %327 = arith.mulf %324, %326 : vector<16x256xf32>
    %c0_159 = arith.constant 0 : index
    %c5_160 = arith.constant 5 : index
    %328 = vector.load %arg10[%c0_159, %c5_160] : memref<16x25xf32, #tpu.memory_space<vmem>>, vector<16x1xf32>
    %329 = vector.broadcast %328 : vector<16x1xf32> to vector<16x256xf32>
    %330 = arith.mulf %327, %329 : vector<16x256xf32>
    %331 = arith.addf %323, %330 : vector<16x256xf32>
    %c17_i32_161 = arith.constant 17 : i32
    %332 = tpu.dynamic_rotate %282 by %c17_i32_161 dim 1 : vector<16x256xf32>, i32 -> vector<16x256xf32>
    %c6_162 = arith.constant 6 : index
    %c0_163 = arith.constant 0 : index
    %333 = vector.load %arg14[%c6_162, %c0_163] : memref<25x256xf32, #tpu.memory_space<vmem>>, vector<1x256xf32>
    %334 = vector.broadcast %333 : vector<1x256xf32> to vector<16x256xf32>
    %335 = arith.mulf %332, %334 : vector<16x256xf32>
    %c0_164 = arith.constant 0 : index
    %c6_165 = arith.constant 6 : index
    %336 = vector.load %arg10[%c0_164, %c6_165] : memref<16x25xf32, #tpu.memory_space<vmem>>, vector<16x1xf32>
    %337 = vector.broadcast %336 : vector<16x1xf32> to vector<16x256xf32>
    %338 = arith.mulf %335, %337 : vector<16x256xf32>
    %339 = arith.addf %331, %338 : vector<16x256xf32>
    %c16_i32_166 = arith.constant 16 : i32
    %340 = tpu.dynamic_rotate %282 by %c16_i32_166 dim 1 : vector<16x256xf32>, i32 -> vector<16x256xf32>
    %c7_167 = arith.constant 7 : index
    %c0_168 = arith.constant 0 : index
    %341 = vector.load %arg14[%c7_167, %c0_168] : memref<25x256xf32, #tpu.memory_space<vmem>>, vector<1x256xf32>
    %342 = vector.broadcast %341 : vector<1x256xf32> to vector<16x256xf32>
    %343 = arith.mulf %340, %342 : vector<16x256xf32>
    %c0_169 = arith.constant 0 : index
    %c7_170 = arith.constant 7 : index
    %344 = vector.load %arg10[%c0_169, %c7_170] : memref<16x25xf32, #tpu.memory_space<vmem>>, vector<16x1xf32>
    %345 = vector.broadcast %344 : vector<16x1xf32> to vector<16x256xf32>
    %346 = arith.mulf %343, %345 : vector<16x256xf32>
    %347 = arith.addf %339, %346 : vector<16x256xf32>
    %c15_i32_171 = arith.constant 15 : i32
    %348 = tpu.dynamic_rotate %282 by %c15_i32_171 dim 1 : vector<16x256xf32>, i32 -> vector<16x256xf32>
    %c8_172 = arith.constant 8 : index
    %c0_173 = arith.constant 0 : index
    %349 = vector.load %arg14[%c8_172, %c0_173] : memref<25x256xf32, #tpu.memory_space<vmem>>, vector<1x256xf32>
    %350 = vector.broadcast %349 : vector<1x256xf32> to vector<16x256xf32>
    %351 = arith.mulf %348, %350 : vector<16x256xf32>
    %c0_174 = arith.constant 0 : index
    %c8_175 = arith.constant 8 : index
    %352 = vector.load %arg10[%c0_174, %c8_175] : memref<16x25xf32, #tpu.memory_space<vmem>>, vector<16x1xf32>
    %353 = vector.broadcast %352 : vector<16x1xf32> to vector<16x256xf32>
    %354 = arith.mulf %351, %353 : vector<16x256xf32>
    %355 = arith.addf %347, %354 : vector<16x256xf32>
    %c14_i32_176 = arith.constant 14 : i32
    %356 = tpu.dynamic_rotate %282 by %c14_i32_176 dim 1 : vector<16x256xf32>, i32 -> vector<16x256xf32>
    %c9_177 = arith.constant 9 : index
    %c0_178 = arith.constant 0 : index
    %357 = vector.load %arg14[%c9_177, %c0_178] : memref<25x256xf32, #tpu.memory_space<vmem>>, vector<1x256xf32>
    %358 = vector.broadcast %357 : vector<1x256xf32> to vector<16x256xf32>
    %359 = arith.mulf %356, %358 : vector<16x256xf32>
    %c0_179 = arith.constant 0 : index
    %c9_180 = arith.constant 9 : index
    %360 = vector.load %arg10[%c0_179, %c9_180] : memref<16x25xf32, #tpu.memory_space<vmem>>, vector<16x1xf32>
    %361 = vector.broadcast %360 : vector<16x1xf32> to vector<16x256xf32>
    %362 = arith.mulf %359, %361 : vector<16x256xf32>
    %363 = arith.addf %355, %362 : vector<16x256xf32>
    %c2_i32_181 = arith.constant 2 : i32
    %364 = tpu.dynamic_rotate %282 by %c2_i32_181 dim 1 : vector<16x256xf32>, i32 -> vector<16x256xf32>
    %c10_182 = arith.constant 10 : index
    %c0_183 = arith.constant 0 : index
    %365 = vector.load %arg14[%c10_182, %c0_183] : memref<25x256xf32, #tpu.memory_space<vmem>>, vector<1x256xf32>
    %366 = vector.broadcast %365 : vector<1x256xf32> to vector<16x256xf32>
    %367 = arith.mulf %364, %366 : vector<16x256xf32>
    %c0_184 = arith.constant 0 : index
    %c10_185 = arith.constant 10 : index
    %368 = vector.load %arg10[%c0_184, %c10_185] : memref<16x25xf32, #tpu.memory_space<vmem>>, vector<16x1xf32>
    %369 = vector.broadcast %368 : vector<16x1xf32> to vector<16x256xf32>
    %370 = arith.mulf %367, %369 : vector<16x256xf32>
    %371 = arith.addf %363, %370 : vector<16x256xf32>
    %c1_i32_186 = arith.constant 1 : i32
    %372 = tpu.dynamic_rotate %282 by %c1_i32_186 dim 1 : vector<16x256xf32>, i32 -> vector<16x256xf32>
    %c11_187 = arith.constant 11 : index
    %c0_188 = arith.constant 0 : index
    %373 = vector.load %arg14[%c11_187, %c0_188] : memref<25x256xf32, #tpu.memory_space<vmem>>, vector<1x256xf32>
    %374 = vector.broadcast %373 : vector<1x256xf32> to vector<16x256xf32>
    %375 = arith.mulf %372, %374 : vector<16x256xf32>
    %c0_189 = arith.constant 0 : index
    %c11_190 = arith.constant 11 : index
    %376 = vector.load %arg10[%c0_189, %c11_190] : memref<16x25xf32, #tpu.memory_space<vmem>>, vector<16x1xf32>
    %377 = vector.broadcast %376 : vector<16x1xf32> to vector<16x256xf32>
    %378 = arith.mulf %375, %377 : vector<16x256xf32>
    %379 = arith.addf %371, %378 : vector<16x256xf32>
    %c12_191 = arith.constant 12 : index
    %c0_192 = arith.constant 0 : index
    %380 = vector.load %arg14[%c12_191, %c0_192] : memref<25x256xf32, #tpu.memory_space<vmem>>, vector<1x256xf32>
    %381 = vector.broadcast %380 : vector<1x256xf32> to vector<16x256xf32>
    %382 = arith.mulf %282, %381 : vector<16x256xf32>
    %c0_193 = arith.constant 0 : index
    %c12_194 = arith.constant 12 : index
    %383 = vector.load %arg10[%c0_193, %c12_194] : memref<16x25xf32, #tpu.memory_space<vmem>>, vector<16x1xf32>
    %384 = vector.broadcast %383 : vector<16x1xf32> to vector<16x256xf32>
    %385 = arith.mulf %382, %384 : vector<16x256xf32>
    %386 = arith.addf %379, %385 : vector<16x256xf32>
    %c255_i32_195 = arith.constant 255 : i32
    %387 = tpu.dynamic_rotate %282 by %c255_i32_195 dim 1 : vector<16x256xf32>, i32 -> vector<16x256xf32>
    %c13_196 = arith.constant 13 : index
    %c0_197 = arith.constant 0 : index
    %388 = vector.load %arg14[%c13_196, %c0_197] : memref<25x256xf32, #tpu.memory_space<vmem>>, vector<1x256xf32>
    %389 = vector.broadcast %388 : vector<1x256xf32> to vector<16x256xf32>
    %390 = arith.mulf %387, %389 : vector<16x256xf32>
    %c0_198 = arith.constant 0 : index
    %c13_199 = arith.constant 13 : index
    %391 = vector.load %arg10[%c0_198, %c13_199] : memref<16x25xf32, #tpu.memory_space<vmem>>, vector<16x1xf32>
    %392 = vector.broadcast %391 : vector<16x1xf32> to vector<16x256xf32>
    %393 = arith.mulf %390, %392 : vector<16x256xf32>
    %394 = arith.addf %386, %393 : vector<16x256xf32>
    %c254_i32_200 = arith.constant 254 : i32
    %395 = tpu.dynamic_rotate %282 by %c254_i32_200 dim 1 : vector<16x256xf32>, i32 -> vector<16x256xf32>
    %c14_201 = arith.constant 14 : index
    %c0_202 = arith.constant 0 : index
    %396 = vector.load %arg14[%c14_201, %c0_202] : memref<25x256xf32, #tpu.memory_space<vmem>>, vector<1x256xf32>
    %397 = vector.broadcast %396 : vector<1x256xf32> to vector<16x256xf32>
    %398 = arith.mulf %395, %397 : vector<16x256xf32>
    %c0_203 = arith.constant 0 : index
    %c14_204 = arith.constant 14 : index
    %399 = vector.load %arg10[%c0_203, %c14_204] : memref<16x25xf32, #tpu.memory_space<vmem>>, vector<16x1xf32>
    %400 = vector.broadcast %399 : vector<16x1xf32> to vector<16x256xf32>
    %401 = arith.mulf %398, %400 : vector<16x256xf32>
    %402 = arith.addf %394, %401 : vector<16x256xf32>
    %c242_i32_205 = arith.constant 242 : i32
    %403 = tpu.dynamic_rotate %282 by %c242_i32_205 dim 1 : vector<16x256xf32>, i32 -> vector<16x256xf32>
    %c15_206 = arith.constant 15 : index
    %c0_207 = arith.constant 0 : index
    %404 = vector.load %arg14[%c15_206, %c0_207] : memref<25x256xf32, #tpu.memory_space<vmem>>, vector<1x256xf32>
    %405 = vector.broadcast %404 : vector<1x256xf32> to vector<16x256xf32>
    %406 = arith.mulf %403, %405 : vector<16x256xf32>
    %c0_208 = arith.constant 0 : index
    %c15_209 = arith.constant 15 : index
    %407 = vector.load %arg10[%c0_208, %c15_209] : memref<16x25xf32, #tpu.memory_space<vmem>>, vector<16x1xf32>
    %408 = vector.broadcast %407 : vector<16x1xf32> to vector<16x256xf32>
    %409 = arith.mulf %406, %408 : vector<16x256xf32>
    %410 = arith.addf %402, %409 : vector<16x256xf32>
    %c241_i32_210 = arith.constant 241 : i32
    %411 = tpu.dynamic_rotate %282 by %c241_i32_210 dim 1 : vector<16x256xf32>, i32 -> vector<16x256xf32>
    %c16_211 = arith.constant 16 : index
    %c0_212 = arith.constant 0 : index
    %412 = vector.load %arg14[%c16_211, %c0_212] : memref<25x256xf32, #tpu.memory_space<vmem>>, vector<1x256xf32>
    %413 = vector.broadcast %412 : vector<1x256xf32> to vector<16x256xf32>
    %414 = arith.mulf %411, %413 : vector<16x256xf32>
    %c0_213 = arith.constant 0 : index
    %c16_214 = arith.constant 16 : index
    %415 = vector.load %arg10[%c0_213, %c16_214] : memref<16x25xf32, #tpu.memory_space<vmem>>, vector<16x1xf32>
    %416 = vector.broadcast %415 : vector<16x1xf32> to vector<16x256xf32>
    %417 = arith.mulf %414, %416 : vector<16x256xf32>
    %418 = arith.addf %410, %417 : vector<16x256xf32>
    %c240_i32_215 = arith.constant 240 : i32
    %419 = tpu.dynamic_rotate %282 by %c240_i32_215 dim 1 : vector<16x256xf32>, i32 -> vector<16x256xf32>
    %c17_216 = arith.constant 17 : index
    %c0_217 = arith.constant 0 : index
    %420 = vector.load %arg14[%c17_216, %c0_217] : memref<25x256xf32, #tpu.memory_space<vmem>>, vector<1x256xf32>
    %421 = vector.broadcast %420 : vector<1x256xf32> to vector<16x256xf32>
    %422 = arith.mulf %419, %421 : vector<16x256xf32>
    %c0_218 = arith.constant 0 : index
    %c17_219 = arith.constant 17 : index
    %423 = vector.load %arg10[%c0_218, %c17_219] : memref<16x25xf32, #tpu.memory_space<vmem>>, vector<16x1xf32>
    %424 = vector.broadcast %423 : vector<16x1xf32> to vector<16x256xf32>
    %425 = arith.mulf %422, %424 : vector<16x256xf32>
    %426 = arith.addf %418, %425 : vector<16x256xf32>
    %c239_i32_220 = arith.constant 239 : i32
    %427 = tpu.dynamic_rotate %282 by %c239_i32_220 dim 1 : vector<16x256xf32>, i32 -> vector<16x256xf32>
    %c18_221 = arith.constant 18 : index
    %c0_222 = arith.constant 0 : index
    %428 = vector.load %arg14[%c18_221, %c0_222] : memref<25x256xf32, #tpu.memory_space<vmem>>, vector<1x256xf32>
    %429 = vector.broadcast %428 : vector<1x256xf32> to vector<16x256xf32>
    %430 = arith.mulf %427, %429 : vector<16x256xf32>
    %c0_223 = arith.constant 0 : index
    %c18_224 = arith.constant 18 : index
    %431 = vector.load %arg10[%c0_223, %c18_224] : memref<16x25xf32, #tpu.memory_space<vmem>>, vector<16x1xf32>
    %432 = vector.broadcast %431 : vector<16x1xf32> to vector<16x256xf32>
    %433 = arith.mulf %430, %432 : vector<16x256xf32>
    %434 = arith.addf %426, %433 : vector<16x256xf32>
    %c238_i32_225 = arith.constant 238 : i32
    %435 = tpu.dynamic_rotate %282 by %c238_i32_225 dim 1 : vector<16x256xf32>, i32 -> vector<16x256xf32>
    %c19_226 = arith.constant 19 : index
    %c0_227 = arith.constant 0 : index
    %436 = vector.load %arg14[%c19_226, %c0_227] : memref<25x256xf32, #tpu.memory_space<vmem>>, vector<1x256xf32>
    %437 = vector.broadcast %436 : vector<1x256xf32> to vector<16x256xf32>
    %438 = arith.mulf %435, %437 : vector<16x256xf32>
    %c0_228 = arith.constant 0 : index
    %c19_229 = arith.constant 19 : index
    %439 = vector.load %arg10[%c0_228, %c19_229] : memref<16x25xf32, #tpu.memory_space<vmem>>, vector<16x1xf32>
    %440 = vector.broadcast %439 : vector<16x1xf32> to vector<16x256xf32>
    %441 = arith.mulf %438, %440 : vector<16x256xf32>
    %442 = arith.addf %434, %441 : vector<16x256xf32>
    %c226_i32_230 = arith.constant 226 : i32
    %443 = tpu.dynamic_rotate %282 by %c226_i32_230 dim 1 : vector<16x256xf32>, i32 -> vector<16x256xf32>
    %c20_231 = arith.constant 20 : index
    %c0_232 = arith.constant 0 : index
    %444 = vector.load %arg14[%c20_231, %c0_232] : memref<25x256xf32, #tpu.memory_space<vmem>>, vector<1x256xf32>
    %445 = vector.broadcast %444 : vector<1x256xf32> to vector<16x256xf32>
    %446 = arith.mulf %443, %445 : vector<16x256xf32>
    %c0_233 = arith.constant 0 : index
    %c20_234 = arith.constant 20 : index
    %447 = vector.load %arg10[%c0_233, %c20_234] : memref<16x25xf32, #tpu.memory_space<vmem>>, vector<16x1xf32>
    %448 = vector.broadcast %447 : vector<16x1xf32> to vector<16x256xf32>
    %449 = arith.mulf %446, %448 : vector<16x256xf32>
    %450 = arith.addf %442, %449 : vector<16x256xf32>
    %c225_i32_235 = arith.constant 225 : i32
    %451 = tpu.dynamic_rotate %282 by %c225_i32_235 dim 1 : vector<16x256xf32>, i32 -> vector<16x256xf32>
    %c21_236 = arith.constant 21 : index
    %c0_237 = arith.constant 0 : index
    %452 = vector.load %arg14[%c21_236, %c0_237] : memref<25x256xf32, #tpu.memory_space<vmem>>, vector<1x256xf32>
    %453 = vector.broadcast %452 : vector<1x256xf32> to vector<16x256xf32>
    %454 = arith.mulf %451, %453 : vector<16x256xf32>
    %c0_238 = arith.constant 0 : index
    %c21_239 = arith.constant 21 : index
    %455 = vector.load %arg10[%c0_238, %c21_239] : memref<16x25xf32, #tpu.memory_space<vmem>>, vector<16x1xf32>
    %456 = vector.broadcast %455 : vector<16x1xf32> to vector<16x256xf32>
    %457 = arith.mulf %454, %456 : vector<16x256xf32>
    %458 = arith.addf %450, %457 : vector<16x256xf32>
    %c224_i32_240 = arith.constant 224 : i32
    %459 = tpu.dynamic_rotate %282 by %c224_i32_240 dim 1 : vector<16x256xf32>, i32 -> vector<16x256xf32>
    %c22_241 = arith.constant 22 : index
    %c0_242 = arith.constant 0 : index
    %460 = vector.load %arg14[%c22_241, %c0_242] : memref<25x256xf32, #tpu.memory_space<vmem>>, vector<1x256xf32>
    %461 = vector.broadcast %460 : vector<1x256xf32> to vector<16x256xf32>
    %462 = arith.mulf %459, %461 : vector<16x256xf32>
    %c0_243 = arith.constant 0 : index
    %c22_244 = arith.constant 22 : index
    %463 = vector.load %arg10[%c0_243, %c22_244] : memref<16x25xf32, #tpu.memory_space<vmem>>, vector<16x1xf32>
    %464 = vector.broadcast %463 : vector<16x1xf32> to vector<16x256xf32>
    %465 = arith.mulf %462, %464 : vector<16x256xf32>
    %466 = arith.addf %458, %465 : vector<16x256xf32>
    %c223_i32_245 = arith.constant 223 : i32
    %467 = tpu.dynamic_rotate %282 by %c223_i32_245 dim 1 : vector<16x256xf32>, i32 -> vector<16x256xf32>
    %c23_246 = arith.constant 23 : index
    %c0_247 = arith.constant 0 : index
    %468 = vector.load %arg14[%c23_246, %c0_247] : memref<25x256xf32, #tpu.memory_space<vmem>>, vector<1x256xf32>
    %469 = vector.broadcast %468 : vector<1x256xf32> to vector<16x256xf32>
    %470 = arith.mulf %467, %469 : vector<16x256xf32>
    %c0_248 = arith.constant 0 : index
    %c23_249 = arith.constant 23 : index
    %471 = vector.load %arg10[%c0_248, %c23_249] : memref<16x25xf32, #tpu.memory_space<vmem>>, vector<16x1xf32>
    %472 = vector.broadcast %471 : vector<16x1xf32> to vector<16x256xf32>
    %473 = arith.mulf %470, %472 : vector<16x256xf32>
    %474 = arith.addf %466, %473 : vector<16x256xf32>
    %c222_i32_250 = arith.constant 222 : i32
    %475 = tpu.dynamic_rotate %282 by %c222_i32_250 dim 1 : vector<16x256xf32>, i32 -> vector<16x256xf32>
    %c24_251 = arith.constant 24 : index
    %c0_252 = arith.constant 0 : index
    %476 = vector.load %arg14[%c24_251, %c0_252] : memref<25x256xf32, #tpu.memory_space<vmem>>, vector<1x256xf32>
    %477 = vector.broadcast %476 : vector<1x256xf32> to vector<16x256xf32>
    %478 = arith.mulf %475, %477 : vector<16x256xf32>
    %c0_253 = arith.constant 0 : index
    %c24_254 = arith.constant 24 : index
    %479 = vector.load %arg10[%c0_253, %c24_254] : memref<16x25xf32, #tpu.memory_space<vmem>>, vector<16x1xf32>
    %480 = vector.broadcast %479 : vector<16x1xf32> to vector<16x256xf32>
    %481 = arith.mulf %478, %480 : vector<16x256xf32>
    %482 = arith.addf %474, %481 : vector<16x256xf32>
    %c0_255 = arith.constant 0 : index
    %c0_256 = arith.constant 0 : index
    %483 = vector.load %arg11[%c0_255, %c0_256] : memref<16x1xf32, #tpu.memory_space<vmem>>, vector<16x1xf32>
    %484 = vector.broadcast %483 : vector<16x1xf32> to vector<16x256xf32>
    %485 = arith.addf %482, %484 : vector<16x256xf32>
    %486 = tpu.concatenate %16, %282, %485, %15 in 0 : vector<32x256xf32>, vector<16x256xf32>, vector<16x256xf32>, vector<32x256xf32> -> vector<96x256xf32>
    %c0_257 = arith.constant 0 : index
    %c0_258 = arith.constant 0 : index
    %487 = vector.load %arg12[%c0_257, %c0_258] : memref<64x96xf32, #tpu.memory_space<vmem>>, vector<64x96xf32>
    %cst_259 = arith.constant dense<0.000000e+00> : vector<64x256xf32>
    %488 = tpu.matmul %487, %486, %cst_259 {dimension_numbers = #tpu.dot_dimension_numbers<[1], [0], [0], [1], [0, 0, 1, 1], [], []>} : vector<64x96xf32>, vector<96x256xf32>, vector<64x256xf32> -> vector<64x256xf32>
    %c0_260 = arith.constant 0 : index
    %c0_261 = arith.constant 0 : index
    %489 = vector.load %arg13[%c0_260, %c0_261] : memref<64x1xf32, #tpu.memory_space<vmem>>, vector<64x1xf32>
    %490 = vector.broadcast %489 : vector<64x1xf32> to vector<64x256xf32>
    %491 = arith.addf %488, %490 : vector<64x256xf32>
    %cst_262 = arith.constant 0.000000e+00 : f32
    %492 = vector.broadcast %cst_262 : f32 to vector<64x256xf32>
    %493 = arith.subf %492, %491 : vector<64x256xf32>
    %494 = math.exp %493 : vector<64x256xf32>
    %cst_263 = arith.constant 1.000000e+00 : f32
    %495 = vector.broadcast %cst_263 : f32 to vector<64x256xf32>
    %496 = arith.addf %495, %494 : vector<64x256xf32>
    %cst_264 = arith.constant 1.000000e+00 : f32
    %497 = vector.broadcast %cst_264 : f32 to vector<64x256xf32>
    %498 = arith.divf %497, %496 : vector<64x256xf32>
    %499 = arith.mulf %491, %498 : vector<64x256xf32>
    %c0_265 = arith.constant 0 : index
    %c0_266 = arith.constant 0 : index
    %c0_267 = arith.constant 0 : index
    %500 = vector.load %arg15[%c0_265, %c0_266, %c0_267] : memref<1x64x256xf32, #tpu.memory_space<vmem>>, vector<1x64x256xf32>
    %501 = vector.shape_cast %500 : vector<1x64x256xf32> to vector<64x256xf32>
    %502 = vector.shape_cast %499 : vector<64x256xf32> to vector<1x64x256xf32>
    tpu.vector_store %arg15[%c0_265, %c0_266, %c0_267], %502 {strides = array<i32>} : memref<1x64x256xf32, #tpu.memory_space<vmem>>, vector<1x64x256xf32>,
    return
  }
  func.func @transform_0(%arg0: i32) -> (i32, i32, i32) {
    %c0_i32 = arith.constant 0 : i32
    %c0_i32_0 = arith.constant 0 : i32
    %c0_i32_1 = arith.constant 0 : i32
    return %arg0, %c0_i32, %c0_i32_0 : i32, i32, i32
  }
  func.func @transform_1(%arg0: i32) -> (i32, i32) {
    %c0_i32 = arith.constant 0 : i32
    %c0_i32_0 = arith.constant 0 : i32
    %c0_i32_1 = arith.constant 0 : i32
    return %c0_i32, %c0_i32_0 : i32, i32
  }
  func.func @transform_2(%arg0: i32) -> (i32, i32) {
    %c0_i32 = arith.constant 0 : i32
    %c0_i32_0 = arith.constant 0 : i32
    %c0_i32_1 = arith.constant 0 : i32
    return %c0_i32, %c0_i32_0 : i32, i32
  }
  func.func @transform_3(%arg0: i32) -> (i32, i32) {
    %c0_i32 = arith.constant 0 : i32
    %c0_i32_0 = arith.constant 0 : i32
    %c0_i32_1 = arith.constant 0 : i32
    return %c0_i32, %c0_i32_0 : i32, i32
  }
  func.func @transform_4(%arg0: i32) -> (i32, i32) {
    %c0_i32 = arith.constant 0 : i32
    %c0_i32_0 = arith.constant 0 : i32
    %c0_i32_1 = arith.constant 0 : i32
    return %c0_i32, %c0_i32_0 : i32, i32
  }
  func.func @transform_5(%arg0: i32) -> (i32, i32) {
    %c0_i32 = arith.constant 0 : i32
    %c0_i32_0 = arith.constant 0 : i32
    %c0_i32_1 = arith.constant 0 : i32
    return %c0_i32, %c0_i32_0 : i32, i32
  }
  func.func @transform_6(%arg0: i32) -> (i32, i32) {
    %c0_i32 = arith.constant 0 : i32
    %c0_i32_0 = arith.constant 0 : i32
    %c0_i32_1 = arith.constant 0 : i32
    return %c0_i32, %c0_i32_0 : i32, i32
  }
  func.func @transform_7(%arg0: i32) -> (i32, i32) {
    %c0_i32 = arith.constant 0 : i32
    %c0_i32_0 = arith.constant 0 : i32
    %c0_i32_1 = arith.constant 0 : i32
    return %c0_i32, %c0_i32_0 : i32, i32
  }
  func.func @transform_8(%arg0: i32) -> (i32, i32) {
    %c0_i32 = arith.constant 0 : i32
    %c0_i32_0 = arith.constant 0 : i32
    %c0_i32_1 = arith.constant 0 : i32
    return %c0_i32, %c0_i32_0 : i32, i32
  }
  func.func @transform_9(%arg0: i32) -> (i32, i32) {
    %c0_i32 = arith.constant 0 : i32
    %c0_i32_0 = arith.constant 0 : i32
    %c0_i32_1 = arith.constant 0 : i32
    return %c0_i32, %c0_i32_0 : i32, i32
  }
  func.func @transform_10(%arg0: i32) -> (i32, i32) {
    %c0_i32 = arith.constant 0 : i32
    %c0_i32_0 = arith.constant 0 : i32
    %c0_i32_1 = arith.constant 0 : i32
    return %c0_i32, %c0_i32_0 : i32, i32
  }
  func.func @transform_11(%arg0: i32) -> (i32, i32) {
    %c0_i32 = arith.constant 0 : i32
    %c0_i32_0 = arith.constant 0 : i32
    %c0_i32_1 = arith.constant 0 : i32
    return %c0_i32, %c0_i32_0 : i32, i32
  }
  func.func @transform_12(%arg0: i32) -> (i32, i32) {
    %c0_i32 = arith.constant 0 : i32
    %c0_i32_0 = arith.constant 0 : i32
    %c0_i32_1 = arith.constant 0 : i32
    return %c0_i32, %c0_i32_0 : i32, i32
  }
  func.func @transform_13(%arg0: i32) -> (i32, i32) {
    %c0_i32 = arith.constant 0 : i32
    %c0_i32_0 = arith.constant 0 : i32
    %c0_i32_1 = arith.constant 0 : i32
    return %c0_i32, %c0_i32_0 : i32, i32
  }
  func.func @transform_14(%arg0: i32) -> (i32, i32, i32) {
    %c0_i32 = arith.constant 0 : i32
    %c0_i32_0 = arith.constant 0 : i32
    %c0_i32_1 = arith.constant 0 : i32
    return %arg0, %c0_i32, %c0_i32_0 : i32, i32, i32
  }
}

</mosaic_0001>

<bundles_post_ra>
// kernel: vovgscsp_forward.1
= control target key start
LH: loop header
LB: loop body
LE: loop exit
PB: predicated region body
PF: predicated region fallthrough
CT: control target
= control target key end

     0   :  { %s3566_s29 = smov 0   ;;  %s5878_s0 = inlined_call_operand.vmem [shape: f32[2,64,256], index: 0, kind: input, shape index: {}]   ;;  %s5879_s1 = inlined_call_operand.vmem [shape: f32[64,64], index: 1, kind: input, shape index: {}]   ;;  %s5880_s2 = inlined_call_operand.vmem [shape: f32[64,1], index: 2, kind: input, shape index: {}]   ;;  %s5881_s3 = inlined_call_operand.vmem [shape: f32[8,32], index: 3, kind: input, shape index: {}]   ;;  %s5882_s4 = inlined_call_operand.vmem [shape: f32[8,1], index: 4, kind: input, shape index: {}]   ;;  %s5883_s5 = inlined_call_operand.vmem [shape: f32[8,25], index: 5, kind: input, shape index: {}]   ;;  %s5884_s6 = inlined_call_operand.vmem [shape: f32[8,1], index: 6, kind: input, shape index: {}]   ;;  %s5885_s7 = inlined_call_operand.vmem [shape: f32[16,144], index: 7, kind: input, shape index: {}]   ;;  %s5886_s8 = inlined_call_operand.vmem [shape: f32[16,1], index: 8, kind: input, shape index: {}]   ;;  %s5887_s9 = inlined_call_operand.vmem [shape: f32[16,25], index: 9, kind: input, shape index: {}]   ;;  %s5888_s10 = inlined_call_operand.vmem [shape: f32[16,1], index: 10, kind: input, shape index: {}]   ;;  %s5889_s11 = inlined_call_operand.vmem [shape: f32[64,96], index: 11, kind: input, shape index: {}]   ;;  %s5890_s12 = inlined_call_operand.vmem [shape: f32[64,1], index: 12, kind: input, shape index: {}]   ;;  %s5891_s13 = inlined_call_operand.vmem [shape: f32[25,256], index: 13, kind: input, shape index: {}]   ;;  %s5892_s14 = inlined_call_operand.vmem [shape: f32[2,64,256], index: 14, kind: output, shape index: {}]  }
   0x1   :  { %6151 = sst [smem:[#allocation92_spill]] %s5878_s0 }
   0x2   :  { %6152 = sst [smem:[#allocation93_spill]] %s5879_s1 }
   0x3   :  { %6153 = sst [smem:[#allocation94_spill]] %s5880_s2 }
   0x4   :  { %6154 = sst [smem:[#allocation95_spill]] %s5881_s3 }
   0x5   :  { %6155 = sst [smem:[#allocation96_spill]] %s5882_s4 }
   0x6   :  { %6156 = sst [smem:[#allocation97_spill]] %s5883_s5 }
   0x7   :  { %6157 = sst [smem:[#allocation98_spill]] %s5884_s6 }
   0x8   :  { %6158 = sst [smem:[#allocation99_spill]] %s5885_s7 }
   0x9   :  { %6159 = sst [smem:[#allocation100_spill]] %s5886_s8 }
   0xa   :  { %6160 = sst [smem:[#allocation101_spill]] %s5887_s9 }
   0xb LB: > { %s3005_s30 = sadd.s32 4294967295, %s3439_s29   ;;  %p3009_p0 = scmp.ge.s32.totalorder %s3439_s29, 1  ;;  %s3439_s29 = sphi %s3566_s29, %s24_s29  }
   0xc   : > { %p412_p1 = scmp.lt.s32.totalorder %s3439_s29, 3 }
   0xe   : > { %p413_p2 = pnand %p3009_p0, %p412_p1 }
  0x10   : > { %416 = sbr.rel (%p413_p2) target bundleno = 1912 (0x778), region = 76 }
  0x17   : > { %p458_p3 = scmp.lt.s32.totalorder %s3005_s30, 1  ;;  %v5926_v0 = vmov 0.0   ;;  %s6161_s2 = sld [smem:[#allocation94_spill]]  ;;  %v5934_v3 = vmov 0   ;;  %vm540_vm0 = vcmask 523264   ;;  %v3443_v38 = vmov 1  }
  0x18   : > { %629 = vmatprep.mubr.f32.mxu0 %v5926_v0  ;;  %665 = vmatprep.mubr.f32.mxu1 %v5926_v0  ;;  %s6162_s0 = sld [smem:[#allocation92_spill]]  ;;  %s6163_s4 = sld [smem:[#allocation96_spill]]  ;;  %v5986_v39 = vmov 4   ;;  %v5984_v40 = vmov 5   ;;  %v5982_v41 = vmov 6   ;;  %v5979_v42 = vmov 7  }
  0x19   : > { %s6530_s30 = smov (!%p458_p3, %s3005_s30), 1  ;;  %3211 = vset.pattern.permute.xlu0 %v5934_v3  ;;  %3212 = vset.pattern.permute.xlu1 %v5934_v3  ;;  %s6164_s5 = sld [smem:[#allocation97_spill]]  ;;  %v5977_v43 = vmov 8   ;;  %v5975_v44 = vmov 9   ;;  %v5973_v45 = vmov 10   ;;  %v5971_v46 = vmov 11  }
  0x1a   : > { %s5893_s19 = sshll.u32 %s6530_s30, 7  ;;  %s6165_s1 = sld [smem:[#allocation93_spill]]  ;;  %v5969_v47 = vmov 12   ;;  %v5967_v50 = vmov 13   ;;  %v5988_v58 = vmov 2   ;;  %v5963_v62 = vmov 16  }
  0x1b   : > { %s6170_s3 = sld [smem:[#allocation95_spill]]  ;;  %vm797_vm1 = vcmask 261120   ;;  %s5914_s18 = smov 32  }
  0x1c   : > { %s5896_s20 = smov 34   ;;  %s5898_s21 = smov 126  }
  0x1d   : > { %v492_v1 = vld [vmem:[%s6161_s2] sm:$0xff]  ;;  %v494_v2 = vld [vmem:[%s6161_s2 + $0x10] sm:$0xff]  ;;  %v493_v4 = vld [vmem:[%s6161_s2 + $0x8] sm:$0xff]  ;;  %s5894_s22 = smov 33   ;;  %s5920_s23 = smov 31  }
  0x1e   : > { %502 = vperm.xlu0 %3211, %v492_v1   ;;  %512 = vperm.xlu1 %3212, %v494_v2   ;;  %v495_v5 = vld [vmem:[%s6161_s2 + $0x18] sm:$0xff]  ;;  %s3598_s26 = scalar_lea.vmem %s6162_s0, %s5893_s19  ;;  %v791_v9 = vld [vmem:[%s6163_s4] sm:$0xff]  ;;  %s5918_s24 = smov 30  }
  0x1f   : > { %v469_v6 = vld [vmem:[%s3598_s26 + $0x8] sm:$0xff]  ;;  %v471_v7 = vld [vmem:[%s3598_s26 + $0x18] sm:$0xff]  ;;  %v468_v8 = vld [vmem:[%s3598_s26] sm:$0xff]  ;;  %s5916_s25 = smov 18   ;;  %s5954_s27 = smov 16  }
  0x20   : > { %v3061_v10 = vpack.c.bf16 %v471_v7, %v469_v6  ;;  %v470_v11 = vld [vmem:[%s3598_s26 + $0x10] sm:$0xff]  ;;  %v473_v12 = vld [vmem:[%s3598_s26 + $0x28] sm:$0xff]  ;;  %v475_v13 = vld [vmem:[%s3598_s26 + $0x38] sm:$0xff]  ;;  %s5922_s28 = smov 15   ;;  %s5908_s15 = smov 127  }
  0x21   : > { %v3063_v14 = vpack.c.bf16 %v470_v11, %v468_v8  ;;  %v3065_v15 = vpack.c.bf16 %v475_v13, %v473_v12  ;;  %v472_v16 = vld [vmem:[%s3598_s26 + $0x20] sm:$0xff]  ;;  %v474_v17 = vld [vmem:[%s3598_s26 + $0x30] sm:$0xff]  ;;  %v477_v18 = vld [vmem:[%s3598_s26 + $0x48] sm:$0xff]  ;;  %s5906_s16 = smov 14   ;;  %s5900_s17 = smov 2  }
  0x22   : > { %507 = vperm.xlu0 %3211, %v493_v4   ;;  %517 = vperm.xlu1 %3212, %v495_v5   ;;  %v479_v19 = vld [vmem:[%s3598_s26 + $0x58] sm:$0xff]  ;;  %v3616_v20 = vld [vmem:[%s6164_s5] sm:$0xff]  ;;  %v3067_v21 = vpack.c.bf16 %v474_v17, %v472_v16  ;;  %v478_v24 = vld [vmem:[%s3598_s26 + $0x50] sm:$0xff]  ;;  %s5902_s19 = smov 1   ;;  %s6175_s6 = sld [smem:[#allocation98_spill]] }
  0x23   : > { %3062 = vmatprep.subr.bf16.mxu0 %v3061_v10  ;;  %3145 = vmatprep.subr.bf16.mxu1 %v3061_v10  ;;  %v3069_v22 = vpack.c.bf16 %v479_v19, %v477_v18  ;;  %v476_v23 = vld [vmem:[%s3598_s26 + $0x40] sm:$0xff]  ;;  %v481_v25 = vld [vmem:[%s3598_s26 + $0x68] sm:$0xff]  ;;  %v483_v26 = vld [vmem:[%s3598_s26 + $0x78] sm:$0xff]  ;;  %s6186_s8 = sld [smem:[#allocation100_spill]]  ;;  %s6189_s9 = sld [smem:[#allocation101_spill]] }
  0x24   : > { %3064 = vmatpush1.bf16.msra.mxu0 %v3063_v14  ;;  %3149 = vmatpush1.bf16.msra.mxu1 %v3063_v14  ;;  %v3071_v27 = vpack.c.bf16 %v478_v24, %v476_v23  ;;  %v3073_v28 = vpack.c.bf16 %v483_v26, %v481_v25  ;;  %v480_v29 = vld [vmem:[%s3598_s26 + $0x60] sm:$0xff]  ;;  %v482_v30 = vld [vmem:[%s3598_s26 + $0x70] sm:$0xff]  ;;  %v485_v33 = vld [vmem:[%s6165_s1 + $0x8] sm:$0xff]  ;;  %s5924_s26 = smov 17   ;;  %s6267_s7 = sld [smem:[#allocation99_spill]] }
  0x25   : > { %3066 = vmatprep.subr.bf16.mxu0 %v3065_v15  ;;  %3146 = vmatprep.subr.bf16.mxu1 %v3065_v15  ;;  %v3075_v31 = vpack.c.bf16 %v482_v30, %v480_v29  ;;  %v484_v32 = vld [vmem:[%s6165_s1] sm:$0xff]  ;;  %v486_v34 = vld [vmem:[%s6165_s1 + $0x10] sm:$0xff]  ;;  %v487_v35 = vld [vmem:[%s6165_s1 + $0x18] sm:$0xff]  ;;  %s6323_s4 = smov 30   ;;  %s6324_s5 = smov 33  }
  0x26   : > { %794 = vperm.xlu0 %3211, %v791_v9   ;;  %912 = vperm.xlu1 %3212, %v3616_v20   ;;  %v490_v36 = vld [vmem:[%s6165_s1 + $0x30] sm:$0xff]  ;;  %v491_v37 = vld [vmem:[%s6165_s1 + $0x38] sm:$0xff]  ;;  %s6325_s0 = smov 18  }
  0x28   : > { %3068 = vmatpush1.bf16.msra.mxu0 %v3067_v21  ;;  %3150 = vmatpush1.bf16.msra.mxu1 %v3067_v21 }
  0x29   : > { %3070 = vmatprep.subr.bf16.mxu0 %v3069_v22  ;;  %3147 = vmatprep.subr.bf16.mxu1 %v3069_v22 }
  0x2a   : > { %3213 = vset.pattern.permute.xlu0 %v3443_v38  ;;  %3214 = vset.pattern.permute.xlu1 %v5988_v58 }
  0x2b   : > { %942 = vperm.xlu0 %3213, %v3616_v20   ;;  %972 = vperm.xlu1 %3214, %v3616_v20  }
  0x2c   : > { %3072 = vmatpush1.bf16.msra.mxu0 %v3071_v27  ;;  %3151 = vmatpush1.bf16.msra.mxu1 %v3071_v27 }
  0x2d   : > { %3074 = vmatprep.subr.bf16.mxu0 %v3073_v28  ;;  %3148 = vmatprep.subr.bf16.mxu1 %v3073_v28 }
  0x2f   : > { %3216 = vset.pattern.permute.xlu0 %v5986_v39 }
  0x30   : > { %3076 = vmatpush1.bf16.msra.mxu0 %v3075_v31  ;;  %3152 = vmatpush1.bf16.msra.mxu1 %v3075_v31 }
  0x31   : > { %1032 = vperm.xlu0 %3216, %v3616_v20  }
  0x33   : > { %3014 = vmatmul.mubr.msk.f32.vlgmr.msra.gmra.mrb[0].mxu0 %vm540_vm0, %v484_v32  ;;  %3020 = vmatmul.mubr.msk.f32.vlgmr.msra.gmra.mrb[0].mxu1 %vm540_vm0, %v490_v36 }
  0x34   : > { %635 = vmatprep.mubr.f32.mxu0 %v5926_v0  ;;  %671 = vmatprep.mubr.f32.mxu1 %v5926_v0 }
  0x35   : > { %3217 = vset.pattern.permute.xlu0 %v5984_v40 }
  0x36   : > { %1062 = vperm.xlu0 %3217, %v3616_v20  }
  0x37   : > { %3015 = vmatmul.mubr.msk.f32.gmra.mrb[2].mxu0 %vm540_vm0, %v485_v33  ;;  %3021 = vmatmul.mubr.msk.f32.gmra.mrb[2].mxu1 %vm540_vm0, %v491_v37 }
  0x38   : > { %641 = vmatprep.mubr.f32.mxu0 %v5926_v0  ;;  %865 = vmatprep.mubr.f32.mxu1 %v5926_v0 }
  0x3a   : > { %3218 = vset.pattern.permute.xlu0 %v5982_v41 }
  0x3b   : > { %3016 = vmatmul.mubr.msk.f32.gmra.mrb[4].mxu0 %vm540_vm0, %v486_v34  ;;  %1092 = vperm.xlu0 %3218, %v3616_v20  }
  0x3c   : > { %647 = vmatprep.mubr.f32.mxu0 %v5926_v0 }
  0x3f   : > { %3017 = vmatmul.mubr.msk.f32.gmra.mrb[6].mxu0 %vm540_vm0, %v487_v35  ;;  %3219 = vset.pattern.permute.xlu0 %v5979_v42 }
  0x40   : > { %653 = vmatprep.mubr.f32.mxu0 %v5926_v0  ;;  %1122 = vperm.xlu0 %3219, %v3616_v20  }
  0x44   : > { %3220 = vset.pattern.permute.xlu0 %v5977_v43 }
  0x45   : > { %1152 = vperm.xlu0 %3220, %v3616_v20  }
  0x49   : > { %3221 = vset.pattern.permute.xlu0 %v5975_v44 }
  0x4a   : > { %1182 = vperm.xlu0 %3221, %v3616_v20  }
  0x4e   : > { %3222 = vset.pattern.permute.xlu0 %v5973_v45  ;;  %v890_v45 = vlaneseq }
  0x4f   : > { %1212 = vperm.xlu0 %3222, %v3616_v20  }
  0x50   : > { %v898_v42 = vshrl.u32 %v890_v45, 7 }
  0x52   : > { %v3965_v41 = vsub.s32 0, %v898_v42  ;;  %v3967_v40 = vsub.s32 1, %v898_v42  ;;  %v895_v42 = vld [vmem:[%s5891_s13] ss:$8 sm:$0x3] }
  0x53   : > { %3223 = vset.pattern.permute.xlu0 %v5971_v46 }
  0x54   : > { %1242 = vperm.xlu0 %3223, %v3616_v20  }
  0x58   : > { %3224 = vset.pattern.permute.xlu0 %v5969_v47 }
  0x59   : > { %1265 = vperm.xlu0 %3224, %v3616_v20  }
  0x5d   : > { %3225 = vset.pattern.permute.xlu0 %v5967_v50 }
  0x5e   : > { %1295 = vperm.xlu0 %3225, %v3616_v20  }
  0x62   : > { %3228 = vset.pattern.permute.xlu0 %v5963_v62 }
  0x63   : > { %1385 = vperm.xlu0 %3228, %v3616_v20  }
  0x9d   : > { %v503_v48 = vpop.permute.xlu0 %502  ;;  %v513_v63 = vpop.permute.xlu1 %512 }
  0xa1   : > { %v508_v55 = vpop.permute.xlu0 %507  ;;  %v518_v13 = vpop.permute.xlu1 %517 }
 0x106   : > { %v631_v49 = vpop.f32.mrb[0].mxu0 }
 0x107   : > { %v3676_v51 = vadd.f32 %v631_v49, %v503_v48  ;;  %v633_v52 = vpop.f32.mrb[1].mxu0 }
 0x108   : > { %v3679_v53 = vadd.f32 %v633_v52, %v503_v48 }
 0x109   : > { %v678_v54 = vsub.f32 0.0, %v3676_v51 }
 0x10a   : > { %v679_v56 = vsub.f32 0.0, %v3679_v53  ;;  %v637_v57 = vpop.f32.mrb[2].mxu0 }
 0x10b   : > { %v694_v59 = vmul.f32 1.442695, %v678_v54  ;;  %v3684_v60 = vadd.f32 %v637_v57, %v508_v55  ;;  %v639_v61 = vpop.f32.mrb[3].mxu0 }
 0x10c   : > { %v696_v1 = vmul.f32 1.442695, %v679_v56  ;;  %v640_v2 = vadd.f32 %v639_v61, %v508_v55 }
 0x10d   : > { %3287 = vpow2.f32 %v694_v59  ;;  %v680_v4 = vsub.f32 0.0, %v3684_v60 }
 0x10e   : > { %3289 = vpow2.f32 %v696_v1  ;;  %v681_v5 = vsub.f32 0.0, %v640_v2  ;;  %v643_v6 = vpop.f32.mrb[4].mxu0 }
 0x10f   : > { %v698_v7 = vmul.f32 1.442695, %v680_v4  ;;  %v644_v8 = vadd.f32 %v643_v6, %v513_v63  ;;  %v645_v9 = vpop.f32.mrb[5].mxu0 }
 0x110   : > { %v700_v10 = vmul.f32 1.442695, %v681_v5  ;;  %v3690_v11 = vadd.f32 %v645_v9, %v513_v63 }
 0x111   : > { %3291 = vpow2.f32 %v698_v7  ;;  %v682_v12 = vsub.f32 0.0, %v644_v8 }
 0x112   : > { %3293 = vpow2.f32 %v700_v10  ;;  %v683_v14 = vsub.f32 0.0, %v3690_v11  ;;  %v649_v15 = vpop.f32.mrb[6].mxu0 }
 0x113   : > { %v702_v16 = vmul.f32 1.442695, %v682_v12  ;;  %v650_v17 = vadd.f32 %v649_v15, %v518_v13  ;;  %v651_v18 = vpop.f32.mrb[7].mxu0  ;;  %v790_v15 = vld [vmem:[%s6170_s3] sm:$0xff]  ;;  %s6321_s3 = smov 34  }
 0x114   : > { %v704_v19 = vmul.f32 1.442695, %v683_v14  ;;  %v652_v21 = vadd.f32 %v651_v18, %v518_v13  ;;  %v5981_v18 = vmov 3  }
 0x115   : > { %3295 = vpow2.f32 %v702_v16  ;;  %v684_v22 = vsub.f32 0.0, %v650_v17  ;;  %3215 = vset.pattern.permute.xlu1 %v5981_v18 }
 0x116   : > { %3297 = vpow2.f32 %v704_v19  ;;  %v685_v23 = vsub.f32 0.0, %v652_v21  ;;  %v5961_v19 = vmov 17   ;;  %1002 = vperm.xlu1 %3215, %v3616_v20  }
 0x117   : > { %v3288_v24 = vpop.eup %3287  ;;  %v706_v25 = vmul.f32 1.442695, %v684_v22  ;;  %3229 = vset.pattern.permute.xlu0 %v5961_v19  ;;  %v5959_v22 = vmov 18  }
 0x118   : > { %v3290_v26 = vpop.eup %3289  ;;  %v726_v27 = vadd.f32 1.0, %v3288_v24  ;;  %v708_v28 = vmul.f32 1.442695, %v685_v23  ;;  %1415 = vperm.xlu0 %3229, %v3616_v20   ;;  %v5965_v23 = vmov 15   ;;  %v5957_v24 = vmov 19  }
 0x119   : > { %v727_v29 = vadd.f32 1.0, %v3290_v26  ;;  %3299 = vpow2.f32 %v706_v25  ;;  %v5952_v25 = vmov 20   ;;  %v795_v26 = vpop.permute.xlu0 %794 }
 0x11a   : > { %3301 = vrcp.f32 %v726_v27 }
 0x11b   : > { %v3292_v30 = vpop.eup %3291  ;;  %3303 = vpow2.f32 %v708_v28 }
 0x11c   : > { %v3294_v31 = vpop.eup %3293  ;;  %v728_v32 = vadd.f32 1.0, %v3292_v30  ;;  %3305 = vrcp.f32 %v727_v29  ;;  %3230 = vset.pattern.permute.xlu0 %v5959_v22 }
 0x11d   : > { %v729_v33 = vadd.f32 1.0, %v3294_v31  ;;  %1445 = vperm.xlu0 %3230, %v3616_v20  }
 0x11e   : > { %3307 = vrcp.f32 %v728_v32 }
 0x11f   : > { %v3296_v34 = vpop.eup %3295  ;;  %3309 = vrcp.f32 %v729_v33 }
 0x120   : > { %v3298_v35 = vpop.eup %3297  ;;  %v730_v36 = vadd.f32 1.0, %v3296_v34 }
 0x121   : > { %v731_v48 = vadd.f32 1.0, %v3298_v35  ;;  %3231 = vset.pattern.permute.xlu0 %v5957_v24 }
 0x122   : > { %3311 = vrcp.f32 %v730_v36  ;;  %1475 = vperm.xlu0 %3231, %v3616_v20  }
 0x123   : > { %v3300_v37 = vpop.eup %3299 }
 0x124   : > { %v732_v49 = vadd.f32 1.0, %v3300_v37  ;;  %v3302_v52 = vpop.eup %3301 }
 0x125   : > { %v3304_v54 = vpop.eup %3303  ;;  %v774_v61 = vmul.f32 %v3302_v52, %v3676_v51 }
 0x126   : > { %3313 = vrcp.f32 %v732_v49  ;;  %v3306_v55 = vpop.eup %3305  ;;  %v733_v56 = vadd.f32 1.0, %v3304_v54  ;;  %3232 = vset.pattern.permute.xlu0 %v5952_v25  ;;  %v499_v25 = vld [vmem:[%s6161_s2 + $0x38] sm:$0xff] }
 0x127   : > { %3315 = vrcp.f32 %v731_v48  ;;  %v775_v1 = vmul.f32 %v3306_v55, %v3679_v53 }
 0x128   : > { %v3308_v57 = vpop.eup %3307  ;;  %3317 = vrcp.f32 %v733_v56  ;;  %v5946_v56 = vmov 21  }
 0x129   : > { %v3310_v59 = vpop.eup %3309  ;;  %v776_v63 = vmul.f32 %v3308_v57, %v3684_v60  ;;  %v5944_v57 = vmov 22  }
 0x12a   : > { %v777_v4 = vmul.f32 %v3310_v59, %v640_v2  ;;  %v5942_v59 = vmov 23  }
 0x12b   : > { %v3696_v5 = vpack.c.bf16 %v776_v63, %v774_v61  ;;  %v5936_v61 = vmov 24   ;;  %v1632_v63 = vld [vmem:[%s6175_s6] sm:$0xff]  ;;  %s6333_s6 = smov 98  }
 0x12c   : > { %v3698_v6 = vpack.c.bf16 %v777_v4, %v775_v1  ;;  %v3312_v7 = vpop.eup %3311  ;;  %v489_v1 = vld [vmem:[%s6165_s1 + $0x28] sm:$0xff]  ;;  %v3818_v4 = vpop.permute.xlu1 %912 }
 0x12d   : > { %6166 = vst [vmem:[#allocation2_spill] sm:$0xff] %v3696_v5  ;;  %v778_v12 = vmul.f32 %v3312_v7, %v644_v8  ;;  %v3712_v8 = vpop.f32.mrb[0].mxu1 }
 0x12e   : > { %6167 = vst [vmem:[#allocation3_spill] sm:$0xff] %v3698_v6  ;;  %3078 = vmatprep.subr.bf16.mxu1 %v3698_v6  ;;  %6171 = vst [vmem:[#allocation6_spill] sm:$0xff] %v3712_v8  ;;  %v3714_v16 = vpop.f32.mrb[1].mxu1  ;;  %v3023_v6 = vld [vmem:[%s5891_s13 + $0x1] ss:$8 sm:$0x3]  ;;  %v3996_v8 = vrot.slane %v895_v42, %v3965_v41 }
 0x12f   : > { %3080 = vmatpush1.bf16.msra.mxu1 %v3696_v5  ;;  %6172 = vst [vmem:[#allocation7_spill] sm:$0xff] %v3714_v16 }
 0x130   : > { %v3314_v9 = vpop.eup %3313  ;;  %v3822_v7 = vpop.permute.xlu1 %972  ;;  %6201 = vst [vmem:[#allocation26_spill] sm:$0xff] %v3996_v8 }
 0x131   : > { %v3316_v10 = vpop.eup %3315  ;;  %v780_v13 = vmul.f32 %v3314_v9, %v650_v17  ;;  %v3716_v17 = vpop.f32.mrb[2].mxu1 }
 0x132   : > { %v3318_v51 = vpop.eup %3317  ;;  %v779_v60 = vmul.f32 %v3316_v10, %v3690_v11  ;;  %6173 = vst [vmem:[#allocation8_spill] sm:$0xff] %v3716_v17  ;;  %v3718_v11 = vpop.f32.mrb[3].mxu1  ;;  %v4002_v17 = vrot.slane %v3023_v6, %v3965_v41 }
 0x133   : > { %v3702_v14 = vpack.c.bf16 %v780_v13, %v778_v12  ;;  %v781_v53 = vmul.f32 %v3318_v51, %v652_v21  ;;  %6174 = vst [vmem:[#allocation9_spill] sm:$0xff] %v3718_v11  ;;  %v5956_v21 = vmov 14   ;;  %v3836_v12 = vpop.permute.xlu0 %942  ;;  %v3999_v11 = vrot.slane %v895_v42, %v3967_v40 }
 0x134   : > { %3226 = vset.pattern.permute.xlu1 %v5956_v21  ;;  %v3934_v21 = vld [vmem:[%s6189_s9] sm:$0xff]  ;;  %6203 = vst [vmem:[#allocation28_spill] sm:$0xff] %v4002_v17 }
 0x135   : > { %6168 = vst [vmem:[#allocation4_spill] sm:$0xff] %v3702_v14  ;;  %v3705_v2 = vpack.c.bf16 %v781_v53, %v779_v60  ;;  %1325 = vperm.xlu1 %3226, %v3616_v20   ;;  %6190 = vst [vmem:[#allocation15_spill] sm:$0xff] %v3934_v21 }
 0x136   : > { %6202 = vst [vmem:[#allocation27_spill] sm:$0xff] %v3999_v11 }
 0x137   : > { %6169 = vst [vmem:[#allocation5_spill] sm:$0xff] %v3705_v2  ;;  %3082 = vmatprep.subr.bf16.mxu1 %v3705_v2  ;;  %v3842_v51 = vpop.permute.xlu0 %1032 }
 0x138   : > { %3084 = vmatpush1.bf16.msra.mxu1 %v3702_v14  ;;  %v3974_v14 = vand.u32 127, %v890_v45  ;;  %v3024_v45 = vld [vmem:[%s5891_s13 + $0x2] ss:$8 sm:$0x3] }
 0x139   : > { %3227 = vset.pattern.permute.xlu1 %v5965_v23 }
 0x13a   : > { %1355 = vperm.xlu1 %3227, %v3616_v20   ;;  %vm892_vm2 = vcmp.lt.s32.totalorder %v3974_v14, 34  ;;  %vm923_vm3 = vcmp.lt.s32.totalorder %v3974_v14, 33  ;;  %vm953_vm4 = vcmp.lt.s32.totalorder %v3974_v14, 32  ;;  %vm6062_vm5 = vcmp.lt.s32.totalorder %v3974_v14, 31 }
 0x13b   : > { %3022 = vmatmul.mubr.msk.f32.vlgmr.msra.gmra.mrb[4].mxu1 %vm797_vm1, %v790_v15  ;;  %v3850_v53 = vpop.permute.xlu0 %1062  ;;  %vm1013_vm6 = vcmp.lt.s32.totalorder %v3974_v14, 30  ;;  %vm6055_vm7 = vcmp.lt.s32.totalorder %v3974_v14, 18  ;;  %vm1073_vm8 = vcmp.lt.s32.totalorder %v3974_v14, 17  ;;  %vm1103_vm9 = vcmp.lt.s32.totalorder %v3974_v14, 16 }
 0x13c   : > { %vm1133_vm10 = vcmp.lt.s32.totalorder %v3974_v14, 15  ;;  %vm6032_vm11 = vcmp.lt.s32.totalorder %v3974_v14, 14  ;;  %vm6046_vm12 = vcmp.lt.s32.totalorder %v3974_v14, 2  ;;  %vm1223_vm13 = vcmp.lt.s32.totalorder %v3974_v14, 1 }
 0x13d   : > { %vm1276_vm14 = vcmp.lt.s32.totalorder %v3974_v14, 127  ;;  %vm6031_vm15 = vcmp.lt.s32.totalorder %v3974_v14, 126  ;;  %vm1366_vm1 = vcmp.lt.s32.totalorder %v3974_v14, 113 }
 0x13e   : > { %3238 = vset.pattern.permute.xlu1 %v5934_v3 }
 0x195   : > { %v3828_v9 = vpop.permute.xlu1 %1002 }
 0x1b4   : > { %v3832_v10 = vpop.permute.xlu1 %1325 }
 0x1b5   : > { %6176 = vst [vmem:[#allocation10_spill] sm:$0xff] %v3832_v10 }
 0x1b9   : > { %v3840_v13 = vpop.permute.xlu1 %1355 }
 0x1ba   : > { %6179 = vst [vmem:[#allocation11_spill] sm:$0xff] %v3840_v13 }
 0x20e   : > { %v867_v27 = vpop.f32.mrb[4].mxu1 }
 0x20f   : > { %v868_v28 = vadd.f32 %v867_v27, %v795_v26  ;;  %v869_v29 = vpop.f32.mrb[5].mxu1  ;;  %v3858_v27 = vpop.permute.xlu0 %1092 }
 0x210   : > { %v870_v30 = vadd.f32 %v869_v29, %v795_v26 }
 0x211   : > { %v872_v31 = vsub.f32 0.0, %v868_v28 }
 0x212   : > { %v873_v32 = vsub.f32 0.0, %v870_v30 }
 0x213   : > { %v874_v33 = vmul.f32 1.442695, %v872_v31  ;;  %v3866_v29 = vpop.permute.xlu0 %1122 }
 0x214   : > { %v876_v34 = vmul.f32 1.442695, %v873_v32 }
 0x215   : > { %3319 = vpow2.f32 %v874_v33 }
 0x216   : > { %3321 = vpow2.f32 %v876_v34 }
 0x217   : > { %v3874_v32 = vpop.permute.xlu0 %1152 }
 0x21b   : > { %v3882_v34 = vpop.permute.xlu0 %1182 }
 0x21f   : > { %v3320_v35 = vpop.eup %3319 }
 0x220   : > { %v878_v36 = vadd.f32 1.0, %v3320_v35  ;;  %v3322_v37 = vpop.eup %3321 }
 0x221   : > { %v879_v48 = vadd.f32 1.0, %v3322_v37  ;;  %v3890_v37 = vpop.permute.xlu0 %1212 }
 0x222   : > { %3323 = vrcp.f32 %v878_v36 }
 0x223   : > { %3325 = vrcp.f32 %v879_v48 }
 0x22c   : > { %v3324_v49 = vpop.eup %3323 }
 0x22d   : > { %v3734_v52 = vmul.f32 %v3324_v49, %v868_v28  ;;  %v3326_v54 = vpop.eup %3325  ;;  %v3898_v49 = vpop.permute.xlu0 %1242 }
 0x22e   : > { %v3744_v55 = vmul.f32 %v3326_v54, %v870_v30 }
 0x22f   : > { %949 = vrot.lane.b32.xlu0 %v3734_v52, %s5914_s18  ;;  %886 = vrot.lane.b32.xlu1 %v3734_v52, %s5896_s20 }
 0x233   : > { %1302 = vrot.lane.b32.xlu0 %v3734_v52, %s5898_s21  ;;  %919 = vrot.lane.b32.xlu1 %v3734_v52, %s5894_s22  ;;  %s6178_s21 = smov 2  }
 0x237   : > { %888 = vrot.lane.b32.xlu0 %v3744_v55, %s5896_s20  ;;  %979 = vrot.lane.b32.xlu1 %v3734_v52, %s5920_s23  ;;  %s6177_s20 = smov 14  }
 0x23b   : > { %921 = vrot.lane.b32.xlu0 %v3744_v55, %s5894_s22  ;;  %1009 = vrot.lane.b32.xlu1 %v3734_v52, %s5918_s24  ;;  %s5904_s22 = smov 94  }
 0x23f   : > { %1505 = vperm.xlu0 %3232, %v3616_v20   ;;  %1039 = vrot.lane.b32.xlu1 %v3734_v52, %s5916_s25 }
 0x243   : > { %3233 = vset.pattern.permute.xlu0 %v5946_v56  ;;  %1069 = vrot.lane.b32.xlu1 %v3734_v52, %s5924_s26 }
 0x244   : > { %1535 = vperm.xlu0 %3233, %v3616_v20  }
 0x247   : > { %1099 = vrot.lane.b32.xlu1 %v3734_v52, %s5954_s27 }
 0x248   : > { %3234 = vset.pattern.permute.xlu0 %v5944_v57 }
 0x249   : > { %1565 = vperm.xlu0 %3234, %v3616_v20  }
 0x24b   : > { %1129 = vrot.lane.b32.xlu1 %v3734_v52, %s5922_s28 }
 0x24d   : > { %1274 = vrot.lane.b32.xlu0 %v3744_v55, %s5908_s15 }
 0x24e   : > { %3235 = vset.pattern.permute.xlu0 %v5942_v59  ;;  %v497_v59 = vld [vmem:[%s6161_s2 + $0x28] sm:$0xff] }
 0x24f   : > { %1159 = vrot.lane.b32.xlu1 %v3734_v52, %s5906_s16  ;;  %s5928_s16 = smov 98  }
 0x251   : > { %1595 = vperm.xlu0 %3235, %v3616_v20  }
 0x253   : > { %1189 = vrot.lane.b32.xlu1 %v3734_v52, %s5900_s17  ;;  %s5910_s17 = smov 114  }
 0x255   : > { %3236 = vset.pattern.permute.xlu0 %v5936_v61 }
 0x256   : > { %1625 = vperm.xlu0 %3236, %v3616_v20   ;;  %v488_v20 = vld [vmem:[%s6165_s1 + $0x20] sm:$0xff]  ;;  %s6320_s1 = smov 31  }
 0x257   : > { %1219 = vrot.lane.b32.xlu1 %v3734_v52, %s5902_s19  ;;  %s5950_s19 = smov 113   ;;  %3018 = vmatmul.mubr.msk.f32.gmra.mrb[8].mxu0 %vm540_vm0, %v488_v20  ;;  %v3906_v20 = vpop.permute.xlu0 %1265 }
 0x258   : > { %659 = vmatprep.mubr.f32.mxu0 %v5926_v0 }
 0x25a   : > { %1602 = vrot.lane.b32.xlu0 %v3734_v52, %s5904_s22  ;;  %s5932_s22 = smov 110  }
 0x25b   : > { %1272 = vrot.lane.b32.xlu1 %v3734_v52, %s5908_s15  ;;  %3237 = vset.pattern.permute.xlu0 %v5934_v3  ;;  %s5912_s15 = smov 112   ;;  %v1725_v3 = vld [vmem:[%s6186_s8 + $0x8] sm:$0xff] }
 0x25c   : > { %3019 = vmatmul.mubr.msk.f32.gmra.mrb[10].mxu0 %vm540_vm0, %v489_v1  ;;  %vm6039_vm0 = vcmp.lt.s32.totalorder %v3974_v14, 114 }
 0x25d   : > { %2773 = vmatprep.mubr.f32.mxu0 %v5926_v0  ;;  %v3912_v0 = vpop.permute.xlu0 %1295 }
 0x25e   : > { %1635 = vperm.xlu0 %3237, %v1632_v63   ;;  %6184 = vst [vmem:[#allocation12_spill] sm:$0xff] %v3912_v0 }
 0x25f   : > { %1332 = vrot.lane.b32.xlu1 %v3734_v52, %s5910_s17  ;;  %s5940_s17 = smov 111  }
 0x261   : > { %v3924_v57 = vpop.permute.xlu0 %1385 }
 0x262   : > { %3239 = vset.pattern.permute.xlu0 %v3443_v38  ;;  %6187 = vst [vmem:[#allocation13_spill] sm:$0xff] %v3924_v57 }
 0x263   : > { %1362 = vrot.lane.b32.xlu1 %v3734_v52, %s5950_s19  ;;  %1873 = vperm.xlu0 %3239, %v3934_v21   ;;  %v4005_v21 = vrot.slane %v3023_v6, %v3967_v40  ;;  %v4023_v6 = vrot.slane %v3024_v45, %v3965_v41 }
 0x265   : > { %6204 = vst [vmem:[#allocation29_spill] sm:$0xff] %v4005_v21  ;;  %6205 = vst [vmem:[#allocation30_spill] sm:$0xff] %v4023_v6 }
 0x267   : > { %1392 = vrot.lane.b32.xlu1 %v3734_v52, %s5912_s15  ;;  %s5930_s15 = smov 97   ;;  %3242 = vset.pattern.permute.xlu0 %v5988_v58  ;;  %v3034_v58 = vld [vmem:[%s5891_s13 + $0x14] ss:$8 sm:$0x3] }
 0x268   : > { %v3977_v2 = vrot.slane %v3034_v58, %v3965_v41  ;;  %v3980_v5 = vrot.slane %v3034_v58, %v3967_v40 }
 0x26a   : > { %6199 = vst [vmem:[#allocation24_spill] sm:$0xff] %v3977_v2  ;;  %6200 = vst [vmem:[#allocation25_spill] sm:$0xff] %v3980_v5  ;;  %v4019_v42 = vmul.f32 %v3980_v5, %v3744_v55 }
 0x26b   : > { %1422 = vrot.lane.b32.xlu1 %v3734_v52, %s5940_s17 }
 0x26f   : > { %1452 = vrot.lane.b32.xlu1 %v3734_v52, %s5932_s22 }
 0x273   : > { %1482 = vrot.lane.b32.xlu1 %v3734_v52, %s5928_s16 }
 0x277   : > { %1512 = vrot.lane.b32.xlu1 %v3734_v52, %s5930_s15 }
 0x27b   : > { %951 = vrot.lane.b32.xlu1 %v3744_v55, %s5914_s18  ;;  %s6180_s18 = smov 1  }
 0x27f   : > { %981 = vrot.lane.b32.xlu1 %v3744_v55, %s5920_s23  ;;  %s6181_s23 = smov 126  }
 0x283   : > { %1011 = vrot.lane.b32.xlu1 %v3744_v55, %s5918_s24  ;;  %s5948_s24 = smov 95  }
 0x287   : > { %1041 = vrot.lane.b32.xlu1 %v3744_v55, %s5916_s25  ;;  %s5938_s25 = smov 96  }
 0x28b   : > { %1071 = vrot.lane.b32.xlu1 %v3744_v55, %s5924_s26  ;;  %s6183_s26 = smov 112  }
 0x28f   : > { %1101 = vrot.lane.b32.xlu1 %v3744_v55, %s5954_s27  ;;  %s6256_s27 = smov 17  }
 0x293   : > { %1131 = vrot.lane.b32.xlu1 %v3744_v55, %s5922_s28  ;;  %s6182_s28 = smov 114  }
 0x297   : > { %1161 = vrot.lane.b32.xlu1 %v3744_v55, %s6177_s20 }
 0x29b   : > { %1191 = vrot.lane.b32.xlu1 %v3744_v55, %s6178_s21 }
 0x29f   : > { %1221 = vrot.lane.b32.xlu1 %v3744_v55, %s6180_s18 }
 0x2a1   : > { %v3846_v60 = vpop.permute.xlu1 %886 }
 0x2a3   : > { %1542 = vrot.lane.b32.xlu1 %v3734_v52, %s5938_s25 }
 0x2a5   : > { %v3852_v15 = vpop.permute.xlu1 %919 }
 0x2a7   : > { %1572 = vrot.lane.b32.xlu1 %v3734_v52, %s5948_s24 }
 0x2a9   : > { %v3856_v26 = vpop.permute.xlu1 %979 }
 0x2ab   : > { %1304 = vrot.lane.b32.xlu1 %v3744_v55, %s6181_s23 }
 0x2ad   : > { %v3862_v28 = vpop.permute.xlu1 %1009 }
 0x2af   : > { %1334 = vrot.lane.b32.xlu1 %v3744_v55, %s6182_s28 }
 0x2b1   : > { %v3868_v30 = vpop.permute.xlu1 %1039 }
 0x2b3   : > { %1364 = vrot.lane.b32.xlu1 %v3744_v55, %s5950_s19  ;;  %s6326_s19 = smov 32  }
 0x2b5   : > { %v3872_v31 = vpop.permute.xlu1 %1069 }
 0x2b7   : > { %1394 = vrot.lane.b32.xlu1 %v3744_v55, %s6183_s26 }
 0x2b9   : > { %v3878_v33 = vpop.permute.xlu1 %1099 }
 0x2bb   : > { %1424 = vrot.lane.b32.xlu1 %v3744_v55, %s5940_s17  ;;  %s6257_s17 = smov 15  }
 0x2bd   : > { %v3884_v35 = vpop.permute.xlu1 %1129 }
 0x2bf   : > { %1454 = vrot.lane.b32.xlu1 %v3744_v55, %s5932_s22  ;;  %s6258_s22 = smov 127  }
 0x2c1   : > { %v3888_v36 = vpop.permute.xlu1 %1159 }
 0x2c3   : > { %1484 = vrot.lane.b32.xlu1 %v3744_v55, %s5928_s16  ;;  %s6185_s16 = smov 94  }
 0x2c5   : > { %v3894_v48 = vpop.permute.xlu1 %1189 }
 0x2c7   : > { %1514 = vrot.lane.b32.xlu1 %v3744_v55, %s5930_s15  ;;  %s6261_s15 = smov 111  }
 0x2c9   : > { %v3900_v54 = vpop.permute.xlu1 %1219 }
 0x2cb   : > { %1544 = vrot.lane.b32.xlu1 %v3744_v55, %s5938_s25  ;;  %s6259_s25 = smov 113  }
 0x2cd   : > { %v3904_v63 = vpop.permute.xlu1 %1272 }
 0x2cf   : > { %1574 = vrot.lane.b32.xlu1 %v3744_v55, %s5948_s24  ;;  %s6255_s24 = smov 16  }
 0x2d1   : > { %v3910_v1 = vpop.permute.xlu1 %1332 }
 0x2d3   : > { %1604 = vrot.lane.b32.xlu1 %v3744_v55, %s6185_s16  ;;  %v4036_v55 = vrot.slane %v3024_v45, %v3967_v40 }
 0x2d5   : > { %v3919_v61 = vpop.permute.xlu1 %1362  ;;  %6206 = vst [vmem:[#allocation31_spill] sm:$0xff] %v4036_v55 }
 0x2d7   : > { %1733 = vperm.xlu1 %3238, %v1725_v3   ;;  %v3939_v3 = vpop.permute.xlu0 %1415 }
 0x2d8   : > { %6192 = vst [vmem:[#allocation17_spill] sm:$0xff] %v3939_v3 }
 0x2d9   : > { %v3926_v56 = vpop.permute.xlu1 %1392 }
 0x2da   : > { %6188 = vst [vmem:[#allocation14_spill] sm:$0xff] %v3926_v56 }
 0x2db   : > { %527 = vperm.xlu1 %3238, %v497_v59   ;;  %v3944_v59 = vld [vmem:[%s6189_s9 + $0x8] sm:$0xff]  ;;  %v3950_v19 = vpop.permute.xlu0 %1445 }
 0x2dc   : > { %6193 = vst [vmem:[#allocation18_spill] sm:$0xff] %v3944_v59  ;;  %6195 = vst [vmem:[#allocation20_spill] sm:$0xff] %v3950_v19 }
 0x2dd   : > { %v3936_v24 = vpop.permute.xlu1 %1422 }
 0x2de   : > { %6191 = vst [vmem:[#allocation16_spill] sm:$0xff] %v3936_v24 }
 0x2df   : > { %537 = vperm.xlu1 %3238, %v499_v25   ;;  %v3957_v25 = vpop.permute.xlu0 %1475 }
 0x2e0   : > { %6198 = vst [vmem:[#allocation23_spill] sm:$0xff] %v3957_v25  ;;  %v3026_v25 = vld [vmem:[%s5891_s13 + $0x4] ss:$8 sm:$0x3] }
 0x2e1   : > { %v3946_v22 = vpop.permute.xlu1 %1452  ;;  %v4045_v3 = vrot.slane %v3026_v25, %v3965_v41 }
 0x2e2   : > { %6194 = vst [vmem:[#allocation19_spill] sm:$0xff] %v3946_v22  ;;  %v4060_v22 = vrot.slane %v3026_v25, %v3967_v40 }
 0x2e3   : > { %1845 = vperm.xlu1 %3238, %v3944_v59   ;;  %v950_v47 = vpop.permute.xlu0 %949  ;;  %v3025_v59 = vld [vmem:[%s5891_s13 + $0x3] ss:$8 sm:$0x3]  ;;  %6209 = vst [vmem:[#allocation34_spill] sm:$0xff] %v4045_v3 }
 0x2e4   : > { %v4042_v5 = vrot.slane %v3025_v59, %v3967_v40  ;;  %6210 = vst [vmem:[#allocation35_spill] sm:$0xff] %v4060_v22 }
 0x2e5   : > { %v3952_v62 = vpop.permute.xlu1 %1482 }
 0x2e6   : > { %6196 = vst [vmem:[#allocation21_spill] sm:$0xff] %v3952_v62  ;;  %6208 = vst [vmem:[#allocation33_spill] sm:$0xff] %v4042_v5 }
 0x2e7   : > { %3240 = vset.pattern.permute.xlu1 %v3443_v38  ;;  %v3961_v43 = vpop.permute.xlu0 %1302 }
 0x2e9   : > { %v3955_v23 = vpop.permute.xlu1 %1512 }
 0x2ea   : > { %6197 = vst [vmem:[#allocation22_spill] sm:$0xff] %v3955_v23  ;;  %v4015_v23 = vmul.f32 %v3977_v2, %v3734_v52  ;;  %v4039_v2 = vrot.slane %v3025_v59, %v3965_v41 }
 0x2eb   : > { %v889_v38 = vpop.permute.xlu0 %888 }
 0x2ec   : > { %6207 = vst [vmem:[#allocation32_spill] sm:$0xff] %v4039_v2  ;;  %v893_v45 = vsel %vm892_vm2, %v3846_v60, %v889_v38  ;;  %v894_v59 = vsel %vm892_vm2, %v889_v38, %v3846_v60 }
 0x2ed   : > { %v952_v50 = vpop.permute.xlu1 %951  ;;  %v907_v38 = vmul.f32 %v3996_v8, %v894_v59 }
 0x2ee   : > { %v954_v13 = vsel %vm953_vm4, %v950_v47, %v952_v50  ;;  %v955_v56 = vsel %vm953_vm4, %v952_v50, %v950_v47  ;;  %v908_v47 = vmul.f32 %v3999_v11, %v893_v45  ;;  %v3030_v45 = vld [vmem:[%s5891_s13 + $0x10] ss:$8 sm:$0x3] }
 0x2ef   : > { %v922_v58 = vpop.permute.xlu0 %921 }
 0x2f0   : > { %v924_v62 = vsel %vm923_vm3, %v3852_v15, %v922_v58  ;;  %v925_v52 = vsel %vm923_vm3, %v922_v58, %v3852_v15  ;;  %v3027_v15 = vld [vmem:[%s5891_s13 + $0x5] ss:$8 sm:$0x3]  ;;  %v3028_v58 = vld [vmem:[%s5891_s13 + $0x6] ss:$8 sm:$0x3] }
 0x2f1   : > { %v982_v46 = vpop.permute.xlu1 %981  ;;  %v939_v57 = vmul.f32 %v4002_v17, %v925_v52  ;;  %v940_v24 = vmul.f32 %v4005_v21, %v924_v62  ;;  %v4072_v0 = vrot.slane %v3027_v15, %v3965_v41  ;;  %v4075_v60 = vrot.slane %v3027_v15, %v3967_v40  ;;  %v3029_v62 = vld [vmem:[%s5891_s13 + $0x7] ss:$8 sm:$0x3] }
 0x2f2   : > { %v4079_v25 = vrot.slane %v3028_v58, %v3965_v41  ;;  %v984_v50 = vsel %vm6062_vm5, %v3856_v26, %v982_v46  ;;  %v985_v52 = vsel %vm6062_vm5, %v982_v46, %v3856_v26  ;;  %v969_v15 = vmul.f32 %v4023_v6, %v955_v56 }
 0x2f3   : > { %6211 = vst [vmem:[#allocation36_spill] sm:$0xff] %v4072_v0  ;;  %6212 = vst [vmem:[#allocation37_spill] sm:$0xff] %v4075_v60  ;;  %v970_v21 = vmul.f32 %v4036_v55, %v954_v13  ;;  %v4095_v17 = vrot.slane %v3028_v58, %v3967_v40  ;;  %v945_v59 = vmul.f32 %v3836_v12, %v939_v57  ;;  %vm6078_vm5 = vcmp.lt.s32.totalorder %v3974_v14, 96 }
 0x2f4   : > { %6213 = vst [vmem:[#allocation38_spill] sm:$0xff] %v4079_v25  ;;  %v946_v11 = vmul.f32 %v3836_v12, %v940_v24  ;;  %v4104_v8 = vrot.slane %v3029_v62, %v3965_v41  ;;  %v4107_v46 = vrot.slane %v3029_v62, %v3967_v40  ;;  %v999_v13 = vmul.f32 %v4039_v2, %v985_v52  ;;  %v4146_v2 = vpop.permute.xlu0 %1505 }
 0x2f5   : > { %v3959_v44 = vpop.permute.xlu1 %1011  ;;  %6214 = vst [vmem:[#allocation39_spill] sm:$0xff] %v4095_v17  ;;  %v1000_v26 = vmul.f32 %v4042_v5, %v984_v50  ;;  %v915_v57 = vmul.f32 %v3818_v4, %v907_v38  ;;  %v916_v12 = vmul.f32 %v3818_v4, %v908_v47  ;;  %v4125_v62 = vrot.slane %v3030_v45, %v3965_v41 }
 0x2f6   : > { %v1014_v58 = vsel %vm1013_vm6, %v3862_v28, %v3959_v44  ;;  %v1015_v24 = vsel %vm1013_vm6, %v3959_v44, %v3862_v28  ;;  %v975_v50 = vmul.f32 %v3822_v7, %v969_v15  ;;  %v976_v52 = vmul.f32 %v3822_v7, %v970_v21  ;;  %v3031_v21 = vld [vmem:[%s5891_s13 + $0x11] ss:$8 sm:$0x3] }
 0x2f7   : > { %v1029_v4 = vmul.f32 %v4045_v3, %v1015_v24  ;;  %v1030_v28 = vmul.f32 %v4060_v22, %v1014_v58  ;;  %v4140_v38 = vrot.slane %v3030_v45, %v3967_v40  ;;  %v947_v47 = vadd.f32 %v945_v59, %v915_v57  ;;  %v3032_v59 = vld [vmem:[%s5891_s13 + $0x12] ss:$8 sm:$0x3] }
 0x2f8   : > { %v948_v15 = vadd.f32 %v946_v11, %v916_v12  ;;  %v6235_v3 = vld [vmem:[#allocation16_spill] sm:$0xff] }
 0x2f9   : > { %v3963_v18 = vpop.permute.xlu1 %1041  ;;  %v1035_v57 = vmul.f32 %v3842_v51, %v1029_v4  ;;  %v1036_v12 = vmul.f32 %v3842_v51, %v1030_v28  ;;  %v4189_v51 = vrot.slane %v3032_v59, %v3965_v41 }
 0x2fa   : > { %v1044_v5 = vsel %vm6055_vm7, %v3868_v30, %v3963_v18  ;;  %v1045_v44 = vsel %vm6055_vm7, %v3963_v18, %v3868_v30  ;;  %v1005_v18 = vmul.f32 %v3828_v9, %v999_v13  ;;  %v1006_v30 = vmul.f32 %v3828_v9, %v1000_v26 }
 0x2fb   : > { %v1059_v58 = vmul.f32 %v4072_v0, %v1045_v44  ;;  %v1060_v45 = vmul.f32 %v4075_v60, %v1044_v5  ;;  %v977_v13 = vadd.f32 %v975_v50, %v947_v47  ;;  %v978_v9 = vadd.f32 %v976_v52, %v948_v15  ;;  %6217 = vst [vmem:[#allocation42_spill] sm:$0xff] %v4189_v51 }
 0x2fc   : > { %v4164_v26 = vrot.slane %v3031_v21, %v3965_v41  ;;  %v4167_v5 = vrot.slane %v3031_v21, %v3967_v40  ;;  %vm1516_vm7 = vcmp.lt.s32.totalorder %v3974_v14, 97 }
 0x2fd   : > { %v3969_v39 = vpop.permute.xlu1 %1071  ;;  %v1007_v4 = vadd.f32 %v1005_v18, %v977_v13  ;;  %v1008_v28 = vadd.f32 %v1006_v30, %v978_v9  ;;  %v1065_v21 = vmul.f32 %v3850_v53, %v1059_v58  ;;  %v1066_v47 = vmul.f32 %v3850_v53, %v1060_v45 }
 0x2fe   : > { %v1074_v24 = vsel %vm1073_vm8, %v3872_v31, %v3969_v39  ;;  %v1075_v11 = vsel %vm1073_vm8, %v3969_v39, %v3872_v31  ;;  %6215 = vst [vmem:[#allocation40_spill] sm:$0xff] %v4164_v26  ;;  %6216 = vst [vmem:[#allocation41_spill] sm:$0xff] %v4167_v5  ;;  %v4210_v58 = vrot.slane %v3032_v59, %v3967_v40  ;;  %v3033_v59 = vld [vmem:[%s5891_s13 + $0x13] ss:$8 sm:$0x3] }
 0x2ff   : > { %v4182_v52 = vmul.f32 %v4079_v25, %v1075_v11  ;;  %v4185_v44 = vmul.f32 %v4095_v17, %v1074_v24  ;;  %v1037_v30 = vadd.f32 %v1035_v57, %v1007_v4  ;;  %v1038_v53 = vadd.f32 %v1036_v12, %v1008_v28 }
 0x300   : > { %6218 = vst [vmem:[#allocation43_spill] sm:$0xff] %v4210_v58 }
 0x301   : > { %v3988_v16 = vpop.permute.xlu1 %1101  ;;  %v1095_v11 = vmul.f32 %v3858_v27, %v4182_v52  ;;  %v1096_v13 = vmul.f32 %v3858_v27, %v4185_v44  ;;  %v1067_v9 = vadd.f32 %v1065_v21, %v1037_v30  ;;  %v1068_v57 = vadd.f32 %v1066_v47, %v1038_v53 }
 0x302   : > { %v1104_v39 = vsel %vm1103_vm9, %v3878_v33, %v3988_v16  ;;  %v1105_v31 = vsel %vm1103_vm9, %v3988_v16, %v3878_v33  ;;  %v4193_v16 = vpop.permute.xlu0 %1535  ;;  %v4251_v21 = vrot.slane %v3033_v59, %v3965_v41  ;;  %v4254_v47 = vrot.slane %v3033_v59, %v3967_v40 }
 0x303   : > { %v4196_v33 = vmul.f32 %v4104_v8, %v1105_v31  ;;  %v4199_v15 = vmul.f32 %v4107_v46, %v1104_v39  ;;  %v1098_v30 = vadd.f32 %v1096_v13, %v1068_v57 }
 0x305   : > { %v4025_v19 = vpop.permute.xlu1 %1131  ;;  %v1125_v39 = vmul.f32 %v3866_v29, %v4196_v33  ;;  %v1126_v31 = vmul.f32 %v3866_v29, %v4199_v15 }
 0x306   : > { %v1134_v24 = vsel %vm1133_vm10, %v3884_v35, %v4025_v19  ;;  %v1135_v18 = vsel %vm1133_vm10, %v4025_v19, %v3884_v35 }
 0x307   : > { %v4231_v12 = vmul.f32 %v4125_v62, %v1135_v18  ;;  %v4234_v27 = vmul.f32 %v4140_v38, %v1134_v24  ;;  %v4256_v24 = vpop.permute.xlu0 %1565  ;;  %v1097_v18 = vadd.f32 %v1095_v11, %v1067_v9  ;;  %v1128_v13 = vadd.f32 %v1126_v31, %v1098_v30  ;;  %v3035_v9 = vld [vmem:[%s5891_s13 + $0x15] ss:$8 sm:$0x3] }
 0x309   : > { %v4069_v10 = vpop.permute.xlu1 %1161  ;;  %v1127_v11 = vadd.f32 %v1125_v39, %v1097_v18  ;;  %v1269_v39 = vmul.f32 %v3906_v20, %v4019_v42 }
 0x30a   : > { %v1164_v19 = vsel %vm6032_vm11, %v3888_v36, %v4069_v10  ;;  %v1165_v35 = vsel %vm6032_vm11, %v4069_v10, %v3888_v36  ;;  %vm1426_vm11 = vcmp.lt.s32.totalorder %v3974_v14, 111 }
 0x30b   : > { %v1179_v4 = vmul.f32 %v4164_v26, %v1165_v35  ;;  %v1180_v28 = vmul.f32 %v4167_v5, %v1164_v19  ;;  %v1156_v19 = vmul.f32 %v3874_v32, %v4234_v27  ;;  %v1275_v30 = vpop.permute.xlu0 %1274 }
 0x30d   : > { %v4109_v56 = vpop.permute.xlu1 %1191  ;;  %v1185_v57 = vmul.f32 %v3882_v34, %v1179_v4 }
 0x30e   : > { %v1194_v10 = vsel %vm6046_vm12, %v3894_v48, %v4109_v56  ;;  %v1195_v36 = vsel %vm6046_vm12, %v4109_v56, %v3894_v48  ;;  %v1155_v56 = vmul.f32 %v3874_v32, %v4231_v12  ;;  %vm6073_vm12 = vcmp.lt.s32.totalorder %v3974_v14, 98 }
 0x30f   : > { %v1209_v35 = vmul.f32 %v4189_v51, %v1195_v36  ;;  %v1210_v59 = vmul.f32 %v4210_v58, %v1194_v10  ;;  %v1268_v10 = vmul.f32 %v3906_v20, %v4015_v23  ;;  %v1158_v36 = vadd.f32 %v1156_v19, %v1128_v13 }
 0x310   : > { %v1157_v31 = vadd.f32 %v1155_v56, %v1127_v11  ;;  %v4298_v20 = vrot.slane %v3035_v9, %v3967_v40 }
 0x311   : > { %v1222_v7 = vpop.permute.xlu1 %1221  ;;  %v1215_v18 = vmul.f32 %v3890_v37, %v1209_v35  ;;  %v1216_v4 = vmul.f32 %v3890_v37, %v1210_v59 }
 0x312   : > { %v1224_v53 = vsel %vm1223_vm13, %v3900_v54, %v1222_v7  ;;  %v1225_v48 = vsel %vm1223_vm13, %v1222_v7, %v3900_v54  ;;  %v1186_v54 = vmul.f32 %v3882_v34, %v1180_v28  ;;  %v3036_v34 = vld [vmem:[%s5891_s13 + $0x16] ss:$8 sm:$0x3]  ;;  %v3037_v28 = vld [vmem:[%s5891_s13 + $0x17] ss:$8 sm:$0x3]  ;;  %v1187_v37 = vadd.f32 %v1185_v57, %v1157_v31 }
 0x313   : > { %v4276_v7 = vmul.f32 %v4251_v21, %v1225_v48  ;;  %v4279_v5 = vmul.f32 %v4254_v47, %v1224_v53  ;;  %v4295_v53 = vrot.slane %v3035_v9, %v3965_v41  ;;  %v4306_v59 = vrot.slane %v3036_v34, %v3965_v41  ;;  %v3038_v9 = vld [vmem:[%s5891_s13 + $0x20] ss:$8 sm:$0x3] }
 0x314   : > { %v1188_v48 = vadd.f32 %v1186_v54, %v1158_v36  ;;  %v4309_v11 = vrot.slane %v3036_v34, %v3967_v40  ;;  %v4313_v13 = vrot.slane %v3037_v28, %v3965_v41  ;;  %v1278_v57 = vsel %vm1276_vm14, %v1275_v30, %v3904_v63  ;;  %v3039_v36 = vld [vmem:[%s5891_s13 + $0x21] ss:$8 sm:$0x3] }
 0x315   : > { %v4179_v50 = vpop.permute.xlu1 %1542  ;;  %v1245_v56 = vmul.f32 %v3898_v49, %v4276_v7  ;;  %v1246_v19 = vmul.f32 %v3898_v49, %v4279_v5  ;;  %6219 = vst [vmem:[#allocation44_spill] sm:$0xff] %v4306_v59  ;;  %v1277_v49 = vsel %vm1276_vm14, %v3904_v63, %v1275_v30  ;;  %v1217_v54 = vadd.f32 %v1215_v18, %v1187_v37 }
 0x316   : > { %6220 = vst [vmem:[#allocation45_spill] sm:$0xff] %v4309_v11  ;;  %6221 = vst [vmem:[#allocation46_spill] sm:$0xff] %v4313_v13  ;;  %v1218_v31 = vadd.f32 %v1216_v4, %v1188_v48  ;;  %v4334_v58 = vrot.slane %v3037_v28, %v3967_v40  ;;  %v4338_v4 = vrot.slane %v3038_v9, %v3965_v41  ;;  %v3040_v48 = vld [vmem:[%s5891_s13 + $0x22] ss:$8 sm:$0x3] }
 0x317   : > { %v1247_v63 = vadd.f32 %v1245_v56, %v1217_v54  ;;  %v4341_v30 = vrot.slane %v3038_v9, %v3967_v40  ;;  %v4354_v28 = vrot.slane %v3039_v36, %v3965_v41  ;;  %v4368_v54 = vrot.slane %v3039_v36, %v3967_v40 }
 0x318   : > { %6222 = vst [vmem:[#allocation47_spill] sm:$0xff] %v4334_v58  ;;  %v1248_v18 = vadd.f32 %v1246_v19, %v1218_v31  ;;  %6223 = vst [vmem:[#allocation48_spill] sm:$0xff] %v4338_v4  ;;  %v4372_v31 = vrot.slane %v3040_v48, %v3965_v41 }
 0x319   : > { %v4213_v45 = vpop.permute.xlu1 %1572  ;;  %6224 = vst [vmem:[#allocation49_spill] sm:$0xff] %v4341_v30  ;;  %6225 = vst [vmem:[#allocation50_spill] sm:$0xff] %v4354_v28 }
 0x31a   : > { %6226 = vst [vmem:[#allocation51_spill] sm:$0xff] %v4368_v54  ;;  %6227 = vst [vmem:[#allocation52_spill] sm:$0xff] %v4372_v31 }
 0x31d   : > { %v1305_v29 = vpop.permute.xlu1 %1304 }
 0x31e   : > { %v1307_v34 = vsel %vm6031_vm15, %v3961_v43, %v1305_v29  ;;  %v1308_v26 = vsel %vm6031_vm15, %v1305_v29, %v3961_v43  ;;  %v4347_v43 = vmul.f32 %v4295_v53, %v1277_v49  ;;  %v4350_v29 = vmul.f32 %v4298_v20, %v1278_v57  ;;  %v3041_v57 = vld [vmem:[%s5891_s13 + $0x23] ss:$8 sm:$0x3] }
 0x31f   : > { %vm1396_vm15 = vcmp.lt.s32.totalorder %v3974_v14, 112  ;;  %v1322_v56 = vmul.f32 %v4306_v59, %v1307_v34  ;;  %v1323_v19 = vmul.f32 %v4309_v11, %v1308_v26  ;;  %v4375_v26 = vrot.slane %v3040_v48, %v3967_v40 }
 0x320   : > { %v1270_v34 = vadd.f32 %v1268_v10, %v1247_v63  ;;  %v1271_v11 = vadd.f32 %v1269_v39, %v1248_v18  ;;  %v4387_v48 = vrot.slane %v3041_v57, %v3965_v41  ;;  %v6230_v10 = vld [vmem:[#allocation12_spill] sm:$0xff]  ;;  %v6231_v18 = vld [vmem:[#allocation10_spill] sm:$0xff] }
 0x321   : > { %v1335_v32 = vpop.permute.xlu1 %1334  ;;  %6228 = vst [vmem:[#allocation53_spill] sm:$0xff] %v4375_v26  ;;  %v1298_v39 = vmul.f32 %v6230_v10, %v4347_v43  ;;  %v1299_v63 = vmul.f32 %v6230_v10, %v4350_v29  ;;  %v1328_v60 = vmul.f32 %v6231_v18, %v1322_v56  ;;  %v3042_v56 = vld [vmem:[%s5891_s13 + $0x24] ss:$8 sm:$0x3] }
 0x322   : > { %v1337_v9 = vsel %vm6039_vm0, %v3910_v1, %v1335_v32  ;;  %v1338_v49 = vsel %vm6039_vm0, %v1335_v32, %v3910_v1  ;;  %vm1456_vm0 = vcmp.lt.s32.totalorder %v3974_v14, 110  ;;  %6229 = vst [vmem:[#allocation54_spill] sm:$0xff] %v4387_v48 }
 0x323   : > { %v1352_v59 = vmul.f32 %v4313_v13, %v1337_v9  ;;  %v1353_v51 = vmul.f32 %v4334_v58, %v1338_v49  ;;  %v6232_v49 = vld [vmem:[#allocation14_spill] sm:$0xff]  ;;  %v1301_v10 = vadd.f32 %v1299_v63, %v1271_v11 }
 0x325   : > { %v1365_v35 = vpop.permute.xlu1 %1364 }
 0x326   : > { %v1367_v1 = vsel %vm1366_vm1, %v3919_v61, %v1365_v35  ;;  %v1368_v32 = vsel %vm1366_vm1, %v1365_v35, %v3919_v61  ;;  %v1329_v61 = vmul.f32 %v6231_v18, %v1323_v19  ;;  %v1300_v19 = vadd.f32 %v1298_v39, %v1270_v34 }
 0x327   : > { %v4396_v35 = vmul.f32 %v4338_v4, %v1367_v1  ;;  %v4399_v9 = vmul.f32 %v4341_v30, %v1368_v32  ;;  %v4411_v1 = vrot.slane %v3041_v57, %v3967_v40  ;;  %v6234_v32 = vld [vmem:[#allocation11_spill] sm:$0xff]  ;;  %v4429_v34 = vrot.slane %v3042_v56, %v3965_v41 }
 0x328   : > { %v1358_v0 = vmul.f32 %v6234_v32, %v1352_v59  ;;  %v1359_v22 = vmul.f32 %v6234_v32, %v1353_v51  ;;  %v4432_v59 = vrot.slane %v3042_v56, %v3967_v40  ;;  %v3043_v51 = vld [vmem:[%s5891_s13 + $0x25] ss:$8 sm:$0x3]  ;;  %v1330_v39 = vadd.f32 %v1328_v60, %v1300_v19 }
 0x329   : > { %v1395_v37 = vpop.permute.xlu1 %1394  ;;  %6233 = vst [vmem:[#allocation12_spill] sm:$0xff] %v4411_v1  ;;  %6238 = vst [vmem:[#allocation11_spill] sm:$0xff] %v4429_v34  ;;  %v1331_v63 = vadd.f32 %v1329_v61, %v1301_v10  ;;  %v6241_v56 = vld [vmem:[#allocation19_spill] sm:$0xff] }
 0x32a   : > { %v1397_v58 = vsel %vm1396_vm15, %v6232_v49, %v1395_v37  ;;  %v1398_v13 = vsel %vm1396_vm15, %v1395_v37, %v6232_v49  ;;  %6239 = vst [vmem:[#allocation16_spill] sm:$0xff] %v4432_v59  ;;  %v1360_v10 = vadd.f32 %v1358_v0, %v1330_v39  ;;  %v4470_v39 = vrot.slane %v3043_v51, %v3967_v40 }
 0x32b   : > { %v4423_v11 = vmul.f32 %v4354_v28, %v1397_v58  ;;  %v4426_v57 = vmul.f32 %v4368_v54, %v1398_v13  ;;  %v1361_v19 = vadd.f32 %v1359_v22, %v1331_v63  ;;  %v3044_v63 = vld [vmem:[%s5891_s13 + $0x26] ss:$8 sm:$0x3] }
 0x32c   : > { %6245 = vst [vmem:[#allocation19_spill] sm:$0xff] %v4470_v39 }
 0x32d   : > { %v1425_v36 = vpop.permute.xlu1 %1424  ;;  %6236 = vst [vmem:[#allocation10_spill] sm:$0xff] %v4423_v11  ;;  %6237 = vst [vmem:[#allocation14_spill] sm:$0xff] %v4426_v57 }
 0x32e   : > { %v1427_v37 = vsel %vm1426_vm11, %v6235_v3, %v1425_v36  ;;  %v1428_v49 = vsel %vm1426_vm11, %v1425_v36, %v6235_v3  ;;  %v6240_v3 = vld [vmem:[#allocation13_spill] sm:$0xff] }
 0x32f   : > { %v1388_v36 = vmul.f32 %v6240_v3, %v4396_v35  ;;  %v1389_v58 = vmul.f32 %v6240_v3, %v4399_v9  ;;  %v4442_v13 = vmul.f32 %v4372_v31, %v1427_v37  ;;  %v4445_v32 = vmul.f32 %v4375_v26, %v1428_v49  ;;  %v6243_v37 = vld [vmem:[#allocation17_spill] sm:$0xff] }
 0x330   : > { %v4455_v3 = vrot.slane %v3043_v51, %v3965_v41  ;;  %v1418_v49 = vmul.f32 %v6243_v37, %v4423_v11  ;;  %v1419_v6 = vmul.f32 %v6243_v37, %v4426_v57  ;;  %v6244_v26 = vld [vmem:[#allocation21_spill] sm:$0xff]  ;;  %v6246_v11 = vld [vmem:[#allocation20_spill] sm:$0xff] }
 0x331   : > { %v1455_v18 = vpop.permute.xlu1 %1454  ;;  %v1390_v37 = vadd.f32 %v1388_v36, %v1360_v10  ;;  %v1391_v57 = vadd.f32 %v1389_v58, %v1361_v19  ;;  %v1448_v54 = vmul.f32 %v6246_v11, %v4442_v13  ;;  %v4489_v19 = vrot.slane %v3044_v63, %v3965_v41 }
 0x332   : > { %v1457_v55 = vsel %vm1456_vm0, %v6241_v56, %v1455_v18  ;;  %v1458_v60 = vsel %vm1456_vm0, %v1455_v18, %v6241_v56  ;;  %6242 = vst [vmem:[#allocation13_spill] sm:$0xff] %v4455_v3  ;;  %v1596_v56 = vpop.permute.xlu0 %1595 }
 0x333   : > { %v1472_v22 = vmul.f32 %v4387_v48, %v1457_v55  ;;  %v1473_v18 = vmul.f32 %v4411_v1, %v1458_v60  ;;  %v1449_v55 = vmul.f32 %v6246_v11, %v4445_v32  ;;  %v1420_v58 = vadd.f32 %v1418_v49, %v1390_v37  ;;  %6248 = vst [vmem:[#allocation17_spill] sm:$0xff] %v4489_v19  ;;  %v4494_v48 = vpop.f32.mrb[8].mxu0 }
 0x334   : > { %v1421_v10 = vadd.f32 %v1419_v6, %v1391_v57  ;;  %v4492_v11 = vrot.slane %v3044_v63, %v3967_v40  ;;  %v4502_v49 = vpop.f32.mrb[9].mxu0 }
 0x335   : > { %v1485_v61 = vpop.permute.xlu1 %1484  ;;  %v1450_v6 = vadd.f32 %v1448_v54, %v1420_v58 }
 0x336   : > { %v1487_v31 = vsel %vm6073_vm12, %v6244_v26, %v1485_v61  ;;  %v1488_v0 = vsel %vm6073_vm12, %v1485_v61, %v6244_v26  ;;  %v6247_v61 = vld [vmem:[#allocation22_spill] sm:$0xff]  ;;  %6249 = vst [vmem:[#allocation21_spill] sm:$0xff] %v4492_v11  ;;  %vm6134_vm12 = vcmp.lt.s32.totalorder %v3974_v14, 95  ;;  %v1451_v57 = vadd.f32 %v1449_v55, %v1421_v10  ;;  %v1626_v55 = vpop.permute.xlu0 %1625 }
 0x337   : > { %v1502_v60 = vmul.f32 %v4429_v34, %v1487_v31  ;;  %v1503_v51 = vmul.f32 %v4432_v59, %v1488_v0  ;;  %v6250_v31 = vld [vmem:[#allocation23_spill] sm:$0xff]  ;;  %v4506_v34 = vpop.f32.mrb[10].mxu0 }
 0x338   : > { %v1478_v0 = vmul.f32 %v6250_v31, %v1472_v22  ;;  %v1479_v59 = vmul.f32 %v6250_v31, %v1473_v18 }
 0x339   : > { %v1515_v26 = vpop.permute.xlu1 %1514  ;;  %v1508_v22 = vmul.f32 %v4146_v2, %v1502_v60  ;;  %v1509_v18 = vmul.f32 %v4146_v2, %v1503_v51  ;;  %v4527_v51 = vpop.f32.mrb[11].mxu0 }
 0x33a   : > { %v1517_v1 = vsel %vm1516_vm7, %v6247_v61, %v1515_v26  ;;  %v1518_v36 = vsel %vm1516_vm7, %v1515_v26, %v6247_v61  ;;  %v3045_v26 = vld [vmem:[%s5891_s13 + $0x27] ss:$8 sm:$0x3]  ;;  %v1480_v10 = vadd.f32 %v1478_v0, %v1450_v6 }
 0x33b   : > { %v1532_v37 = vmul.f32 %v4455_v3, %v1517_v1  ;;  %v1533_v63 = vmul.f32 %v4470_v39, %v1518_v36  ;;  %v3046_v1 = vld [vmem:[%s5891_s13 + $0x30] ss:$8 sm:$0x3]  ;;  %v4522_v60 = vrot.slane %v3045_v26, %v3965_v41  ;;  %v4525_v2 = vrot.slane %v3045_v26, %v3967_v40 }
 0x33c   : > { %v1481_v39 = vadd.f32 %v1479_v59, %v1451_v57 }
 0x33d   : > { %v1545_v61 = vpop.permute.xlu1 %1544  ;;  %6251 = vst [vmem:[#allocation20_spill] sm:$0xff] %v4522_v60  ;;  %6252 = vst [vmem:[#allocation22_spill] sm:$0xff] %v4525_v2 }
 0x33e   : > { %v1547_v31 = vsel %vm6078_vm5, %v4179_v50, %v1545_v61  ;;  %v1548_v54 = vsel %vm6078_vm5, %v1545_v61, %v4179_v50  ;;  %vm6089_vm5 = vcmp.lt.s32.totalorder %v3974_v14, 94  ;;  %v1538_v50 = vmul.f32 %v4193_v16, %v1532_v37 }
 0x33f   : > { %v1562_v36 = vmul.f32 %v4489_v19, %v1547_v31  ;;  %v1563_v58 = vmul.f32 %v4492_v11, %v1548_v54  ;;  %v1539_v61 = vmul.f32 %v4193_v16, %v1533_v63  ;;  %v4533_v31 = vrot.slane %v3046_v1, %v3965_v41 }
 0x340   : > { %v4536_v54 = vrot.slane %v3046_v1, %v3967_v40  ;;  %v1510_v11 = vadd.f32 %v1508_v22, %v1480_v10  ;;  %v1511_v26 = vadd.f32 %v1509_v18, %v1481_v39  ;;  %v1603_v40 = vpop.permute.xlu0 %1602 }
 0x341   : > { %v1575_v3 = vpop.permute.xlu1 %1574  ;;  %6253 = vst [vmem:[#allocation23_spill] sm:$0xff] %v4533_v31  ;;  %v1568_v6 = vmul.f32 %v4256_v24, %v1562_v36  ;;  %v1569_v16 = vmul.f32 %v4256_v24, %v1563_v58 }
 0x342   : > { %6254 = vst [vmem:[#allocation55_spill] sm:$0xff] %v4536_v54  ;;  %v1577_v0 = vsel %vm6134_vm12, %v4213_v45, %v1575_v3  ;;  %v1578_v59 = vsel %vm6134_vm12, %v1575_v3, %v4213_v45  ;;  %v1540_v37 = vadd.f32 %v1538_v50, %v1510_v11  ;;  %v1541_v63 = vadd.f32 %v1539_v61, %v1511_v26 }
 0x343   : > { %v1592_v41 = vmul.f32 %v4522_v60, %v1577_v0  ;;  %v1593_v57 = vmul.f32 %v4525_v2, %v1578_v59 }
 0x344   : > { %v1570_v3 = vadd.f32 %v1568_v6, %v1540_v37  ;;  %v1571_v36 = vadd.f32 %v1569_v16, %v1541_v63  ;;  %v1636_v50 = vpop.permute.xlu0 %1635 }
 0x345   : > { %v1598_v39 = vmul.f32 %v1596_v56, %v1592_v41  ;;  %v1599_v22 = vmul.f32 %v1596_v56, %v1593_v57  ;;  %v1605_v18 = vpop.permute.xlu1 %1604 }
 0x346   : > { %v1607_v1 = vsel %vm6089_vm5, %v1603_v40, %v1605_v18  ;;  %v1608_v45 = vsel %vm6089_vm5, %v1605_v18, %v1603_v40  ;;  %v6264_v18 = vld [vmem:[#allocation15_spill] sm:$0xff]  ;;  %vm1736_vm5 = vcmask 130048  }
 0x347   : > { %v1622_v24 = vmul.f32 %v4533_v31, %v1607_v1  ;;  %v1623_v58 = vmul.f32 %v4536_v54, %v1608_v45  ;;  %v1600_v59 = vadd.f32 %v1598_v39, %v1570_v3  ;;  %v1601_v11 = vadd.f32 %v1599_v22, %v1571_v36  ;;  %v1721_v3 = vld [vmem:[%s6267_s7 + $0x8] sm:$0xff] }
 0x348   : > { %v6265_v1 = vmov 5   ;;  %v6266_v45 = vmov 6   ;;  %3047 = vmatprep.mubr.msk.f32.mxu1 %vm1736_vm5, %v1721_v3  ;;  %v6268_v36 = vmov 3   ;;  %v6285_v3 = vmov 22  }
 0x349   : > { %v1628_v10 = vmul.f32 %v1626_v55, %v1622_v24  ;;  %v1629_v0 = vmul.f32 %v1626_v55, %v1623_v58  ;;  %v6269_v24 = vmov 7   ;;  %v6270_v58 = vmov 8  }
 0x34b   : > { %v1630_v61 = vadd.f32 %v1628_v10, %v1600_v59  ;;  %v1631_v56 = vadd.f32 %v1629_v0, %v1601_v11  ;;  %v6271_v10 = vmov 9   ;;  %v6272_v0 = vmov 10  }
 0x34c   : > { %v6273_v59 = vmov 11   ;;  %v6274_v11 = vmov 12  }
 0x34d   : > { %v1638_v26 = vadd.f32 %v1636_v50, %v1630_v61  ;;  %v1639_v41 = vadd.f32 %v1636_v50, %v1631_v56  ;;  %v6275_v50 = vmov 13   ;;  %v6276_v61 = vmov 15  }
 0x34e   : > { %v6277_v56 = vmov 16  }
 0x34f   : > { %v1640_v57 = vsub.f32 0.0, %v1638_v26  ;;  %v1641_v2 = vsub.f32 0.0, %v1639_v41 }
 0x351   : > { %v1642_v60 = vmul.f32 1.442695, %v1640_v57  ;;  %v1644_v19 = vmul.f32 1.442695, %v1641_v2  ;;  %v6263_v2 = vmov 4   ;;  %v6279_v57 = vmov 18  }
 0x353   : > { %3327 = vpow2.f32 %v1642_v60  ;;  %v6262_v60 = vmov 2  }
 0x354   : > { %3329 = vpow2.f32 %v1644_v19  ;;  %v6260_v19 = vld [vmem:[#allocation18_spill] sm:$0xff] }
 0x35d   : > { %v3328_v6 = vpop.eup %3327 }
 0x35e   : > { %v3330_v16 = vpop.eup %3329  ;;  %v1646_v40 = vadd.f32 1.0, %v3328_v6 }
 0x35f   : > { %v1647_v37 = vadd.f32 1.0, %v3330_v16  ;;  %v6280_v16 = vmov 19  }
 0x360   : > { %3331 = vrcp.f32 %v1646_v40  ;;  %v6281_v40 = vmov 14  }
 0x361   : > { %3333 = vrcp.f32 %v1647_v37 }
 0x36a   : > { %v3332_v55 = vpop.eup %3331 }
 0x36b   : > { %v4554_v63 = vmul.f32 %v3332_v55, %v1638_v26  ;;  %v3334_v39 = vpop.eup %3333  ;;  %v4641_v26 = vpop.permute.xlu1 %1733  ;;  %v6282_v55 = vmov 20  }
 0x36c   : > { %v4560_v22 = vmul.f32 %v3334_v39, %v1639_v41  ;;  %v6278_v41 = vmov 17  }
 0x36d   : > { %1662 = vrot.lane.b32.xlu0 %v4554_v63, %s6255_s24  ;;  %1654 = vrot.lane.b32.xlu1 %v4554_v63, %s6256_s27 }
 0x36f   : > { %v4648_v6 = vpop.permute.xlu1 %527 }
 0x371   : > { %1670 = vrot.lane.b32.xlu0 %v4554_v63, %s6257_s17  ;;  %1656 = vrot.lane.b32.xlu1 %v4560_v22, %s6256_s27 }
 0x373   : > { %v4656_v37 = vpop.permute.xlu1 %537 }
 0x375   : > { %1678 = vrot.lane.b32.xlu0 %v4554_v63, %s6180_s18  ;;  %1664 = vrot.lane.b32.xlu1 %v4560_v22, %s6255_s24 }
 0x377   : > { %v4661_v39 = vpop.permute.xlu1 %1845 }
 0x378   : > { %6283 = vst [vmem:[#allocation18_spill] sm:$0xff] %v4661_v39 }
 0x379   : > { %1688 = vrot.lane.b32.xlu0 %v4554_v63, %s6258_s22  ;;  %1672 = vrot.lane.b32.xlu1 %v4560_v22, %s6257_s17 }
 0x37d   : > { %1696 = vrot.lane.b32.xlu0 %v4554_v63, %s6259_s25  ;;  %1680 = vrot.lane.b32.xlu1 %v4560_v22, %s6180_s18 }
 0x381   : > { %1704 = vrot.lane.b32.xlu0 %v4554_v63, %s6183_s26  ;;  %1877 = vperm.xlu1 %3240, %v6260_v19  }
 0x385   : > { %1712 = vrot.lane.b32.xlu0 %v4554_v63, %s6261_s15  ;;  %1690 = vrot.lane.b32.xlu1 %v4560_v22, %s6258_s22 }
 0x386   : > { %3241 = vset.pattern.permute.xlu1 %v6262_v60  ;;  %v4664_v60 = vpop.permute.xlu0 %1873 }
 0x389   : > { %1909 = vperm.xlu0 %3242, %v6260_v19   ;;  %1698 = vrot.lane.b32.xlu1 %v4560_v22, %s6259_s25 }
 0x38d   : > { %3244 = vset.pattern.permute.xlu0 %v6263_v2  ;;  %1706 = vrot.lane.b32.xlu1 %v4560_v22, %s6183_s26 }
 0x38e   : > { %1969 = vperm.xlu0 %3244, %v6264_v18  }
 0x391   : > { %1714 = vrot.lane.b32.xlu1 %v4560_v22, %s6261_s15 }
 0x392   : > { %3247 = vset.pattern.permute.xlu0 %v6265_v1 }
 0x393   : > { %2005 = vperm.xlu0 %3247, %v6260_v19  }
 0x395   : > { %1905 = vperm.xlu1 %3241, %v6264_v18  }
 0x397   : > { %3248 = vset.pattern.permute.xlu0 %v6266_v45 }
 0x398   : > { %2033 = vperm.xlu0 %3248, %v6264_v18  }
 0x399   : > { %3243 = vset.pattern.permute.xlu1 %v6268_v36 }
 0x39a   : > { %1937 = vperm.xlu1 %3243, %v6264_v18  }
 0x39c   : > { %3251 = vset.pattern.permute.xlu0 %v6269_v24 }
 0x39d   : > { %2069 = vperm.xlu0 %3251, %v6260_v19  }
 0x39e   : > { %1941 = vperm.xlu1 %3243, %v6260_v19  }
 0x3a1   : > { %3252 = vset.pattern.permute.xlu0 %v6270_v58 }
 0x3a2   : > { %2097 = vperm.xlu0 %3252, %v6264_v18   ;;  %3245 = vset.pattern.permute.xlu1 %v6263_v2  ;;  %v6284_v2 = vmov 21  }
 0x3a3   : > { %1973 = vperm.xlu1 %3245, %v6260_v19  }
 0x3a6   : > { %3255 = vset.pattern.permute.xlu0 %v6271_v10 }
 0x3a7   : > { %2133 = vperm.xlu0 %3255, %v6260_v19   ;;  %3246 = vset.pattern.permute.xlu1 %v6265_v1 }
 0x3a8   : > { %2001 = vperm.xlu1 %3246, %v6264_v18  }
 0x3ab   : > { %3256 = vset.pattern.permute.xlu0 %v6272_v0 }
 0x3ac   : > { %2161 = vperm.xlu0 %3256, %v6264_v18   ;;  %3249 = vset.pattern.permute.xlu1 %v6266_v45 }
 0x3ad   : > { %2037 = vperm.xlu1 %3249, %v6260_v19  }
 0x3b0   : > { %3259 = vset.pattern.permute.xlu0 %v6273_v59 }
 0x3b1   : > { %2197 = vperm.xlu0 %3259, %v6260_v19   ;;  %3250 = vset.pattern.permute.xlu1 %v6269_v24 }
 0x3b2   : > { %2065 = vperm.xlu1 %3250, %v6264_v18  }
 0x3b5   : > { %3260 = vset.pattern.permute.xlu0 %v6274_v11 }
 0x3b6   : > { %2213 = vperm.xlu0 %3260, %v6264_v18   ;;  %3253 = vset.pattern.permute.xlu1 %v6270_v58 }
 0x3b7   : > { %2101 = vperm.xlu1 %3253, %v6260_v19  }
 0x3ba   : > { %3263 = vset.pattern.permute.xlu0 %v6275_v50 }
 0x3bb   : > { %2249 = vperm.xlu0 %3263, %v6260_v19   ;;  %3254 = vset.pattern.permute.xlu1 %v6271_v10 }
 0x3bc   : > { %2129 = vperm.xlu1 %3254, %v6264_v18  }
 0x3bf   : > { %3265 = vset.pattern.permute.xlu0 %v6276_v61 }
 0x3c0   : > { %2309 = vperm.xlu0 %3265, %v6264_v18   ;;  %3257 = vset.pattern.permute.xlu1 %v6272_v0 }
 0x3c1   : > { %2165 = vperm.xlu1 %3257, %v6260_v19  }
 0x3c4   : > { %3268 = vset.pattern.permute.xlu0 %v6277_v56 }
 0x3c5   : > { %2345 = vperm.xlu0 %3268, %v6260_v19   ;;  %3258 = vset.pattern.permute.xlu1 %v6273_v59 }
 0x3c6   : > { %2193 = vperm.xlu1 %3258, %v6264_v18  }
 0x3c9   : > { %3269 = vset.pattern.permute.xlu0 %v6278_v41 }
 0x3ca   : > { %2373 = vperm.xlu0 %3269, %v6264_v18   ;;  %3261 = vset.pattern.permute.xlu1 %v6274_v11 }
 0x3cb   : > { %2217 = vperm.xlu1 %3261, %v6260_v19  }
 0x3ce   : > { %3272 = vset.pattern.permute.xlu0 %v6279_v57 }
 0x3cf   : > { %2409 = vperm.xlu0 %3272, %v6260_v19   ;;  %3262 = vset.pattern.permute.xlu1 %v6275_v50  ;;  %v6286_v50 = vmov 23  }
 0x3d0   : > { %2245 = vperm.xlu1 %3262, %v6264_v18  }
 0x3d3   : > { %3273 = vset.pattern.permute.xlu0 %v6280_v16 }
 0x3d4   : > { %2437 = vperm.xlu0 %3273, %v6264_v18   ;;  %3264 = vset.pattern.permute.xlu1 %v6281_v40 }
 0x3d5   : > { %2277 = vperm.xlu1 %3264, %v6264_v18  }
 0x3d8   : > { %3276 = vset.pattern.permute.xlu0 %v6282_v55 }
 0x3d9   : > { %2473 = vperm.xlu0 %3276, %v6260_v19   ;;  %2281 = vperm.xlu1 %3264, %v6260_v19  }
 0x3dd   : > { %3277 = vset.pattern.permute.xlu0 %v6284_v2  ;;  %3266 = vset.pattern.permute.xlu1 %v6276_v61 }
 0x3de   : > { %2501 = vperm.xlu0 %3277, %v6264_v18   ;;  %2313 = vperm.xlu1 %3266, %v6260_v19  }
 0x3df   : > { %v1655_v1 = vpop.permute.xlu1 %1654  ;;  %v1663_v45 = vpop.permute.xlu0 %1662 }
 0x3e2   : > { %3280 = vset.pattern.permute.xlu0 %v6285_v3  ;;  %3267 = vset.pattern.permute.xlu1 %v6277_v56 }
 0x3e3   : > { %2537 = vperm.xlu0 %3280, %v6260_v19   ;;  %v1657_v36 = vpop.permute.xlu1 %1656  ;;  %2341 = vperm.xlu1 %3267, %v6264_v18   ;;  %v1671_v59 = vpop.permute.xlu0 %1670 }
 0x3e4   : > { %v1658_v24 = vsel %vm1073_vm8, %v1655_v1, %v1657_v36  ;;  %v1659_v58 = vsel %vm1073_vm8, %v1657_v36, %v1655_v1 }
 0x3e5   : > { %v1660_v10 = vmul.f32 %v1659_v58, %v4079_v25  ;;  %v1661_v0 = vmul.f32 %v1658_v24, %v4095_v17 }
 0x3e7   : > { %v3087_v11 = vpack.c.bf16 %v1660_v10, %v4182_v52  ;;  %3281 = vset.pattern.permute.xlu0 %v6286_v50  ;;  %v1665_v61 = vpop.permute.xlu1 %1664  ;;  %v3085_v56 = vpack.c.bf16 %v1661_v0, %v4185_v44  ;;  %3270 = vset.pattern.permute.xlu1 %v6278_v41  ;;  %v1679_v58 = vpop.permute.xlu0 %1678  ;;  %v6287_v0 = vmov 24  }
 0x3e8   : > { %v1666_v40 = vsel %vm1103_vm9, %v1663_v45, %v1665_v61  ;;  %v1667_v1 = vsel %vm1103_vm9, %v1665_v61, %v1663_v45  ;;  %2565 = vperm.xlu0 %3281, %v6264_v18   ;;  %2377 = vperm.xlu1 %3270, %v6260_v19  }
 0x3e9   : > { %v1668_v36 = vmul.f32 %v1667_v1, %v4104_v8  ;;  %v1669_v52 = vmul.f32 %v1666_v40, %v4107_v46  ;;  %3086 = vmatprep.subr.bf16.mxu1 %v3085_v56 }
 0x3ea   : > { %3088 = vmatpush1.bf16.msra.mxu1 %v3087_v11 }
 0x3eb   : > { %v3091_v44 = vpack.c.bf16 %v1668_v36, %v4196_v33  ;;  %v1673_v24 = vpop.permute.xlu1 %1672  ;;  %v3089_v41 = vpack.c.bf16 %v1669_v52, %v4199_v15  ;;  %v1689_v36 = vpop.permute.xlu0 %1688 }
 0x3ec   : > { %v1674_v10 = vsel %vm1133_vm10, %v1671_v59, %v1673_v24  ;;  %v1675_v45 = vsel %vm1133_vm10, %v1673_v24, %v1671_v59  ;;  %3284 = vset.pattern.permute.xlu0 %v6287_v0  ;;  %3271 = vset.pattern.permute.xlu1 %v6279_v57  ;;  %v1724_v59 = vld [vmem:[%s6186_s8] sm:$0xff]  ;;  %s6337_s8 = smov 96  }
 0x3ed   : > { %v1676_v61 = vmul.f32 %v1675_v45, %v4125_v62  ;;  %v1677_v11 = vmul.f32 %v1674_v10, %v4140_v38  ;;  %2601 = vperm.xlu0 %3284, %v6260_v19   ;;  %3090 = vmatprep.subr.bf16.mxu1 %v3089_v41  ;;  %v496_v24 = vld [vmem:[%s6161_s2 + $0x20] sm:$0xff]  ;;  %v6290_v41 = vld [vmem:[#allocation24_spill] sm:$0xff] }
 0x3ee   : > { %3092 = vmatpush1.bf16.msra.mxu1 %v3091_v44  ;;  %2405 = vperm.xlu1 %3271, %v6264_v18   ;;  %v6288_v18 = vmov 0  }
 0x3ef   : > { %v3095_v33 = vpack.c.bf16 %v1676_v61, %v4231_v12  ;;  %v1681_v15 = vpop.permute.xlu1 %1680  ;;  %v3093_v56 = vpack.c.bf16 %v1677_v11, %v4234_v27  ;;  %v6289_v12 = vld [vmem:[#allocation25_spill] sm:$0xff] }
 0x3f0   : > { %v1682_v57 = vsel %vm1223_vm13, %v1679_v58, %v1681_v15  ;;  %v1683_v40 = vsel %vm1223_vm13, %v1681_v15, %v1679_v58  ;;  %v1687_v27 = vmul.f32 %v4560_v22, %v6289_v12  ;;  %v1686_v58 = vmul.f32 %v4554_v63, %v6290_v41  ;;  %v3431_v22 = vld [vmem:[%s6189_s9 + $0x8] sm:$0xff]  ;;  %v3432_v63 = vld [vmem:[%s6189_s9] sm:$0xff]  ;;  %s6338_s9 = smov 95  }
 0x3f1   : > { %v1684_v19 = vmul.f32 %v1683_v40, %v4251_v21  ;;  %v1685_v1 = vmul.f32 %v1682_v57, %v4254_v47  ;;  %3285 = vset.pattern.permute.xlu0 %v6288_v18  ;;  %3094 = vmatprep.subr.bf16.mxu1 %v3093_v56 }
 0x3f2   : > { %1728 = vperm.xlu0 %3285, %v1724_v59   ;;  %3096 = vmatpush1.bf16.msra.mxu1 %v3095_v33  ;;  %v3101_v10 = vpack.c.bf16 %v1687_v27, %v4019_v42 }
 0x3f3   : > { %v3099_v52 = vpack.c.bf16 %v1684_v19, %v4276_v7  ;;  %v3097_v44 = vpack.c.bf16 %v1685_v1, %v4279_v5  ;;  %3274 = vset.pattern.permute.xlu1 %v6280_v16  ;;  %v498_v5 = vld [vmem:[%s6161_s2 + $0x30] sm:$0xff]  ;;  %v1697_v7 = vpop.permute.xlu0 %1696  ;;  %v3103_v16 = vpack.c.bf16 %v1686_v58, %v4015_v23  ;;  %s6332_s2 = smov 110  }
 0x3f4   : > { %2441 = vperm.xlu1 %3274, %v3431_v22  }
 0x3f5   : > { %3098 = vmatprep.subr.bf16.mxu1 %v3097_v44 }
 0x3f6   : > { %522 = vperm.xlu0 %3285, %v496_v24   ;;  %3100 = vmatpush1.bf16.msra.mxu1 %v3099_v52  ;;  %v6293_v24 = vld [vmem:[#allocation51_spill] sm:$0xff] }
 0x3f7   : > { %3102 = vmatprep.subr.bf16.mxu1 %v3101_v10  ;;  %v1705_v42 = vpop.permute.xlu0 %1704  ;;  %v6295_v10 = vld [vmem:[#allocation14_spill] sm:$0xff] }
 0x3f8   : > { %3275 = vset.pattern.permute.xlu1 %v6282_v55 }
 0x3f9   : > { %2469 = vperm.xlu1 %3275, %v3432_v63  }
 0x3fa   : > { %532 = vperm.xlu0 %3285, %v498_v5   ;;  %3104 = vmatpush1.bf16.msra.mxu1 %v3103_v16  ;;  %v6296_v16 = vld [vmem:[#allocation52_spill] sm:$0xff] }
 0x3fb   : > { %v1713_v23 = vpop.permute.xlu0 %1712 }
 0x3fd   : > { %3278 = vset.pattern.permute.xlu1 %v6284_v2 }
 0x3fe   : > { %1840 = vperm.xlu0 %3285, %v3432_v63   ;;  %2505 = vperm.xlu1 %3278, %v3431_v22  }
 0x400   : > { %v4739_v45 = vpop.permute.xlu1 %1877 }
 0x401   : > { %6291 = vst [vmem:[#allocation15_spill] sm:$0xff] %v4739_v45  ;;  %v6348_v45 = vld [vmem:[#allocation27_spill] sm:$0xff] }
 0x402   : > { %3279 = vset.pattern.permute.xlu1 %v6285_v3 }
 0x403   : > { %2533 = vperm.xlu1 %3279, %v3432_v63  }
 0x404   : > { %v1691_v61 = vpop.permute.xlu1 %1690 }
 0x405   : > { %v1692_v55 = vsel %vm1276_vm14, %v1689_v36, %v1691_v61  ;;  %v1693_v11 = vsel %vm1276_vm14, %v1691_v61, %v1689_v36 }
 0x406   : > { %v1694_v33 = vmul.f32 %v1692_v55, %v4295_v53  ;;  %v1695_v2 = vmul.f32 %v1693_v11, %v4298_v20 }
 0x407   : > { %3282 = vset.pattern.permute.xlu1 %v6286_v50 }
 0x408   : > { %v3107_v15 = vpack.c.bf16 %v1694_v33, %v4347_v43  ;;  %v1699_v56 = vpop.permute.xlu1 %1698  ;;  %v3105_v3 = vpack.c.bf16 %v1695_v2, %v4350_v29  ;;  %v4751_v59 = vpop.permute.xlu0 %1909  ;;  %2569 = vperm.xlu1 %3282, %v3431_v22  }
 0x409   : > { %6292 = vst [vmem:[#allocation25_spill] sm:$0xff] %v4751_v59  ;;  %v1700_v57 = vsel %vm1366_vm1, %v1697_v7, %v1699_v56  ;;  %v1701_v40 = vsel %vm1366_vm1, %v1699_v56, %v1697_v7 }
 0x40a   : > { %v1702_v19 = vmul.f32 %v1700_v57, %v4338_v4  ;;  %v1703_v1 = vmul.f32 %v1701_v40, %v4341_v30  ;;  %3106 = vmatprep.subr.bf16.mxu1 %v3105_v3  ;;  %v6367_v30 = vld [vmem:[#allocation33_spill] sm:$0xff] }
 0x40b   : > { %3108 = vmatpush1.bf16.msra.mxu1 %v3107_v15 }
 0x40c   : > { %v3111_v43 = vpack.c.bf16 %v1702_v19, %v4396_v35  ;;  %v1707_v50 = vpop.permute.xlu1 %1706  ;;  %v3109_v29 = vpack.c.bf16 %v1703_v1, %v4399_v9  ;;  %3283 = vset.pattern.permute.xlu1 %v6287_v0  ;;  %v6294_v35 = vld [vmem:[#allocation10_spill] sm:$0xff] }
 0x40d   : > { %v1708_v27 = vsel %vm1396_vm15, %v1705_v42, %v1707_v50  ;;  %v1709_v36 = vsel %vm1396_vm15, %v1707_v50, %v1705_v42  ;;  %v4766_v52 = vpop.permute.xlu0 %1969  ;;  %2597 = vperm.xlu1 %3283, %v3432_v63   ;;  %v6297_v42 = vld [vmem:[#allocation53_spill] sm:$0xff] }
 0x40e   : > { %v1710_v44 = vmul.f32 %v1708_v27, %v4354_v28  ;;  %v1711_v58 = vmul.f32 %v1709_v36, %v6293_v24  ;;  %3110 = vmatprep.subr.bf16.mxu1 %v3109_v29  ;;  %v6366_v24 = vld [vmem:[#allocation32_spill] sm:$0xff] }
 0x40f   : > { %3112 = vmatpush1.bf16.msra.mxu1 %v3111_v43 }
 0x410   : > { %v3115_v22 = vpack.c.bf16 %v1710_v44, %v6294_v35  ;;  %v1715_v9 = vpop.permute.xlu1 %1714  ;;  %v3113_v0 = vpack.c.bf16 %v1711_v58, %v6295_v10 }
 0x411   : > { %v1716_v5 = vsel %vm1426_vm11, %v1713_v23, %v1715_v9  ;;  %v1717_v7 = vsel %vm1426_vm11, %v1715_v9, %v1713_v23  ;;  %3286 = vset.pattern.permute.xlu1 %v6288_v18  ;;  %v1720_v23 = vld [vmem:[%s6267_s7] sm:$0xff]  ;;  %v1723_v18 = vld [vmem:[%s6267_s7 + $0x18] sm:$0xff]  ;;  %v4833_v9 = vadd.f32 %v4527_v51, %v4648_v6 }
 0x412   : > { %v1718_v63 = vmul.f32 %v1716_v5, %v6296_v16  ;;  %v1719_v61 = vmul.f32 %v1717_v7, %v6297_v42  ;;  %3114 = vmatprep.subr.bf16.mxu1 %v3113_v0  ;;  %v4779_v55 = vpop.permute.xlu0 %2005  ;;  %v6313_v0 = vld [vmem:[#allocation8_spill] sm:$0xff] }
 0x413   : > { %6298 = vst [vmem:[#allocation24_spill] sm:$0xff] %v4779_v55  ;;  %3116 = vmatpush1.bf16.msra.mxu1 %v3115_v22  ;;  %v4829_v22 = vadd.f32 %v4506_v34, %v4648_v6  ;;  %v4839_v5 = vadd.f32 %v6313_v0, %v4656_v37 }
 0x414   : > { %v3119_v11 = vpack.c.bf16 %v1718_v63, %v4442_v13  ;;  %v3117_v33 = vpack.c.bf16 %v1719_v61, %v4445_v32  ;;  %v1722_v13 = vld [vmem:[%s6267_s7 + $0x10] sm:$0xff]  ;;  %v6314_v63 = vld [vmem:[#allocation9_spill] sm:$0xff]  ;;  %s6335_s7 = smov 97  }
 0x415   : > { %v688_v7 = vsub.f32 0.0, %v4829_v22  ;;  %v4844_v61 = vadd.f32 %v6314_v63, %v4656_v37  ;;  %v692_v34 = vsub.f32 0.0, %v4839_v5 }
 0x416   : > { %3118 = vmatprep.subr.bf16.mxu1 %v3117_v33 }
 0x417   : > { %3120 = vmatpush1.bf16.msra.mxu1 %v3119_v11  ;;  %v4786_v2 = vpop.permute.xlu0 %2033  ;;  %v689_v11 = vsub.f32 0.0, %v4833_v9  ;;  %v714_v51 = vmul.f32 1.442695, %v688_v7  ;;  %v693_v6 = vsub.f32 0.0, %v4844_v61 }
 0x419   : > { %3335 = vpow2.f32 %v714_v51  ;;  %v724_v54 = vmul.f32 1.442695, %v693_v6 }
 0x41a   : > { %1808 = vmatmul.mubr.f32.vlgmr.msra.gmra.mrb[6].mxu1 %v1720_v23  ;;  %v716_v23 = vmul.f32 1.442695, %v689_v11 }
 0x41b   : > { %3048 = vmatprep.mubr.msk.f32.mxu1 %vm1736_vm5, %v1723_v18  ;;  %v722_v18 = vmul.f32 1.442695, %v692_v34  ;;  %vm6364_vm5 = vcmp.lt.s32.totalorder %v3974_v14, 31 }
 0x41c   : > { %v4795_v32 = vpop.permute.xlu0 %2069  ;;  %3337 = vpow2.f32 %v716_v23 }
 0x41d   : > { %6299 = vst [vmem:[#allocation10_spill] sm:$0xff] %v4795_v32  ;;  %3339 = vpow2.f32 %v722_v18 }
 0x41e   : > { %1814 = vmatmul.mubr.f32.gmra.mrb[8].mxu1 %v1722_v13  ;;  %3341 = vpow2.f32 %v724_v54 }
 0x421   : > { %v4797_v15 = vpop.permute.xlu0 %2097 }
 0x426   : > { %v4799_v56 = vpop.permute.xlu0 %2133 }
 0x427   : > { %6300 = vst [vmem:[#allocation14_spill] sm:$0xff] %v4799_v56 }
 0x42b   : > { %v4801_v3 = vpop.permute.xlu0 %2161 }
 0x430   : > { %v4803_v57 = vpop.permute.xlu0 %2197 }
 0x431   : > { %6301 = vst [vmem:[#allocation56_spill] sm:$0xff] %v4803_v57 }
 0x435   : > { %v4805_v40 = vpop.permute.xlu0 %2213 }
 0x43a   : > { %v4807_v19 = vpop.permute.xlu0 %2249 }
 0x43b   : > { %6302 = vst [vmem:[#allocation57_spill] sm:$0xff] %v4807_v19 }
 0x43f   : > { %v4809_v1 = vpop.permute.xlu0 %2309 }
 0x440   : > { %6303 = vst [vmem:[#allocation58_spill] sm:$0xff] %v4809_v1 }
 0x444   : > { %v4811_v43 = vpop.permute.xlu0 %2345 }
 0x445   : > { %6304 = vst [vmem:[#allocation59_spill] sm:$0xff] %v4811_v43  ;;  %v6316_v43 = vld [vmem:[#allocation7_spill] sm:$0xff] }
 0x449   : > { %v4813_v50 = vpop.permute.xlu0 %2373 }
 0x44a   : > { %6305 = vst [vmem:[#allocation60_spill] sm:$0xff] %v4813_v50 }
 0x44e   : > { %v4815_v29 = vpop.permute.xlu0 %2409 }
 0x44f   : > { %6306 = vst [vmem:[#allocation61_spill] sm:$0xff] %v4815_v29  ;;  %v6315_v29 = vld [vmem:[#allocation6_spill] sm:$0xff] }
 0x453   : > { %v4817_v27 = vpop.permute.xlu0 %2437 }
 0x454   : > { %6307 = vst [vmem:[#allocation62_spill] sm:$0xff] %v4817_v27 }
 0x458   : > { %v4819_v36 = vpop.permute.xlu0 %2473 }
 0x459   : > { %6308 = vst [vmem:[#allocation63_spill] sm:$0xff] %v4819_v36 }
 0x45d   : > { %v4821_v44 = vpop.permute.xlu0 %2501 }
 0x45e   : > { %6309 = vst [vmem:[#allocation64_spill] sm:$0xff] %v4821_v44 }
 0x462   : > { %v4823_v58 = vpop.permute.xlu0 %2537 }
 0x463   : > { %6310 = vst [vmem:[#allocation65_spill] sm:$0xff] %v4823_v58 }
 0x467   : > { %v4825_v35 = vpop.permute.xlu0 %2565 }
 0x468   : > { %6311 = vst [vmem:[#allocation66_spill] sm:$0xff] %v4825_v35 }
 0x46c   : > { %v4835_v10 = vpop.permute.xlu0 %2601 }
 0x46d   : > { %6312 = vst [vmem:[#allocation67_spill] sm:$0xff] %v4835_v10 }
 0x471   : > { %v4848_v33 = vpop.permute.xlu0 %1728 }
 0x475   : > { %v523_v13 = vpop.permute.xlu0 %522 }
 0x476   : > { %v656_v0 = vadd.f32 %v4494_v48, %v523_v13  ;;  %v658_v10 = vadd.f32 %v4502_v49, %v523_v13  ;;  %v3336_v49 = vpop.eup %3335 }
 0x477   : > { %v3338_v6 = vpop.eup %3337  ;;  %v736_v18 = vadd.f32 1.0, %v3336_v49 }
 0x478   : > { %v686_v37 = vsub.f32 0.0, %v656_v0  ;;  %v687_v63 = vsub.f32 0.0, %v658_v10  ;;  %v3340_v23 = vpop.eup %3339  ;;  %v737_v13 = vadd.f32 1.0, %v3338_v6 }
 0x479   : > { %v533_v31 = vpop.permute.xlu0 %532 }
 0x47a   : > { %v710_v58 = vmul.f32 1.442695, %v686_v37  ;;  %v712_v36 = vmul.f32 1.442695, %v687_v63  ;;  %v668_v7 = vadd.f32 %v6315_v29, %v533_v31  ;;  %v670_v19 = vadd.f32 %v6316_v43, %v533_v31  ;;  %v3342_v37 = vpop.eup %3341 }
 0x47b   : > { %v740_v29 = vadd.f32 1.0, %v3340_v23  ;;  %v741_v54 = vadd.f32 1.0, %v3342_v37 }
 0x47c   : > { %3343 = vpow2.f32 %v710_v58  ;;  %v690_v11 = vsub.f32 0.0, %v668_v7  ;;  %v691_v34 = vsub.f32 0.0, %v670_v19 }
 0x47d   : > { %3345 = vpow2.f32 %v712_v36 }
 0x47e   : > { %v718_v48 = vmul.f32 1.442695, %v690_v11  ;;  %v720_v51 = vmul.f32 1.442695, %v691_v34 }
 0x480   : > { %3347 = vpow2.f32 %v718_v48 }
 0x481   : > { %3349 = vpow2.f32 %v720_v51 }
 0x482   : > { %3351 = vrcp.f32 %v736_v18 }
 0x483   : > { %3353 = vrcp.f32 %v737_v13 }
 0x486   : > { %v3344_v63 = vpop.eup %3343 }
 0x487   : > { %v3346_v57 = vpop.eup %3345  ;;  %v734_v31 = vadd.f32 1.0, %v3344_v63 }
 0x488   : > { %v735_v43 = vadd.f32 1.0, %v3346_v57 }
 0x489   : > { %3355 = vrcp.f32 %v734_v31 }
 0x48a   : > { %v3348_v36 = vpop.eup %3347  ;;  %3357 = vrcp.f32 %v735_v43 }
 0x48b   : > { %v3350_v58 = vpop.eup %3349  ;;  %3359 = vrcp.f32 %v740_v29  ;;  %v738_v11 = vadd.f32 1.0, %v3348_v36 }
 0x48c   : > { %3361 = vrcp.f32 %v741_v54  ;;  %v739_v34 = vadd.f32 1.0, %v3350_v58  ;;  %v3352_v48 = vpop.eup %3351 }
 0x48d   : > { %3363 = vrcp.f32 %v738_v11  ;;  %v3354_v51 = vpop.eup %3353  ;;  %v784_v23 = vmul.f32 %v3352_v48, %v4829_v22 }
 0x48e   : > { %3365 = vrcp.f32 %v739_v34  ;;  %v785_v57 = vmul.f32 %v3354_v51, %v4833_v9 }
 0x493   : > { %v3356_v49 = vpop.eup %3355 }
 0x494   : > { %v3358_v6 = vpop.eup %3357  ;;  %v782_v18 = vmul.f32 %v3356_v49, %v656_v0  ;;  %v4859_v0 = vpop.permute.xlu1 %1905 }
 0x495   : > { %v3360_v37 = vpop.eup %3359  ;;  %v783_v13 = vmul.f32 %v3358_v6, %v658_v10 }
 0x496   : > { %v3362_v63 = vpop.eup %3361  ;;  %v3123_v31 = vpack.c.bf16 %v784_v23, %v782_v18  ;;  %v788_v54 = vmul.f32 %v3360_v37, %v4839_v5 }
 0x497   : > { %v3364_v43 = vpop.eup %3363  ;;  %v3121_v29 = vpack.c.bf16 %v785_v57, %v783_v13  ;;  %v789_v11 = vmul.f32 %v3362_v63, %v4844_v61 }
 0x498   : > { %v3366_v36 = vpop.eup %3365  ;;  %v786_v58 = vmul.f32 %v3364_v43, %v668_v7  ;;  %v4861_v9 = vpop.permute.xlu1 %1937 }
 0x499   : > { %v787_v34 = vmul.f32 %v3366_v36, %v670_v19  ;;  %3122 = vmatprep.subr.bf16.mxu0 %v3121_v29 }
 0x49a   : > { %v3127_v56 = vpack.c.bf16 %v788_v54, %v786_v58  ;;  %3124 = vmatpush1.bf16.msra.mxu0 %v3123_v31 }
 0x49b   : > { %v3125_v22 = vpack.c.bf16 %v789_v11, %v787_v34 }
 0x49c   : > { %v4863_v10 = vpop.permute.xlu1 %1941 }
 0x49d   : > { %3126 = vmatprep.subr.bf16.mxu0 %v3125_v22  ;;  %6317 = vst [vmem:[#allocation8_spill] sm:$0xff] %v4863_v10  ;;  %v6347_v10 = vld [vmem:[#allocation26_spill] sm:$0xff] }
 0x49e   : > { %3128 = vmatpush1.bf16.msra.mxu0 %v3127_v56 }
 0x4a0   : > { %v4865_v48 = vpop.permute.xlu1 %1973 }
 0x4a1   : > { %6318 = vst [vmem:[#allocation9_spill] sm:$0xff] %v4865_v48 }
 0x4a4   : > { %v4867_v51 = vpop.permute.xlu1 %2001 }
 0x4a8   : > { %v4869_v7 = vpop.permute.xlu1 %2037 }
 0x4a9   : > { %6319 = vst [vmem:[#allocation6_spill] sm:$0xff] %v4869_v7 }
 0x4ac   : > { %v4887_v37 = vpop.permute.xlu1 %2065 }
 0x4ed   : > { %v1809_v5 = vpop.f32.mrb[6].mxu1 }
 0x4ee   : > { %v4872_v19 = vadd.f32 %v1809_v5, %v4848_v33  ;;  %v1811_v61 = vpop.f32.mrb[7].mxu1 }
 0x4ef   : > { %v4879_v6 = vadd.f32 %v1811_v61, %v4848_v33 }
 0x4f0   : > { %1920 = vrot.lane.b32.xlu1 %v4872_v19, %s6320_s1  ;;  %1820 = vrot.lane.b32.xlu0 %v4872_v19, %s6321_s3 }
 0x4f1   : > { %v1815_v56 = vpop.f32.mrb[8].mxu1 }
 0x4f2   : > { %v1817_v49 = vpop.f32.mrb[9].mxu1  ;;  %v4882_v23 = vadd.f32 %v1815_v56, %v4641_v26 }
 0x4f3   : > { %v4885_v18 = vadd.f32 %v1817_v49, %v4641_v26  ;;  %v4901_v26 = vpop.permute.xlu1 %2101 }
 0x4f4   : > { %6322 = vst [vmem:[#allocation7_spill] sm:$0xff] %v4882_v23  ;;  %1952 = vrot.lane.b32.xlu1 %v4872_v19, %s6323_s4  ;;  %1856 = vrot.lane.b32.xlu0 %v4872_v19, %s6324_s5  ;;  %v3131_v33 = vpack.c.bf16 %v4882_v23, %v4872_v19  ;;  %6327 = vst [vmem:[#allocation68_spill] sm:$0xff] %v4901_v26 }
 0x4f5   : > { %v3129_v57 = vpack.c.bf16 %v4885_v18, %v4879_v6 }
 0x4f7   : > { %3130 = vmatprep.subr.bf16.mxu0 %v3129_v57  ;;  %v4907_v13 = vpop.permute.xlu1 %2129 }
 0x4f8   : > { %1984 = vrot.lane.b32.xlu1 %v4872_v19, %s6325_s0  ;;  %1888 = vrot.lane.b32.xlu0 %v4872_v19, %s6326_s19 }
 0x4f9   : > { %3132 = vmatpush1.bf16.msra.mxu0 %v3131_v33 }
 0x4fb   : > { %v4917_v63 = vpop.permute.xlu1 %2165 }
 0x4fc   : > { %2016 = vrot.lane.b32.xlu1 %v4872_v19, %s6256_s27  ;;  %2228 = vrot.lane.b32.xlu0 %v4872_v19, %s6258_s22  ;;  %6328 = vst [vmem:[#allocation69_spill] sm:$0xff] %v4917_v63 }
 0x4ff   : > { %v4923_v31 = vpop.permute.xlu1 %2193 }
 0x500   : > { %2048 = vrot.lane.b32.xlu1 %v4872_v19, %s6255_s24  ;;  %2580 = vrot.lane.b32.xlu0 %v4872_v19, %s6185_s16 }
 0x503   : > { %v4933_v43 = vpop.permute.xlu1 %2217 }
 0x504   : > { %2080 = vrot.lane.b32.xlu1 %v4872_v19, %s6257_s17  ;;  %1824 = vrot.lane.b32.xlu0 %v4879_v6, %s6321_s3  ;;  %6329 = vst [vmem:[#allocation70_spill] sm:$0xff] %v4933_v43 }
 0x507   : > { %v4939_v29 = vpop.permute.xlu1 %2245 }
 0x508   : > { %2112 = vrot.lane.b32.xlu1 %v4872_v19, %s6177_s20  ;;  %1860 = vrot.lane.b32.xlu0 %v4879_v6, %s6324_s5 }
 0x50b   : > { %v4949_v36 = vpop.permute.xlu1 %2277 }
 0x50c   : > { %2144 = vrot.lane.b32.xlu1 %v4872_v19, %s6178_s21  ;;  %1892 = vrot.lane.b32.xlu0 %v4879_v6, %s6326_s19 }
 0x50f   : > { %v4955_v54 = vpop.permute.xlu1 %2281 }
 0x510   : > { %2176 = vrot.lane.b32.xlu1 %v4872_v19, %s6180_s18  ;;  %1956 = vrot.lane.b32.xlu0 %v4879_v6, %s6323_s4  ;;  %6330 = vst [vmem:[#allocation71_spill] sm:$0xff] %v4955_v54 }
 0x513   : > { %v4961_v58 = vpop.permute.xlu1 %2313 }
 0x514   : > { %2260 = vrot.lane.b32.xlu1 %v4872_v19, %s6181_s23  ;;  %2020 = vrot.lane.b32.xlu0 %v4879_v6, %s6256_s27  ;;  %6331 = vst [vmem:[#allocation72_spill] sm:$0xff] %v4961_v58 }
 0x517   : > { %v4971_v11 = vpop.permute.xlu1 %2341 }
 0x518   : > { %2292 = vrot.lane.b32.xlu1 %v4872_v19, %s6182_s28  ;;  %2084 = vrot.lane.b32.xlu0 %v4879_v6, %s6257_s17  ;;  %6334 = vst [vmem:[#allocation73_spill] sm:$0xff] %v4971_v11 }
 0x51b   : > { %v4977_v34 = vpop.permute.xlu1 %2377 }
 0x51c   : > { %2324 = vrot.lane.b32.xlu1 %v4872_v19, %s6259_s25  ;;  %2148 = vrot.lane.b32.xlu0 %v4879_v6, %s6178_s21  ;;  %6336 = vst [vmem:[#allocation74_spill] sm:$0xff] %v4977_v34 }
 0x51f   : > { %v4987_v22 = vpop.permute.xlu1 %2405 }
 0x520   : > { %2356 = vrot.lane.b32.xlu1 %v4872_v19, %s6183_s26  ;;  %2232 = vrot.lane.b32.xlu0 %v4879_v6, %s6258_s22  ;;  %6339 = vst [vmem:[#allocation75_spill] sm:$0xff] %v4987_v22  ;;  %v6352_v22 = vld [vmem:[#allocation31_spill] sm:$0xff] }
 0x523   : > { %v4993_v5 = vpop.permute.xlu1 %2441 }
 0x524   : > { %2388 = vrot.lane.b32.xlu1 %v4872_v19, %s6261_s15  ;;  %2296 = vrot.lane.b32.xlu0 %v4879_v6, %s6182_s28  ;;  %6340 = vst [vmem:[#allocation76_spill] sm:$0xff] %v4993_v5 }
 0x527   : > { %v5003_v61 = vpop.permute.xlu1 %2469 }
 0x528   : > { %2420 = vrot.lane.b32.xlu1 %v4872_v19, %s6332_s2  ;;  %2360 = vrot.lane.b32.xlu0 %v4879_v6, %s6183_s26  ;;  %6341 = vst [vmem:[#allocation77_spill] sm:$0xff] %v5003_v61 }
 0x52b   : > { %v5009_v56 = vpop.permute.xlu1 %2505 }
 0x52c   : > { %2452 = vrot.lane.b32.xlu1 %v4872_v19, %s6333_s6  ;;  %2424 = vrot.lane.b32.xlu0 %v4879_v6, %s6332_s2  ;;  %6342 = vst [vmem:[#allocation78_spill] sm:$0xff] %v5009_v56  ;;  %v1841_v56 = vpop.permute.xlu0 %1840 }
 0x52f   : > { %v5019_v49 = vpop.permute.xlu1 %2533 }
 0x530   : > { %2484 = vrot.lane.b32.xlu1 %v4872_v19, %s6335_s7  ;;  %2488 = vrot.lane.b32.xlu0 %v4879_v6, %s6335_s7  ;;  %6343 = vst [vmem:[#allocation79_spill] sm:$0xff] %v5019_v49 }
 0x533   : > { %v5025_v57 = vpop.permute.xlu1 %2569 }
 0x534   : > { %2516 = vrot.lane.b32.xlu1 %v4872_v19, %s6337_s8  ;;  %2552 = vrot.lane.b32.xlu0 %v4879_v6, %s6338_s9  ;;  %6344 = vst [vmem:[#allocation80_spill] sm:$0xff] %v5025_v57 }
 0x537   : > { %v5035_v33 = vpop.permute.xlu1 %2597 }
 0x538   : > { %2548 = vrot.lane.b32.xlu1 %v4872_v19, %s6338_s9  ;;  %1922 = vrot.lane.b32.xlu0 %v4882_v23, %s6320_s1  ;;  %6345 = vst [vmem:[#allocation81_spill] sm:$0xff] %v5035_v33 }
 0x53c   : > { %1924 = vrot.lane.b32.xlu1 %v4879_v6, %s6320_s1  ;;  %1986 = vrot.lane.b32.xlu0 %v4882_v23, %s6325_s0 }
 0x540   : > { %1988 = vrot.lane.b32.xlu1 %v4879_v6, %s6325_s0  ;;  %2050 = vrot.lane.b32.xlu0 %v4882_v23, %s6255_s24 }
 0x544   : > { %2052 = vrot.lane.b32.xlu1 %v4879_v6, %s6255_s24  ;;  %2114 = vrot.lane.b32.xlu0 %v4882_v23, %s6177_s20 }
 0x548   : > { %2116 = vrot.lane.b32.xlu1 %v4879_v6, %s6177_s20  ;;  %2178 = vrot.lane.b32.xlu0 %v4882_v23, %s6180_s18 }
 0x54c   : > { %2180 = vrot.lane.b32.xlu1 %v4879_v6, %s6180_s18  ;;  %2262 = vrot.lane.b32.xlu0 %v4882_v23, %s6181_s23 }
 0x550   : > { %2264 = vrot.lane.b32.xlu1 %v4879_v6, %s6181_s23  ;;  %2326 = vrot.lane.b32.xlu0 %v4882_v23, %s6259_s25 }
 0x554   : > { %2328 = vrot.lane.b32.xlu1 %v4879_v6, %s6259_s25  ;;  %2390 = vrot.lane.b32.xlu0 %v4882_v23, %s6261_s15 }
 0x558   : > { %2392 = vrot.lane.b32.xlu1 %v4879_v6, %s6261_s15  ;;  %2454 = vrot.lane.b32.xlu0 %v4882_v23, %s6333_s6 }
 0x55c   : > { %2456 = vrot.lane.b32.xlu1 %v4879_v6, %s6333_s6  ;;  %2518 = vrot.lane.b32.xlu0 %v4882_v23, %s6337_s8 }
 0x560   : > { %2520 = vrot.lane.b32.xlu1 %v4879_v6, %s6337_s8  ;;  %1926 = vrot.lane.b32.xlu0 %v4885_v18, %s6320_s1 }
 0x562   : > { %v5041_v57 = vpop.permute.xlu1 %1920  ;;  %v1821_v5 = vpop.permute.xlu0 %1820 }
 0x564   : > { %1822 = vrot.lane.b32.xlu1 %v4882_v23, %s6321_s3  ;;  %1990 = vrot.lane.b32.xlu0 %v4885_v18, %s6325_s0 }
 0x566   : > { %v5047_v34 = vpop.permute.xlu1 %1952  ;;  %v1857_v58 = vpop.permute.xlu0 %1856 }
 0x568   : > { %1858 = vrot.lane.b32.xlu1 %v4882_v23, %s6324_s5  ;;  %2054 = vrot.lane.b32.xlu0 %v4885_v18, %s6255_s24 }
 0x56a   : > { %v5053_v33 = vpop.permute.xlu1 %1984  ;;  %v1889_v54 = vpop.permute.xlu0 %1888 }
 0x56c   : > { %1890 = vrot.lane.b32.xlu1 %v4882_v23, %s6326_s19  ;;  %2118 = vrot.lane.b32.xlu0 %v4885_v18, %s6177_s20 }
 0x56e   : > { %v5059_v43 = vpop.permute.xlu1 %2016  ;;  %v5061_v63 = vpop.permute.xlu0 %2228 }
 0x570   : > { %1954 = vrot.lane.b32.xlu1 %v4882_v23, %s6323_s4  ;;  %2182 = vrot.lane.b32.xlu0 %v4885_v18, %s6180_s18 }
 0x572   : > { %v5067_v26 = vpop.permute.xlu1 %2048  ;;  %v5069_v7 = vpop.permute.xlu0 %2580 }
 0x573   : > { %6346 = vst [vmem:[#allocation82_spill] sm:$0xff] %v5069_v7 }
 0x574   : > { %2018 = vrot.lane.b32.xlu1 %v4882_v23, %s6256_s27  ;;  %2584 = vrot.lane.b32.xlu0 %v4879_v6, %s6185_s16 }
 0x576   : > { %v5075_v32 = vpop.permute.xlu1 %2080  ;;  %v1825_v55 = vpop.permute.xlu0 %1824 }
 0x577   : > { %v1828_v48 = vsel %vm892_vm2, %v1821_v5, %v1825_v55  ;;  %v1830_v59 = vsel %vm892_vm2, %v1825_v55, %v1821_v5 }
 0x578   : > { %v1832_v39 = vmul.f32 %v1830_v59, %v6347_v10  ;;  %v1833_v35 = vmul.f32 %v1828_v48, %v6348_v45  ;;  %2082 = vrot.lane.b32.xlu1 %v4882_v23, %s6257_s17  ;;  %2266 = vrot.lane.b32.xlu0 %v4885_v18, %s6181_s23  ;;  %v6349_v59 = vld [vmem:[#allocation28_spill] sm:$0xff]  ;;  %v6350_v48 = vld [vmem:[#allocation29_spill] sm:$0xff] }
 0x57a   : > { %v1848_v7 = vmul.f32 %v1841_v56, %v1832_v39  ;;  %v1849_v49 = vmul.f32 %v1841_v56, %v1833_v35  ;;  %v5087_v44 = vpop.permute.xlu1 %2112  ;;  %v1861_v61 = vpop.permute.xlu0 %1860 }
 0x57b   : > { %v1864_v27 = vsel %vm923_vm3, %v1857_v58, %v1861_v61  ;;  %v1866_v55 = vsel %vm923_vm3, %v1861_v61, %v1857_v58 }
 0x57c   : > { %v1868_v5 = vmul.f32 %v1866_v55, %v6349_v59  ;;  %v1869_v45 = vmul.f32 %v1864_v27, %v6350_v48  ;;  %2146 = vrot.lane.b32.xlu1 %v4882_v23, %s6178_s21  ;;  %2330 = vrot.lane.b32.xlu0 %v4885_v18, %s6259_s25  ;;  %v6351_v48 = vld [vmem:[#allocation30_spill] sm:$0xff] }
 0x57e   : > { %v1880_v39 = vmul.f32 %v4664_v60, %v1868_v5  ;;  %v1881_v35 = vmul.f32 %v4664_v60, %v1869_v45  ;;  %v5101_v56 = vpop.permute.xlu1 %2144  ;;  %v1893_v10 = vpop.permute.xlu0 %1892 }
 0x57f   : > { %v1896_v58 = vsel %vm953_vm4, %v1889_v54, %v1893_v10  ;;  %v1898_v61 = vsel %vm953_vm4, %v1893_v10, %v1889_v54 }
 0x580   : > { %v1884_v27 = vadd.f32 %v1880_v39, %v1848_v7  ;;  %v1885_v55 = vadd.f32 %v1881_v35, %v1849_v49  ;;  %v1900_v59 = vmul.f32 %v1898_v61, %v6351_v48  ;;  %v1901_v50 = vmul.f32 %v1896_v58, %v6352_v22  ;;  %2230 = vrot.lane.b32.xlu1 %v4882_v23, %s6258_s22  ;;  %v2637_v58 = vld [vmem:[%s5890_s12 + $0x8] sm:$0xff] }
 0x581   : > { %2394 = vrot.lane.b32.xlu0 %v4885_v18, %s6261_s15  ;;  %v2641_v22 = vld [vmem:[%s5890_s12 + $0x28] sm:$0xff] }
 0x582   : > { %v1912_v60 = vmul.f32 %v4859_v0, %v1900_v59  ;;  %v1913_v45 = vmul.f32 %v4859_v0, %v1901_v50  ;;  %v5115_v5 = vpop.permute.xlu1 %2176  ;;  %v1957_v42 = vpop.permute.xlu0 %1956  ;;  %v2612_v59 = vld [vmem:[%s5888_s10] sm:$0xff] }
 0x584   : > { %v5117_v10 = vadd.f32 %v1912_v60, %v1884_v27  ;;  %v5119_v7 = vadd.f32 %v1913_v45, %v1885_v55  ;;  %2294 = vrot.lane.b32.xlu1 %v4882_v23, %s6182_s28  ;;  %v2639_v55 = vld [vmem:[%s5890_s12 + $0x18] sm:$0xff] }
 0x585   : > { %2458 = vrot.lane.b32.xlu0 %v4885_v18, %s6333_s6 }
 0x586   : > { %v5125_v54 = vpop.permute.xlu1 %2260  ;;  %v2021_v49 = vpop.permute.xlu0 %2020 }
 0x588   : > { %2358 = vrot.lane.b32.xlu1 %v4882_v23, %s6183_s26 }
 0x589   : > { %2522 = vrot.lane.b32.xlu0 %v4885_v18, %s6337_s8 }
 0x58a   : > { %v5131_v50 = vpop.permute.xlu1 %2292  ;;  %v2085_v0 = vpop.permute.xlu0 %2084 }
 0x58c   : > { %2422 = vrot.lane.b32.xlu1 %v4882_v23, %s6332_s2 }
 0x58d   : > { %2616 = vperm.xlu0 %3285, %v2612_v59  }
 0x58e   : > { %v5138_v39 = vpop.permute.xlu1 %2324  ;;  %v5140_v35 = vpop.permute.xlu0 %2148 }
 0x590   : > { %2486 = vrot.lane.b32.xlu1 %v4882_v23, %s6335_s7 }
 0x591   : > { %2651 = vperm.xlu0 %3285, %v2637_v58  }
 0x592   : > { %v5147_v61 = vpop.permute.xlu1 %2356  ;;  %v2233_v27 = vpop.permute.xlu0 %2232 }
 0x593   : > { %v5155_v60 = vsel %vm1276_vm14, %v5061_v63, %v2233_v27  ;;  %v5160_v45 = vsel %vm1276_vm14, %v2233_v27, %v5061_v63  ;;  %v2643_v63 = vld [vmem:[%s5890_s12 + $0x38] sm:$0xff] }
 0x594   : > { %2550 = vrot.lane.b32.xlu1 %v4882_v23, %s6338_s9 }
 0x595   : > { %2661 = vperm.xlu0 %3285, %v2639_v55  }
 0x596   : > { %v5164_v59 = vpop.permute.xlu1 %2388  ;;  %v5166_v58 = vpop.permute.xlu0 %2296 }
 0x597   : > { %6353 = vst [vmem:[#allocation83_spill] sm:$0xff] %v5164_v59 }
 0x598   : > { %2582 = vrot.lane.b32.xlu1 %v4882_v23, %s6185_s16 }
 0x599   : > { %2671 = vperm.xlu0 %3285, %v2641_v22  }
 0x59a   : > { %v2421_v48 = vpop.permute.xlu1 %2420  ;;  %v5173_v16 = vpop.permute.xlu0 %2360 }
 0x59c   : > { %1826 = vrot.lane.b32.xlu1 %v4885_v18, %s6321_s3 }
 0x59d   : > { %2681 = vperm.xlu0 %3285, %v2643_v63  }
 0x59e   : > { %v5180_v27 = vpop.permute.xlu1 %2452  ;;  %v2425_v55 = vpop.permute.xlu0 %2424 }
 0x59f   : > { %6354 = vst [vmem:[#allocation84_spill] sm:$0xff] %v5180_v27  ;;  %v5184_v59 = vsel %vm1456_vm0, %v2421_v48, %v2425_v55  ;;  %v5188_v22 = vsel %vm1456_vm0, %v2425_v55, %v2421_v48 }
 0x5a0   : > { %6355 = vst [vmem:[#allocation85_spill] sm:$0xff] %v5184_v59  ;;  %6356 = vst [vmem:[#allocation86_spill] sm:$0xff] %v5188_v22  ;;  %1862 = vrot.lane.b32.xlu1 %v4885_v18, %s6324_s5 }
 0x5a2   : > { %v2485_v23 = vpop.permute.xlu1 %2484  ;;  %v2489_v11 = vpop.permute.xlu0 %2488 }
 0x5a3   : > { %v5194_v1 = vsel %vm1516_vm7, %v2485_v23, %v2489_v11  ;;  %v5198_v63 = vsel %vm1516_vm7, %v2489_v11, %v2485_v23  ;;  %v1960_v23 = vsel %vm1013_vm6, %v5047_v34, %v1957_v42  ;;  %v1962_v11 = vsel %vm1013_vm6, %v1957_v42, %v5047_v34 }
 0x5a4   : > { %6357 = vst [vmem:[#allocation87_spill] sm:$0xff] %v5194_v1  ;;  %6358 = vst [vmem:[#allocation88_spill] sm:$0xff] %v5198_v63  ;;  %1894 = vrot.lane.b32.xlu1 %v4885_v18, %s6326_s19  ;;  %v6363_v63 = vld [vmem:[#allocation35_spill] sm:$0xff] }
 0x5a5   : > { %v1965_v59 = vmul.f32 %v1960_v23, %v6363_v63  ;;  %v2088_v23 = vsel %vm1133_vm10, %v5075_v32, %v2085_v0 }
 0x5a6   : > { %v5202_v27 = vpop.permute.xlu1 %2516  ;;  %v2553_v48 = vpop.permute.xlu0 %2552 }
 0x5a7   : > { %6359 = vst [vmem:[#allocation89_spill] sm:$0xff] %v5202_v27  ;;  %v2024_v27 = vsel %vm1073_vm8, %v5059_v43, %v2021_v49  ;;  %v1977_v63 = vmul.f32 %v4766_v52, %v1965_v59 }
 0x5a8   : > { %1958 = vrot.lane.b32.xlu1 %v4885_v18, %s6323_s4 }
 0x5aa   : > { %v2549_v55 = vpop.permute.xlu1 %2548 }
 0x5ab   : > { %v5208_v22 = vsel %vm6134_vm12, %v2549_v55, %v2553_v48  ;;  %v5212_v1 = vsel %vm6134_vm12, %v2553_v48, %v2549_v55  ;;  %v2026_v48 = vsel %vm1073_vm8, %v2021_v49, %v5059_v43  ;;  %vm6365_vm12 = vmmov %vm6364_vm5  ;;  %v2029_v49 = vmul.f32 %v2024_v27, %v4095_v17 }
 0x5ac   : > { %6360 = vst [vmem:[#allocation90_spill] sm:$0xff] %v5208_v22  ;;  %6361 = vst [vmem:[#allocation91_spill] sm:$0xff] %v5212_v1  ;;  %2022 = vrot.lane.b32.xlu1 %v4885_v18, %s6256_s27  ;;  %v6362_v1 = vld [vmem:[#allocation34_spill] sm:$0xff]  ;;  %v2028_v43 = vmul.f32 %v2026_v48, %v4079_v25  ;;  %v2093_v25 = vmul.f32 %v2088_v23, %v4140_v38 }
 0x5ad   : > { %v1964_v22 = vmul.f32 %v1962_v11, %v6362_v1  ;;  %v2090_v11 = vsel %vm1133_vm10, %v2085_v0, %v5075_v32  ;;  %v2041_v59 = vmul.f32 %v4786_v2, %v2029_v49 }
 0x5ae   : > { %v1925_v55 = vpop.permute.xlu1 %1924 }
 0x5af   : > { %v1928_v42 = vsel %vm6364_vm5, %v5041_v57, %v1925_v55  ;;  %v1930_v34 = vsel %vm6365_vm12, %v1925_v55, %v5041_v57  ;;  %vm6368_vm12 = vcmp.lt.s32.totalorder %v3974_v14, 18 }
 0x5b0   : > { %v1932_v28 = vmul.f32 %v1930_v34, %v6366_v24  ;;  %v1933_v4 = vmul.f32 %v1928_v42, %v6367_v30  ;;  %2086 = vrot.lane.b32.xlu1 %v4885_v18, %s6257_s17  ;;  %v1976_v34 = vmul.f32 %v4766_v52, %v1964_v22  ;;  %vm6369_vm5 = vmmov %vm6368_vm12  ;;  %v2040_v52 = vmul.f32 %v4786_v2, %v2028_v43 }
 0x5b1   : > { %v2092_v22 = vmul.f32 %v2090_v11, %v4125_v62 }
 0x5b2   : > { %v1944_v57 = vmul.f32 %v4861_v9, %v1932_v28  ;;  %v1945_v55 = vmul.f32 %v4861_v9, %v1933_v4  ;;  %v1989_v42 = vpop.permute.xlu1 %1988  ;;  %v6370_v28 = vld [vmem:[#allocation36_spill] sm:$0xff]  ;;  %v6371_v4 = vld [vmem:[#allocation37_spill] sm:$0xff] }
 0x5b3   : > { %v1992_v27 = vsel %vm6368_vm12, %v5053_v33, %v1989_v42  ;;  %v1994_v48 = vsel %vm6369_vm5, %v1989_v42, %v5053_v33  ;;  %vm6372_vm12 = vcmp.lt.s32.totalorder %v3974_v14, 2  ;;  %v2104_v11 = vmul.f32 %v4797_v15, %v2092_v22 }
 0x5b4   : > { %v1948_v17 = vadd.f32 %v1944_v57, %v5117_v10  ;;  %v1949_v32 = vadd.f32 %v1945_v55, %v5119_v7  ;;  %v1996_v0 = vmul.f32 %v1994_v48, %v6370_v28  ;;  %v1997_v9 = vmul.f32 %v1992_v27, %v6371_v4  ;;  %2150 = vrot.lane.b32.xlu1 %v4885_v18, %s6178_s21  ;;  %vm6373_vm5 = vmmov %vm6372_vm12 }
 0x5b5   : > { %v2152_v55 = vsel %vm6372_vm12, %v5101_v56, %v5140_v35  ;;  %v2154_v2 = vsel %vm6373_vm5, %v5140_v35, %v5101_v56  ;;  %v2105_v56 = vmul.f32 %v4797_v15, %v2093_v25  ;;  %vm6376_vm12 = vcmp.lt.s32.totalorder %v3974_v14, 14 }
 0x5b6   : > { %v1980_v33 = vadd.f32 %v1976_v34, %v1948_v17  ;;  %v1981_v42 = vadd.f32 %v1977_v63, %v1949_v32  ;;  %v2008_v10 = vmul.f32 %v4867_v51, %v1996_v0  ;;  %v2009_v7 = vmul.f32 %v4867_v51, %v1997_v9  ;;  %v2053_v57 = vpop.permute.xlu1 %2052  ;;  %v6374_v32 = vld [vmem:[#allocation42_spill] sm:$0xff]  ;;  %v6375_v9 = vld [vmem:[#allocation43_spill] sm:$0xff]  ;;  %vm6377_vm5 = vmmov %vm6376_vm12 }
 0x5b7   : > { %v2056_v17 = vsel %vm1103_vm9, %v5067_v26, %v2053_v57  ;;  %v2058_v63 = vsel %vm1103_vm9, %v2053_v57, %v5067_v26  ;;  %v2156_v0 = vmul.f32 %v2154_v2, %v6374_v32  ;;  %v2208_v57 = vmul.f32 %v4872_v19, %v6290_v41 }
 0x5b8   : > { %v2012_v51 = vadd.f32 %v2008_v10, %v1980_v33  ;;  %v2013_v43 = vadd.f32 %v2009_v7, %v1981_v42  ;;  %v2060_v49 = vmul.f32 %v2058_v63, %v4104_v8  ;;  %v2061_v23 = vmul.f32 %v2056_v17, %v4107_v46  ;;  %2234 = vrot.lane.b32.xlu1 %v4885_v18, %s6258_s22  ;;  %v6379_v10 = vld [vmem:[#allocation41_spill] sm:$0xff] }
 0x5b9   : > { %v2157_v33 = vmul.f32 %v2152_v55, %v6375_v9 }
 0x5ba   : > { %v2044_v35 = vadd.f32 %v2040_v52, %v2012_v51  ;;  %v2045_v34 = vadd.f32 %v2041_v59, %v2013_v43  ;;  %v2072_v27 = vmul.f32 %v4887_v37, %v2060_v49  ;;  %v2073_v48 = vmul.f32 %v4887_v37, %v2061_v23  ;;  %v2117_v26 = vpop.permute.xlu1 %2116  ;;  %v6378_v52 = vld [vmem:[#allocation40_spill] sm:$0xff] }
 0x5bb   : > { %v2120_v42 = vsel %vm6376_vm12, %v5087_v44, %v2117_v26  ;;  %v2122_v22 = vsel %vm6377_vm5, %v2117_v26, %v5087_v44  ;;  %v2209_v37 = vmul.f32 %v4879_v6, %v6289_v12  ;;  %v2168_v51 = vmul.f32 %v4801_v3, %v2156_v0 }
 0x5bc   : > { %v2076_v25 = vadd.f32 %v2072_v27, %v2044_v35  ;;  %v2077_v15 = vadd.f32 %v2073_v48, %v2045_v34  ;;  %v2124_v59 = vmul.f32 %v2122_v22, %v6378_v52  ;;  %v2125_v7 = vmul.f32 %v2120_v42, %v6379_v10  ;;  %2298 = vrot.lane.b32.xlu1 %v4885_v18, %s6182_s28  ;;  %v5334_v34 = vpop.permute.xlu0 %1922 }
 0x5bd   : > { %v2169_v43 = vmul.f32 %v4801_v3, %v2157_v33  ;;  %v2240_v3 = vmul.f32 %v5155_v60, %v4295_v53  ;;  %vm6380_vm12 = vcmp.lt.s32.totalorder %v3974_v14, 114  ;;  %v2220_v33 = vmul.f32 %v4805_v40, %v2208_v57 }
 0x5be   : > { %v2108_v55 = vadd.f32 %v2104_v11, %v2076_v25  ;;  %v2109_v2 = vadd.f32 %v2105_v56, %v2077_v15  ;;  %v2136_v17 = vmul.f32 %v4907_v13, %v2124_v59  ;;  %v2137_v44 = vmul.f32 %v4907_v13, %v2125_v7  ;;  %v2181_v63 = vpop.permute.xlu1 %2180  ;;  %vm6381_vm5 = vmmov %vm6380_vm12  ;;  %v6384_v25 = vld [vmem:[#allocation44_spill] sm:$0xff]  ;;  %v6385_v59 = vld [vmem:[#allocation45_spill] sm:$0xff] }
 0x5bf   : > { %v2184_v49 = vsel %vm1223_vm13, %v5115_v5, %v2181_v63  ;;  %v2186_v6 = vsel %vm1223_vm13, %v2181_v63, %v5115_v5  ;;  %v2241_v13 = vmul.f32 %v5160_v45, %v4298_v20  ;;  %v2300_v5 = vsel %vm6380_vm12, %v5131_v50, %v5166_v58 }
 0x5c0   : > { %v2140_v19 = vadd.f32 %v2136_v17, %v2108_v55  ;;  %v2141_v23 = vadd.f32 %v2137_v44, %v2109_v2  ;;  %v2188_v11 = vmul.f32 %v2186_v6, %v4251_v21  ;;  %v2189_v56 = vmul.f32 %v2184_v49, %v4254_v47  ;;  %2362 = vrot.lane.b32.xlu1 %v4885_v18, %s6183_s26  ;;  %v6387_v55 = vld [vmem:[#allocation47_spill] sm:$0xff] }
 0x5c1   : > { %v2302_v35 = vsel %vm6381_vm5, %v5166_v58, %v5131_v50  ;;  %v2221_v45 = vmul.f32 %v4805_v40, %v2209_v37  ;;  %vm6382_vm12 = vcmp.lt.s32.totalorder %v3974_v14, 126  ;;  %v2253_v40 = vmul.f32 %v4939_v29, %v2241_v13  ;;  %v6386_v37 = vld [vmem:[#allocation46_spill] sm:$0xff] }
 0x5c2   : > { %v2172_v27 = vadd.f32 %v2168_v51, %v2140_v19  ;;  %v2173_v48 = vadd.f32 %v2169_v43, %v2141_v23  ;;  %v2200_v26 = vmul.f32 %v4923_v31, %v2188_v11  ;;  %v2201_v60 = vmul.f32 %v4923_v31, %v2189_v56  ;;  %v2265_v0 = vpop.permute.xlu1 %2264  ;;  %vm6383_vm5 = vmmov %vm6382_vm12  ;;  %v5362_v43 = vpop.permute.xlu0 %1986  ;;  %v6389_v56 = vld [vmem:[#allocation49_spill] sm:$0xff]  ;;  %v6390_v13 = vld [vmem:[#allocation50_spill] sm:$0xff] }
 0x5c3   : > { %v2268_v42 = vsel %vm6382_vm12, %v5125_v54, %v2265_v0  ;;  %v2270_v50 = vsel %vm6383_vm5, %v2265_v0, %v5125_v54  ;;  %v2252_v31 = vmul.f32 %v4939_v29, %v2240_v3  ;;  %v2304_v57 = vmul.f32 %v2300_v5, %v6386_v37 }
 0x5c4   : > { %v2204_v58 = vadd.f32 %v2200_v26, %v2172_v27  ;;  %v2205_v22 = vadd.f32 %v2201_v60, %v2173_v48  ;;  %v2272_v15 = vmul.f32 %v2268_v42, %v6384_v25  ;;  %v2273_v7 = vmul.f32 %v2270_v50, %v6385_v59  ;;  %2426 = vrot.lane.b32.xlu1 %v4885_v18, %s6332_s2  ;;  %v6392_v27 = vld [vmem:[#allocation58_spill] sm:$0xff]  ;;  %v6394_v50 = vld [vmem:[#allocation83_spill] sm:$0xff] }
 0x5c5   : > { %v2305_v2 = vmul.f32 %v2302_v35, %v6387_v55  ;;  %v2364_v54 = vsel %vm1396_vm15, %v5147_v61, %v5173_v16  ;;  %v2366_v17 = vsel %vm1396_vm15, %v5173_v16, %v5147_v61  ;;  %v6388_v16 = vld [vmem:[#allocation48_spill] sm:$0xff]  ;;  %v2316_v48 = vmul.f32 %v6392_v27, %v2304_v57  ;;  %v6396_v57 = vld [vmem:[#allocation53_spill] sm:$0xff] }
 0x5c6   : > { %v2224_v44 = vadd.f32 %v2220_v33, %v2204_v58  ;;  %v2225_v63 = vadd.f32 %v2221_v45, %v2205_v22  ;;  %v2329_v51 = vpop.permute.xlu1 %2328  ;;  %v2284_v29 = vmul.f32 %v4949_v36, %v2272_v15  ;;  %v2285_v49 = vmul.f32 %v4949_v36, %v2273_v7  ;;  %v6391_v36 = vld [vmem:[#allocation51_spill] sm:$0xff]  ;;  %v6393_v45 = vld [vmem:[#allocation73_spill] sm:$0xff] }
 0x5c7   : > { %v2332_v6 = vsel %vm1366_vm1, %v5138_v39, %v2329_v51  ;;  %v2334_v19 = vsel %vm1366_vm1, %v2329_v51, %v5138_v39  ;;  %v2368_v5 = vmul.f32 %v2364_v54, %v6390_v13  ;;  %v2369_v35 = vmul.f32 %v2366_v17, %v6391_v36  ;;  %v6397_v54 = vld [vmem:[#allocation60_spill] sm:$0xff]  ;;  %v6398_v51 = vld [vmem:[#allocation54_spill] sm:$0xff] }
 0x5c8   : > { %v2256_v23 = vadd.f32 %v2252_v31, %v2224_v44  ;;  %v2257_v11 = vadd.f32 %v2253_v40, %v2225_v63  ;;  %v2336_v61 = vmul.f32 %v2332_v6, %v6388_v16  ;;  %v2337_v3 = vmul.f32 %v2334_v19, %v6389_v56  ;;  %2490 = vrot.lane.b32.xlu1 %v4885_v18, %s6335_s7  ;;  %v6395_v31 = vld [vmem:[#allocation52_spill] sm:$0xff]  ;;  %v5394_v63 = vpop.permute.xlu0 %2050  ;;  %v6401_v19 = vld [vmem:[#allocation86_spill] sm:$0xff] }
 0x5c9   : > { %v2317_v26 = vmul.f32 %v6392_v27, %v2305_v2  ;;  %v2380_v17 = vmul.f32 %v6397_v54, %v2368_v5  ;;  %v2381_v44 = vmul.f32 %v6397_v54, %v2369_v35  ;;  %v6400_v6 = vld [vmem:[#allocation12_spill] sm:$0xff]  ;;  %v6402_v27 = vld [vmem:[#allocation75_spill] sm:$0xff]  ;;  %vm6404_vm12 = vcmp.lt.s32.totalorder %v3974_v14, 98 }
 0x5ca   : > { %v2288_v60 = vadd.f32 %v2284_v29, %v2256_v23  ;;  %v2289_v0 = vadd.f32 %v2285_v49, %v2257_v11  ;;  %v2393_v39 = vpop.permute.xlu1 %2392  ;;  %v2348_v33 = vmul.f32 %v6393_v45, %v2336_v61  ;;  %v2349_v42 = vmul.f32 %v6393_v45, %v2337_v3  ;;  %v6399_v29 = vld [vmem:[#allocation85_spill] sm:$0xff]  ;;  %vm6405_vm5 = vmmov %vm6404_vm12  ;;  %v6406_v45 = vld [vmem:[#allocation11_spill] sm:$0xff] }
 0x5cb   : > { %v2396_v58 = vsel %vm1426_vm11, %v6394_v50, %v2393_v39  ;;  %v2398_v22 = vsel %vm1426_vm11, %v2393_v39, %v6394_v50  ;;  %v2432_v49 = vmul.f32 %v6399_v29, %v6398_v51  ;;  %v2433_v23 = vmul.f32 %v6401_v19, %v6400_v6  ;;  %v2613_v54 = vld [vmem:[%s5888_s10 + $0x8] sm:$0xff]  ;;  %v6412_v29 = vld [vmem:[#allocation62_spill] sm:$0xff] }
 0x5cc   : > { %v2320_v15 = vadd.f32 %v2316_v48, %v2288_v60  ;;  %v2321_v7 = vadd.f32 %v2317_v26, %v2289_v0  ;;  %v2400_v40 = vmul.f32 %v2396_v58, %v6395_v31  ;;  %v2401_v2 = vmul.f32 %v2398_v22, %v6396_v57  ;;  %2554 = vrot.lane.b32.xlu1 %v4885_v18, %s6338_s9  ;;  %v6403_v60 = vld [vmem:[#allocation84_spill] sm:$0xff]  ;;  %v6409_v22 = vld [vmem:[#allocation87_spill] sm:$0xff]  ;;  %v6438_v51 = vld [vmem:[#allocation26_spill] sm:$0xff]  ;;  %s6528_s9 = sshll.u32 %s6530_s30, 7 }
 0x5cd   : > { %v6407_v58 = vld [vmem:[#allocation16_spill] sm:$0xff]  ;;  %v6441_v31 = vld [vmem:[#allocation29_spill] sm:$0xff] }
 0x5ce   : > { %v2352_v11 = vadd.f32 %v2348_v33, %v2320_v15  ;;  %v2353_v61 = vadd.f32 %v2349_v42, %v2321_v7  ;;  %v2457_v3 = vpop.permute.xlu1 %2456  ;;  %v2412_v48 = vmul.f32 %v6402_v27, %v2400_v40  ;;  %v2413_v26 = vmul.f32 %v6402_v27, %v2401_v2  ;;  %v6408_v42 = vld [vmem:[#allocation13_spill] sm:$0xff]  ;;  %v6410_v7 = vld [vmem:[#allocation19_spill] sm:$0xff]  ;;  %v6411_v40 = vld [vmem:[#allocation88_spill] sm:$0xff] }
 0x5cf   : > { %v2460_v5 = vsel %vm6404_vm12, %v6403_v60, %v2457_v3  ;;  %v2462_v35 = vsel %vm6405_vm5, %v2457_v3, %v6403_v60  ;;  %v2496_v15 = vmul.f32 %v6409_v22, %v6408_v42  ;;  %v2497_v2 = vmul.f32 %v6411_v40, %v6410_v7  ;;  %v5421_v3 = vpop.permute.xlu0 %2114  ;;  %v6413_v27 = vld [vmem:[#allocation77_spill] sm:$0xff]  ;;  %v6421_v42 = vld [vmem:[#allocation90_spill] sm:$0xff] }
 0x5d0   : > { %v2384_v0 = vadd.f32 %v2380_v17, %v2352_v11  ;;  %v2385_v39 = vadd.f32 %v2381_v44, %v2353_v61  ;;  %v2464_v50 = vmul.f32 %v2460_v5, %v6406_v45  ;;  %v2465_v33 = vmul.f32 %v2462_v35, %v6407_v58  ;;  %2586 = vrot.lane.b32.xlu1 %v4885_v18, %s6185_s16  ;;  %v6414_v35 = vld [vmem:[#allocation89_spill] sm:$0xff]  ;;  %v6422_v45 = vld [vmem:[#allocation22_spill] sm:$0xff]  ;;  %s5837_s16 = scalar_lea.vmem %s5892_s14, %s6528_s9 }
 0x5d1   : > { %v2444_v17 = vmul.f32 %v6412_v29, %v2432_v49  ;;  %v2445_v44 = vmul.f32 %v6412_v29, %v2433_v23  ;;  %vm6415_vm12 = vcmp.lt.s32.totalorder %v3974_v14, 96  ;;  %v6417_v23 = vld [vmem:[#allocation17_spill] sm:$0xff] }
 0x5d2   : > { %v2416_v19 = vadd.f32 %v2412_v48, %v2384_v0  ;;  %v2417_v11 = vadd.f32 %v2413_v26, %v2385_v39  ;;  %v2521_v61 = vpop.permute.xlu1 %2520  ;;  %v2476_v60 = vmul.f32 %v6413_v27, %v2464_v50  ;;  %v2477_v5 = vmul.f32 %v6413_v27, %v2465_v33  ;;  %vm6416_vm5 = vmmov %vm6415_vm12  ;;  %v6418_v26 = vld [vmem:[#allocation21_spill] sm:$0xff]  ;;  %v6419_v39 = vld [vmem:[#allocation64_spill] sm:$0xff] }
 0x5d3   : > { %v2524_v22 = vsel %vm6415_vm12, %v6414_v35, %v2521_v61  ;;  %v2526_v40 = vsel %vm6416_vm5, %v2521_v61, %v6414_v35  ;;  %v2508_v29 = vmul.f32 %v6419_v39, %v2496_v15  ;;  %v2509_v50 = vmul.f32 %v6419_v39, %v2497_v2  ;;  %v2636_v33 = vld [vmem:[%s5890_s12] sm:$0xff]  ;;  %v6420_v27 = vld [vmem:[#allocation20_spill] sm:$0xff]  ;;  %v6423_v61 = vld [vmem:[#allocation91_spill] sm:$0xff]  ;;  %v5444_v2 = vpop.permute.xlu0 %2178 }
 0x5d4   : > { %v2448_v49 = vadd.f32 %v2444_v17, %v2416_v19  ;;  %v2449_v7 = vadd.f32 %v2445_v44, %v2417_v11  ;;  %v2528_v48 = vmul.f32 %v2524_v22, %v6417_v23  ;;  %v2529_v0 = vmul.f32 %v2526_v40, %v6418_v26  ;;  %2621 = vperm.xlu1 %3286, %v2613_v54   ;;  %v6424_v54 = vld [vmem:[#allocation79_spill] sm:$0xff]  ;;  %v2638_v39 = vld [vmem:[%s5890_s12 + $0x10] sm:$0xff] }
 0x5d5   : > { %v2560_v58 = vmul.f32 %v6421_v42, %v6420_v27  ;;  %v2561_v17 = vmul.f32 %v6423_v61, %v6422_v45  ;;  %v6425_v42 = vld [vmem:[#allocation66_spill] sm:$0xff]  ;;  %vm6436_vm12 = vcmp.lt.s32.totalorder %v3974_v14, 31 }
 0x5d6   : > { %v2480_v44 = vadd.f32 %v2476_v60, %v2448_v49  ;;  %v2481_v19 = vadd.f32 %v2477_v5, %v2449_v7  ;;  %v1823_v11 = vpop.permute.xlu1 %1822  ;;  %v2540_v40 = vmul.f32 %v6424_v54, %v2528_v48  ;;  %v2541_v15 = vmul.f32 %v6424_v54, %v2529_v0  ;;  %v2640_v0 = vld [vmem:[%s5890_s12 + $0x20] sm:$0xff]  ;;  %vm6437_vm5 = vmmov %vm6436_vm12 }
 0x5d7   : > { %v2572_v27 = vmul.f32 %v6425_v42, %v2560_v58  ;;  %v2573_v61 = vmul.f32 %v6425_v42, %v2561_v17  ;;  %v2642_v58 = vld [vmem:[%s5890_s12 + $0x30] sm:$0xff] }
 0x5d8   : > { %v2512_v35 = vadd.f32 %v2508_v29, %v2480_v44  ;;  %v2513_v22 = vadd.f32 %v2509_v50, %v2481_v19  ;;  %2646 = vperm.xlu1 %3286, %v2636_v33   ;;  %v5458_v50 = vpop.permute.xlu0 %2262 }
 0x5da   : > { %v2544_v60 = vadd.f32 %v2540_v40, %v2512_v35  ;;  %v2545_v7 = vadd.f32 %v2541_v15, %v2513_v22  ;;  %v1859_v5 = vpop.permute.xlu1 %1858 }
 0x5dc   : > { %2656 = vperm.xlu1 %3286, %v2638_v39   ;;  %v5451_v49 = vadd.f32 %v2573_v61, %v2545_v7  ;;  %v5453_v48 = vadd.f32 %v2572_v27, %v2544_v60  ;;  %v5463_v17 = vpop.permute.xlu0 %2326 }
 0x5de   : > { %6426 = vst [vmem:[#allocation34_spill] sm:$0xff] %v5451_v49  ;;  %6427 = vst [vmem:[#allocation32_spill] sm:$0xff] %v5453_v48  ;;  %v1891_v29 = vpop.permute.xlu1 %1890 }
 0x5e0   : > { %2666 = vperm.xlu1 %3286, %v2640_v0   ;;  %v5469_v19 = vpop.permute.xlu0 %2390 }
 0x5e1   : > { %6428 = vst [vmem:[#allocation33_spill] sm:$0xff] %v5469_v19 }
 0x5e2   : > { %v1955_v33 = vpop.permute.xlu1 %1954 }
 0x5e4   : > { %2676 = vperm.xlu1 %3286, %v2642_v58   ;;  %v5473_v22 = vpop.permute.xlu0 %2454 }
 0x5e5   : > { %6429 = vst [vmem:[#allocation36_spill] sm:$0xff] %v5473_v22  ;;  %v6439_v22 = vld [vmem:[#allocation27_spill] sm:$0xff] }
 0x5e6   : > { %v5465_v44 = vpop.permute.xlu1 %2018 }
 0x5e8   : > { %v5479_v15 = vpop.permute.xlu0 %2518 }
 0x5e9   : > { %6430 = vst [vmem:[#allocation37_spill] sm:$0xff] %v5479_v15 }
 0x5ea   : > { %v5467_v27 = vpop.permute.xlu1 %2082 }
 0x5ec   : > { %v1927_v42 = vpop.permute.xlu0 %1926 }
 0x5ed   : > { %v1929_v15 = vsel %vm6436_vm12, %v5334_v34, %v1927_v42 }
 0x5ee   : > { %v5471_v35 = vpop.permute.xlu1 %2146 }
 0x5f0   : > { %v1991_v7 = vpop.permute.xlu0 %1990 }
 0x5f2   : > { %v5475_v54 = vpop.permute.xlu1 %2230 }
 0x5f4   : > { %v2055_v58 = vpop.permute.xlu0 %2054 }
 0x5f6   : > { %v5477_v40 = vpop.permute.xlu1 %2294 }
 0x5f8   : > { %v2119_v45 = vpop.permute.xlu0 %2118 }
 0x5fa   : > { %v5481_v39 = vpop.permute.xlu1 %2358 }
 0x5fb   : > { %6431 = vst [vmem:[#allocation42_spill] sm:$0xff] %v5481_v39  ;;  %v1935_v39 = vmul.f32 %v1929_v15, %v6367_v30  ;;  %v6448_v15 = vld [vmem:[#allocation8_spill] sm:$0xff] }
 0x5fe   : > { %v5483_v61 = vpop.permute.xlu1 %2422 }
 0x5ff   : > { %6432 = vst [vmem:[#allocation43_spill] sm:$0xff] %v5483_v61 }
 0x602   : > { %v5485_v60 = vpop.permute.xlu1 %2486 }
 0x603   : > { %6433 = vst [vmem:[#allocation40_spill] sm:$0xff] %v5485_v60  ;;  %v1931_v60 = vsel %vm6437_vm5, %v1927_v42, %v5334_v34  ;;  %v2183_v34 = vpop.permute.xlu0 %2182  ;;  %v6442_v42 = vld [vmem:[#allocation15_spill] sm:$0xff] }
 0x604   : > { %v1934_v13 = vmul.f32 %v1931_v60, %v6366_v24  ;;  %v6445_v24 = vld [vmem:[#allocation18_spill] sm:$0xff] }
 0x606   : > { %v5487_v0 = vpop.permute.xlu1 %2550  ;;  %v1946_v60 = vmul.f32 %v6448_v15, %v1934_v13 }
 0x607   : > { %6434 = vst [vmem:[#allocation41_spill] sm:$0xff] %v5487_v0 }
 0x60a   : > { %v5489_v48 = vpop.permute.xlu1 %2582 }
 0x60b   : > { %6435 = vst [vmem:[#allocation44_spill] sm:$0xff] %v5489_v48 }
 0x60e   : > { %v1827_v49 = vpop.permute.xlu1 %1826 }
 0x60f   : > { %v1829_v26 = vsel %vm892_vm2, %v1823_v11, %v1827_v49  ;;  %v1831_v23 = vsel %vm892_vm2, %v1827_v49, %v1823_v11  ;;  %v6440_v11 = vld [vmem:[#allocation28_spill] sm:$0xff]  ;;  %vm6443_vm2 = vcmp.lt.s32.totalorder %v3974_v14, 18 }
 0x610   : > { %v1834_v61 = vmul.f32 %v1831_v23, %v6438_v51  ;;  %v1835_v57 = vmul.f32 %v1829_v26, %v6439_v22  ;;  %v1993_v51 = vsel %vm6443_vm2, %v5362_v43, %v1991_v7 }
 0x611   : > { %v1999_v13 = vmul.f32 %v1993_v51, %v6371_v4 }
 0x612   : > { %v1863_v0 = vpop.permute.xlu1 %1862  ;;  %v1850_v23 = vmul.f32 %v6445_v24, %v1834_v61  ;;  %v1851_v26 = vmul.f32 %v6445_v24, %v1835_v57 }
 0x613   : > { %v1865_v48 = vsel %vm923_vm3, %v1859_v5, %v1863_v0  ;;  %v1867_v6 = vsel %vm923_vm3, %v1863_v0, %v1859_v5  ;;  %vm6444_vm3 = vmmov %vm6443_vm2  ;;  %v1947_v0 = vmul.f32 %v6448_v15, %v1935_v39  ;;  %v5539_v39 = vpop.permute.xlu0 %2584  ;;  %vm6508_vm2 = vcmp.lt.s32.totalorder %v3974_v14, 94 }
 0x614   : > { %v1870_v49 = vmul.f32 %v1867_v6, %v6440_v11  ;;  %v1871_v36 = vmul.f32 %v1865_v48, %v6441_v31  ;;  %v1995_v6 = vsel %vm6444_vm3, %v1991_v7, %v5362_v43  ;;  %v6447_v48 = vld [vmem:[#allocation31_spill] sm:$0xff]  ;;  %v2057_v43 = vsel %vm1103_vm9, %v5394_v63, %v2055_v58  ;;  %v6449_v7 = vld [vmem:[#allocation25_spill] sm:$0xff]  ;;  %vm6509_vm3 = vmmov %vm6508_vm2 }
 0x616   : > { %v1882_v19 = vmul.f32 %v6442_v42, %v1870_v49  ;;  %v1883_v56 = vmul.f32 %v6442_v42, %v1871_v36  ;;  %v1895_v16 = vpop.permute.xlu1 %1894  ;;  %v6446_v36 = vld [vmem:[#allocation30_spill] sm:$0xff]  ;;  %v1998_v42 = vmul.f32 %v1995_v6, %v6370_v28  ;;  %v2063_v28 = vmul.f32 %v2057_v43, %v4107_v46  ;;  %v6456_v43 = vld [vmem:[#allocation39_spill] sm:$0xff] }
 0x617   : > { %v1897_v31 = vsel %vm953_vm4, %v1891_v29, %v1895_v16  ;;  %v1899_v30 = vsel %vm953_vm4, %v1895_v16, %v1891_v29  ;;  %v2059_v16 = vsel %vm1103_vm9, %v2055_v58, %v5394_v63  ;;  %v6450_v58 = vld [vmem:[#allocation35_spill] sm:$0xff]  ;;  %vm6451_vm4 = vcmp.lt.s32.totalorder %v3974_v14, 14 }
 0x618   : > { %v1902_v5 = vmul.f32 %v1899_v30, %v6446_v36  ;;  %v1903_v22 = vmul.f32 %v1897_v31, %v6447_v48  ;;  %v1886_v29 = vadd.f32 %v1882_v19, %v1850_v23  ;;  %v1887_v61 = vadd.f32 %v1883_v56, %v1851_v26  ;;  %vm6452_vm9 = vmmov %vm6451_vm4  ;;  %v6453_v26 = vld [vmem:[#allocation9_spill] sm:$0xff]  ;;  %v6454_v48 = vld [vmem:[#allocation24_spill] sm:$0xff] }
 0x619   : > { %v2062_v23 = vmul.f32 %v2059_v16, %v4104_v8  ;;  %v2121_v4 = vsel %vm6451_vm4, %v5421_v3, %v2119_v45  ;;  %v2123_v51 = vsel %vm6452_vm9, %v2119_v45, %v5421_v3  ;;  %v2011_v8 = vmul.f32 %v6454_v48, %v1999_v13  ;;  %vm6511_vm4 = vmmov %vm6508_vm2 }
 0x61a   : > { %v1914_v57 = vmul.f32 %v6449_v7, %v1902_v5  ;;  %v1915_v11 = vmul.f32 %v6449_v7, %v1903_v22  ;;  %v1959_v49 = vpop.permute.xlu1 %1958  ;;  %v2010_v22 = vmul.f32 %v6454_v48, %v1998_v42  ;;  %vm6512_vm9 = vmmov %vm6508_vm2 }
 0x61b   : > { %v1961_v31 = vsel %vm1013_vm6, %v1955_v33, %v1959_v49  ;;  %v1963_v30 = vsel %vm1013_vm6, %v1959_v49, %v1955_v33  ;;  %v2267_v49 = vpop.permute.xlu0 %2266  ;;  %vm6461_vm6 = vcmp.lt.s32.totalorder %v3974_v14, 2 }
 0x61c   : > { %v1918_v63 = vadd.f32 %v1914_v57, %v1886_v29  ;;  %v1919_v19 = vadd.f32 %v1915_v11, %v1887_v61  ;;  %v1966_v56 = vmul.f32 %v1963_v30, %v6362_v1  ;;  %v1967_v24 = vmul.f32 %v1961_v31, %v6450_v58  ;;  %v6457_v29 = vld [vmem:[#allocation10_spill] sm:$0xff] }
 0x61d   : > { %v2074_v61 = vmul.f32 %v6457_v29, %v2062_v23  ;;  %v2075_v7 = vmul.f32 %v6457_v29, %v2063_v28  ;;  %v2126_v57 = vmul.f32 %v2123_v51, %v6378_v52  ;;  %v2127_v11 = vmul.f32 %v2121_v4, %v6379_v10  ;;  %v6458_v31 = vld [vmem:[#allocation6_spill] sm:$0xff]  ;;  %v6467_v29 = vld [vmem:[#allocation56_spill] sm:$0xff] }
 0x61e   : > { %v1950_v6 = vadd.f32 %v1946_v60, %v1918_v63  ;;  %v1951_v33 = vadd.f32 %v1947_v0, %v1919_v19  ;;  %v1978_v36 = vmul.f32 %v6453_v26, %v1966_v56  ;;  %v1979_v1 = vmul.f32 %v6453_v26, %v1967_v24  ;;  %v2023_v5 = vpop.permute.xlu1 %2022  ;;  %v6455_v60 = vld [vmem:[#allocation38_spill] sm:$0xff] }
 0x61f   : > { %v2025_v46 = vsel %vm1073_vm8, %v5465_v44, %v2023_v5  ;;  %v2027_v15 = vsel %vm1073_vm8, %v2023_v5, %v5465_v44  ;;  %v2185_v19 = vsel %vm1223_vm13, %v5444_v2, %v2183_v34  ;;  %v2187_v56 = vsel %vm1223_vm13, %v2183_v34, %v5444_v2  ;;  %v6459_v4 = vld [vmem:[#allocation14_spill] sm:$0xff]  ;;  %v6460_v34 = vld [vmem:[#allocation68_spill] sm:$0xff]  ;;  %v2331_v48 = vpop.permute.xlu0 %2330  ;;  %vm6462_vm8 = vmmov %vm6461_vm6 }
 0x620   : > { %v1982_v45 = vadd.f32 %v1978_v36, %v1950_v6  ;;  %v1983_v3 = vadd.f32 %v1979_v1, %v1951_v33  ;;  %v2030_v0 = vmul.f32 %v2027_v15, %v6455_v60  ;;  %v2031_v16 = vmul.f32 %v2025_v46, %v6456_v43  ;;  %v6466_v43 = vld [vmem:[#allocation69_spill] sm:$0xff] }
 0x621   : > { %v2138_v51 = vmul.f32 %v6459_v4, %v2126_v57  ;;  %v2139_v6 = vmul.f32 %v6459_v4, %v2127_v11  ;;  %v2190_v5 = vmul.f32 %v2187_v56, %v4251_v21  ;;  %v6469_v56 = vld [vmem:[#allocation57_spill] sm:$0xff] }
 0x622   : > { %v2014_v42 = vadd.f32 %v2010_v22, %v1982_v45  ;;  %v2015_v13 = vadd.f32 %v2011_v8, %v1983_v3  ;;  %v2042_v30 = vmul.f32 %v6458_v31, %v2030_v0  ;;  %v2043_v44 = vmul.f32 %v6458_v31, %v2031_v16  ;;  %v2087_v63 = vpop.permute.xlu1 %2086  ;;  %v6463_v45 = vld [vmem:[#allocation7_spill] sm:$0xff] }
 0x623   : > { %v2089_v52 = vsel %vm1133_vm10, %v5467_v27, %v2087_v63  ;;  %v2091_v10 = vsel %vm1133_vm10, %v2087_v63, %v5467_v27  ;;  %v2191_v27 = vmul.f32 %v2185_v19, %v4254_v47  ;;  %v2210_v21 = vmul.f32 %v6463_v45, %v6290_v41  ;;  %v6478_v45 = vld [vmem:[#allocation50_spill] sm:$0xff] }
 0x624   : > { %v2046_v58 = vadd.f32 %v2042_v30, %v2014_v42  ;;  %v2047_v24 = vadd.f32 %v2043_v44, %v2015_v13  ;;  %v2094_v23 = vmul.f32 %v2091_v10, %v4125_v62  ;;  %v2095_v28 = vmul.f32 %v2089_v52, %v4140_v38  ;;  %v2395_v44 = vpop.permute.xlu0 %2394 }
 0x625   : > { %v2211_v47 = vmul.f32 %v4885_v18, %v6289_v12  ;;  %vm6464_vm10 = vcmp.lt.s32.totalorder %v3974_v14, 126  ;;  %v2202_v41 = vmul.f32 %v6467_v29, %v2190_v5  ;;  %v2333_v63 = vsel %vm1366_vm1, %v5463_v17, %v2331_v48 }
 0x626   : > { %v2078_v33 = vadd.f32 %v2074_v61, %v2046_v58  ;;  %v2079_v2 = vadd.f32 %v2075_v7, %v2047_v24  ;;  %v2106_v26 = vmul.f32 %v6460_v34, %v2094_v23  ;;  %v2107_v36 = vmul.f32 %v6460_v34, %v2095_v28  ;;  %v2151_v1 = vpop.permute.xlu1 %2150  ;;  %vm6465_vm13 = vmmov %vm6464_vm10  ;;  %v6472_v28 = vld [vmem:[#allocation71_spill] sm:$0xff] }
 0x627   : > { %v2153_v62 = vsel %vm6461_vm6, %v5471_v35, %v2151_v1  ;;  %v2155_v38 = vsel %vm6462_vm8, %v2151_v1, %v5471_v35  ;;  %v2269_v3 = vsel %vm6464_vm10, %v5458_v50, %v2267_v49  ;;  %v2271_v35 = vsel %vm6465_vm13, %v2267_v49, %v5458_v50  ;;  %v6468_v49 = vld [vmem:[#allocation70_spill] sm:$0xff] }
 0x628   : > { %v2110_v22 = vadd.f32 %v2106_v26, %v2078_v33  ;;  %v2111_v8 = vadd.f32 %v2107_v36, %v2079_v2  ;;  %v2158_v46 = vmul.f32 %v2155_v38, %v6374_v32  ;;  %v2159_v15 = vmul.f32 %v2153_v62, %v6375_v9  ;;  %v6474_v2 = vld [vmem:[#allocation49_spill] sm:$0xff]  ;;  %v6477_v38 = vld [vmem:[#allocation42_spill] sm:$0xff] }
 0x629   : > { %v2203_v61 = vmul.f32 %v6467_v29, %v2191_v27  ;;  %v2222_v42 = vmul.f32 %v6468_v49, %v2210_v21  ;;  %v2223_v13 = vmul.f32 %v6468_v49, %v2211_v47  ;;  %v2274_v31 = vmul.f32 %v2269_v3, %v6384_v25  ;;  %v6475_v26 = vld [vmem:[#allocation33_spill] sm:$0xff]  ;;  %v6476_v27 = vld [vmem:[#allocation72_spill] sm:$0xff]  ;;  %v6479_v47 = vld [vmem:[#allocation51_spill] sm:$0xff] }
 0x62a   : > { %v2142_v60 = vadd.f32 %v2138_v51, %v2110_v22  ;;  %v2143_v0 = vadd.f32 %v2139_v6, %v2111_v8  ;;  %v2170_v32 = vmul.f32 %v6466_v43, %v2158_v46  ;;  %v2171_v9 = vmul.f32 %v6466_v43, %v2159_v15  ;;  %v2235_v16 = vpop.permute.xlu1 %2234  ;;  %v6473_v6 = vld [vmem:[#allocation48_spill] sm:$0xff]  ;;  %v6487_v49 = vld [vmem:[#allocation43_spill] sm:$0xff] }
 0x62b   : > { %v2237_v12 = vsel %vm1276_vm14, %v5475_v54, %v2235_v16  ;;  %v2239_v18 = vsel %vm1276_vm14, %v2235_v16, %v5475_v54  ;;  %v2275_v30 = vmul.f32 %v2271_v35, %v6385_v59  ;;  %v2335_v54 = vsel %vm1366_vm1, %v2331_v48, %v5463_v17  ;;  %v6480_v35 = vld [vmem:[#allocation59_spill] sm:$0xff]  ;;  %v6481_v43 = vld [vmem:[#allocation52_spill] sm:$0xff] }
 0x62c   : > { %v2174_v50 = vadd.f32 %v2170_v32, %v2142_v60  ;;  %v2175_v7 = vadd.f32 %v2171_v9, %v2143_v0  ;;  %v2242_v57 = vmul.f32 %v2237_v12, %v4295_v53  ;;  %v2243_v11 = vmul.f32 %v2239_v18, %v4298_v20  ;;  %v6482_v9 = vld [vmem:[#allocation53_spill] sm:$0xff]  ;;  %v6483_v29 = vld [vmem:[#allocation36_spill] sm:$0xff] }
 0x62d   : > { %vm6470_vm14 = vcmp.lt.s32.totalorder %v3974_v14, 114  ;;  %v2286_v4 = vmul.f32 %v6472_v28, %v2274_v31  ;;  %v2287_v51 = vmul.f32 %v6472_v28, %v2275_v30  ;;  %v2338_v33 = vmul.f32 %v2333_v63, %v6473_v6 }
 0x62e   : > { %v2206_v53 = vadd.f32 %v2202_v41, %v2174_v50  ;;  %v2207_v19 = vadd.f32 %v2203_v61, %v2175_v7  ;;  %v2299_v20 = vpop.permute.xlu1 %2298  ;;  %v2254_v52 = vmul.f32 %v6469_v56, %v2242_v57  ;;  %v2255_v10 = vmul.f32 %v6469_v56, %v2243_v11  ;;  %vm6471_vm12 = vmmov %vm6470_vm14  ;;  %v6486_v7 = vld [vmem:[#allocation74_spill] sm:$0xff] }
 0x62f   : > { %v2301_v25 = vsel %vm6470_vm14, %v5477_v40, %v2299_v20  ;;  %v2303_v59 = vsel %vm6471_vm12, %v2299_v20, %v5477_v40  ;;  %v2339_v34 = vmul.f32 %v2335_v54, %v6474_v2  ;;  %v2397_v36 = vsel %vm1426_vm11, %v6475_v26, %v2395_v44  ;;  %v6489_v54 = vld [vmem:[#allocation12_spill] sm:$0xff] }
 0x630   : > { %v2226_v58 = vadd.f32 %v2222_v42, %v2206_v53  ;;  %v2227_v24 = vadd.f32 %v2223_v13, %v2207_v19  ;;  %v2306_v23 = vmul.f32 %v2301_v25, %v6386_v37  ;;  %v2307_v17 = vmul.f32 %v2303_v59, %v6387_v55  ;;  %v2459_v55 = vpop.permute.xlu0 %2458  ;;  %v6490_v19 = vld [vmem:[#allocation61_spill] sm:$0xff]  ;;  %v6491_v59 = vld [vmem:[#allocation11_spill] sm:$0xff] }
 0x631   : > { %v2399_v40 = vsel %vm1426_vm11, %v2395_v44, %v6475_v26  ;;  %v2350_v60 = vmul.f32 %v6480_v35, %v2338_v33  ;;  %v2351_v0 = vmul.f32 %v6480_v35, %v2339_v34  ;;  %v2402_v32 = vmul.f32 %v2397_v36, %v6481_v43  ;;  %v6488_v44 = vld [vmem:[#allocation54_spill] sm:$0xff]  ;;  %v6494_v33 = vld [vmem:[#allocation40_spill] sm:$0xff] }
 0x632   : > { %v2258_v1 = vadd.f32 %v2254_v52, %v2226_v58  ;;  %v2259_v37 = vadd.f32 %v2255_v10, %v2227_v24  ;;  %v2363_v5 = vpop.permute.xlu1 %2362  ;;  %v2318_v48 = vmul.f32 %v6476_v27, %v2306_v23  ;;  %v2319_v62 = vmul.f32 %v6476_v27, %v2307_v17  ;;  %v6492_v24 = vld [vmem:[#allocation16_spill] sm:$0xff]  ;;  %v6496_v27 = vld [vmem:[#allocation13_spill] sm:$0xff] }
 0x633   : > { %v2365_v22 = vsel %vm1396_vm15, %v6477_v38, %v2363_v5  ;;  %v2367_v8 = vsel %vm1396_vm15, %v2363_v5, %v6477_v38  ;;  %v2403_v16 = vmul.f32 %v2399_v40, %v6482_v9  ;;  %vm6484_vm11 = vcmp.lt.s32.totalorder %v3974_v14, 98  ;;  %v6504_v9 = vld [vmem:[#allocation41_spill] sm:$0xff] }
 0x634   : > { %v2290_v46 = vadd.f32 %v2286_v4, %v2258_v1  ;;  %v2291_v15 = vadd.f32 %v2287_v51, %v2259_v37  ;;  %v2370_v21 = vmul.f32 %v2365_v22, %v6478_v45  ;;  %v2371_v3 = vmul.f32 %v2367_v8, %v6479_v47  ;;  %vm6485_vm15 = vmmov %vm6484_vm11  ;;  %v6493_v4 = vld [vmem:[#allocation76_spill] sm:$0xff]  ;;  %v2523_v26 = vpop.permute.xlu0 %2522  ;;  %v6495_v37 = vld [vmem:[#allocation63_spill] sm:$0xff] }
 0x635   : > { %v2461_v41 = vsel %vm6484_vm11, %v6483_v29, %v2459_v55  ;;  %v2463_v61 = vsel %vm6485_vm15, %v2459_v55, %v6483_v29  ;;  %v2414_v20 = vmul.f32 %v6490_v19, %v2402_v32  ;;  %v2415_v56 = vmul.f32 %v6490_v19, %v2403_v16  ;;  %v6498_v22 = vld [vmem:[#allocation37_spill] sm:$0xff] }
 0x636   : > { %v2322_v12 = vadd.f32 %v2318_v48, %v2290_v46  ;;  %v2323_v18 = vadd.f32 %v2319_v62, %v2291_v15  ;;  %v2427_v50 = vpop.permute.xlu1 %2426  ;;  %v2382_v57 = vmul.f32 %v6486_v7, %v2370_v21  ;;  %v2383_v11 = vmul.f32 %v6486_v7, %v2371_v3  ;;  %v6497_v62 = vld [vmem:[#allocation19_spill] sm:$0xff]  ;;  %v6501_v21 = vld [vmem:[#allocation17_spill] sm:$0xff]  ;;  %v6510_v7 = vld [vmem:[#allocation44_spill] sm:$0xff] }
 0x637   : > { %v2429_v42 = vsel %vm1456_vm0, %v6487_v49, %v2427_v50  ;;  %v2431_v13 = vsel %vm1456_vm0, %v2427_v50, %v6487_v49  ;;  %v2466_v58 = vmul.f32 %v2461_v41, %v6491_v59  ;;  %v2467_v23 = vmul.f32 %v2463_v61, %v6492_v24  ;;  %v6502_v3 = vld [vmem:[#allocation21_spill] sm:$0xff]  ;;  %v6507_v41 = vld [vmem:[#allocation82_spill] sm:$0xff] }
 0x638   : > { %v2354_v31 = vadd.f32 %v2350_v60, %v2322_v12  ;;  %v2355_v30 = vadd.f32 %v2351_v0, %v2323_v18  ;;  %v2434_v63 = vmul.f32 %v2429_v42, %v6488_v44  ;;  %v2435_v53 = vmul.f32 %v2431_v13, %v6489_v54  ;;  %v6503_v60 = vld [vmem:[#allocation78_spill] sm:$0xff]  ;;  %v6513_v49 = vld [vmem:[#allocation65_spill] sm:$0xff]  ;;  %v6516_v54 = vld [vmem:[#allocation23_spill] sm:$0xff] }
 0x639   : > { %v2478_v5 = vmul.f32 %v6495_v37, %v2466_v58  ;;  %v2479_v55 = vmul.f32 %v6495_v37, %v2467_v23  ;;  %vm6499_vm0 = vcmp.lt.s32.totalorder %v3974_v14, 96  ;;  %v2588_v61 = vsel %vm6508_vm2, %v6507_v41, %v5539_v39  ;;  %v6515_v44 = vld [vmem:[#allocation22_spill] sm:$0xff]  ;;  %v6519_v58 = vld [vmem:[#allocation81_spill] sm:$0xff] }
 0x63a   : > { %v2386_v52 = vadd.f32 %v2382_v57, %v2354_v31  ;;  %v2387_v10 = vadd.f32 %v2383_v11, %v2355_v30  ;;  %v2491_v25 = vpop.permute.xlu1 %2490  ;;  %v2446_v51 = vmul.f32 %v6493_v4, %v2434_v63  ;;  %v2447_v6 = vmul.f32 %v6493_v4, %v2435_v53  ;;  %vm6500_vm1 = vmmov %vm6499_vm0  ;;  %v6514_v31 = vld [vmem:[#allocation20_spill] sm:$0xff]  ;;  %v6517_v53 = vld [vmem:[#allocation55_spill] sm:$0xff] }
 0x63b   : > { %v2493_v2 = vsel %vm1516_vm7, %v6494_v33, %v2491_v25  ;;  %v2495_v34 = vsel %vm1516_vm7, %v2491_v25, %v6494_v33  ;;  %v2525_v8 = vsel %vm6499_vm0, %v6498_v22, %v2523_v26  ;;  %v2527_v46 = vsel %vm6500_vm1, %v2523_v26, %v6498_v22  ;;  %v2617_v33 = vpop.permute.xlu0 %2616  ;;  %v6522_v26 = vld [vmem:[#allocation32_spill] sm:$0xff]  ;;  %v6523_v22 = vld [vmem:[#allocation3_spill] sm:$0xff] }
 0x63c   : > { %v2418_v17 = vadd.f32 %v2414_v20, %v2386_v52  ;;  %v2419_v28 = vadd.f32 %v2415_v56, %v2387_v10  ;;  %v2498_v48 = vmul.f32 %v2493_v2, %v6496_v27  ;;  %v2499_v38 = vmul.f32 %v2495_v34, %v6497_v62  ;;  %v6521_v2 = vld [vmem:[#allocation34_spill] sm:$0xff] }
 0x63d   : > { %v2530_v47 = vmul.f32 %v2525_v8, %v6501_v21  ;;  %v2531_v35 = vmul.f32 %v2527_v46, %v6502_v3  ;;  %vm6505_vm7 = vcmp.lt.s32.totalorder %v3974_v14, 95  ;;  %v2590_v12 = vsel %vm6509_vm3, %v5539_v39, %v6507_v41  ;;  %v6518_v14 = vld [vmem:[#allocation80_spill] sm:$0xff]  ;;  %v6524_v8 = vld [vmem:[#allocation2_spill] sm:$0xff]  ;;  %v6525_v46 = vld [vmem:[#allocation5_spill] sm:$0xff] }
 0x63e   : > { %v2450_v36 = vadd.f32 %v2446_v51, %v2418_v17  ;;  %v2451_v40 = vadd.f32 %v2447_v6, %v2419_v28  ;;  %v2555_v1 = vpop.permute.xlu1 %2554  ;;  %v2510_v0 = vmul.f32 %v6503_v60, %v2498_v48  ;;  %v2511_v43 = vmul.f32 %v6503_v60, %v2499_v38  ;;  %vm6506_vm5 = vmmov %vm6505_vm7  ;;  %v6520_v17 = vld [vmem:[#allocation67_spill] sm:$0xff]  ;;  %v2630_v3 = vld [vmem:[%s5889_s11 + $0x10] sm:$0xff] }
 0x63f   : > { %v2557_v16 = vsel %vm6505_vm7, %v6504_v9, %v2555_v1  ;;  %v2559_v29 = vsel %vm6506_vm5, %v2555_v1, %v6504_v9  ;;  %v2542_v42 = vmul.f32 %v6513_v49, %v2530_v47  ;;  %v2543_v13 = vmul.f32 %v6513_v49, %v2531_v35  ;;  %v2629_v47 = vld [vmem:[%s5889_s11 + $0x8] sm:$0xff]  ;;  %v2631_v35 = vld [vmem:[%s5889_s11 + $0x18] sm:$0xff]  ;;  %v2632_v60 = vld [vmem:[%s5889_s11 + $0x20] sm:$0xff] }
 0x640   : > { %v2482_v15 = vadd.f32 %v2478_v5, %v2450_v36  ;;  %v2483_v45 = vadd.f32 %v2479_v55, %v2451_v40  ;;  %v2562_v30 = vmul.f32 %v2557_v16, %v6514_v31  ;;  %v2563_v63 = vmul.f32 %v2559_v29, %v6515_v44 }
 0x641   : > { %v2592_v39 = vmul.f32 %v2588_v61, %v6516_v54  ;;  %v2593_v19 = vmul.f32 %v2590_v12, %v6517_v53  ;;  %vm2684_vm6 = vcmask 785408   ;;  %v6527_v21 = vmov 0.0  }
 0x642   : > { %v2587_v32 = vpop.permute.xlu1 %2586  ;;  %v2514_v18 = vadd.f32 %v2510_v0, %v2482_v15  ;;  %v2515_v50 = vadd.f32 %v2511_v43, %v2483_v45  ;;  %v2574_v25 = vmul.f32 %v6518_v14, %v2562_v30  ;;  %v2575_v59 = vmul.f32 %v6518_v14, %v2563_v63  ;;  %v6526_v15 = vld [vmem:[#allocation4_spill] sm:$0xff]  ;;  %v2628_v45 = vld [vmem:[%s5889_s11] sm:$0xff]  ;;  %v2633_v0 = vld [vmem:[%s5889_s11 + $0x28] sm:$0xff] }
 0x643   : > { %v2589_v57 = vsel %vm6511_vm4, %v6510_v7, %v2587_v32  ;;  %v2591_v11 = vsel %vm6512_vm9, %v2587_v32, %v6510_v7  ;;  %v2604_v24 = vmul.f32 %v6519_v58, %v2592_v39  ;;  %v2605_v23 = vmul.f32 %v6519_v58, %v2593_v19  ;;  %v2634_v43 = vld [vmem:[%s5889_s11 + $0x30] sm:$0xff]  ;;  %v2635_v32 = vld [vmem:[%s5889_s11 + $0x38] sm:$0xff] }
 0x644   : > { %v2594_v20 = vmul.f32 %v2589_v57, %v6516_v54  ;;  %v2595_v56 = vmul.f32 %v2591_v11, %v6517_v53  ;;  %v2546_v52 = vadd.f32 %v2542_v42, %v2514_v18  ;;  %v2547_v10 = vadd.f32 %v2543_v13, %v2515_v50  ;;  %v2652_v18 = vpop.permute.xlu0 %2651 }
 0x645   : > { %v2609_v34 = vadd.f32 %v2605_v23, %v6521_v2  ;;  %v2608_v36 = vadd.f32 %v2604_v24, %v6522_v26 }
 0x646   : > { %v2606_v28 = vmul.f32 %v6520_v17, %v2594_v20  ;;  %v2607_v4 = vmul.f32 %v6520_v17, %v2595_v56  ;;  %v2578_v51 = vadd.f32 %v2574_v25, %v2546_v52  ;;  %v2579_v6 = vadd.f32 %v2575_v59, %v2547_v10 }
 0x647   : > { %v2624_v5 = vadd.f32 %v2617_v33, %v2608_v36  ;;  %v2625_v55 = vadd.f32 %v2617_v33, %v2609_v34 }
 0x648   : > { %v2610_v40 = vadd.f32 %v2606_v28, %v2578_v51  ;;  %v2611_v1 = vadd.f32 %v2607_v4, %v2579_v6  ;;  %v2662_v52 = vpop.permute.xlu0 %2661 }
 0x653   : > { %v2622_v37 = vpop.permute.xlu1 %2621 }
 0x654   : > { %v2626_v27 = vadd.f32 %v2622_v37, %v2610_v40  ;;  %v2627_v48 = vadd.f32 %v2622_v37, %v2611_v1 }
 0x656   : > { %v3133_v62 = vpack.c.bf16 %v2627_v48, %v2625_v55  ;;  %v3135_v38 = vpack.c.bf16 %v2626_v27, %v2624_v5  ;;  %v2672_v55 = vpop.permute.xlu0 %2671 }
 0x657   : > { %v2647_v9 = vpop.permute.xlu1 %2646 }
 0x658   : > { %3134 = vmatprep.subr.bf16.mxu0 %v3133_v62 }
 0x659   : > { %3136 = vmatpush1.bf16.msra.mxu0 %v3135_v38 }
 0x65a   : > { %3138 = vmatprep.subr.bf16.mxu0 %v6523_v22 }
 0x65b   : > { %v2657_v30 = vpop.permute.xlu1 %2656 }
 0x65d   : > { %3140 = vmatpush1.bf16.msra.mxu0 %v6524_v8 }
 0x65e   : > { %3142 = vmatprep.subr.bf16.mxu0 %v6525_v46 }
 0x65f   : > { %v2667_v28 = vpop.permute.xlu1 %2666 }
 0x661   : > { %3144 = vmatpush1.bf16.msra.mxu0 %v6526_v15 }
 0x664   : > { %3049 = vmatmul.mubr.msk.f32.vlgmr.msra.gmra.mrb[12].mxu0 %vm2684_vm6, %v2628_v45 }
 0x665   : > { %2779 = vmatprep.mubr.f32.mxu0 %v6527_v21 }
 0x668   : > { %3050 = vmatmul.mubr.msk.f32.gmra.mrb[14].mxu0 %vm2684_vm6, %v2629_v47 }
 0x669   : > { %2785 = vmatprep.mubr.f32.mxu0 %v6527_v21 }
 0x66c   : > { %3051 = vmatmul.mubr.msk.f32.gmra.mrb[16].mxu0 %vm2684_vm6, %v2630_v3 }
 0x66d   : > { %2791 = vmatprep.mubr.f32.mxu0 %v6527_v21 }
 0x670   : > { %3052 = vmatmul.mubr.msk.f32.gmra.mrb[18].mxu0 %vm2684_vm6, %v2631_v35  ;;  %v2677_v35 = vpop.permute.xlu1 %2676 }
 0x671   : > { %2797 = vmatprep.mubr.f32.mxu0 %v6527_v21 }
 0x674   : > { %3053 = vmatmul.mubr.msk.f32.gmra.mrb[20].mxu0 %vm2684_vm6, %v2632_v60 }
 0x675   : > { %2803 = vmatprep.mubr.f32.mxu0 %v6527_v21 }
 0x678   : > { %3054 = vmatmul.mubr.msk.f32.gmra.mrb[22].mxu0 %vm2684_vm6, %v2633_v0 }
 0x679   : > { %2809 = vmatprep.mubr.f32.mxu0 %v6527_v21 }
 0x67c   : > { %3055 = vmatmul.mubr.msk.f32.gmra.mrb[24].mxu0 %vm2684_vm6, %v2634_v43 }
 0x67d   : > { %2815 = vmatprep.mubr.f32.mxu0 %v6527_v21 }
 0x680   : > { %3056 = vmatmul.mubr.msk.f32.gmra.mrb[26].mxu0 %vm2684_vm6, %v2635_v32 }
 0x737   : > { %v2775_v16 = vpop.f32.mrb[12].mxu0 }
 0x738   : > { %v5788_v29 = vadd.f32 %v2775_v16, %v2647_v9  ;;  %v2777_v41 = vpop.f32.mrb[13].mxu0 }
 0x739   : > { %v5790_v61 = vadd.f32 %v2777_v41, %v2647_v9 }
 0x73a   : > { %v2822_v12 = vsub.f32 0.0, %v5788_v29 }
 0x73b   : > { %v2823_v50 = vsub.f32 0.0, %v5790_v61  ;;  %v2781_v7 = vpop.f32.mrb[14].mxu0 }
 0x73c   : > { %v2838_v57 = vmul.f32 1.442695, %v2822_v12  ;;  %v5794_v11 = vadd.f32 %v2781_v7, %v2652_v18  ;;  %v2783_v49 = vpop.f32.mrb[15].mxu0 }
 0x73d   : > { %v2840_v42 = vmul.f32 1.442695, %v2823_v50  ;;  %v5796_v13 = vadd.f32 %v2783_v49, %v2652_v18  ;;  %v2682_v49 = vpop.permute.xlu0 %2681 }
 0x73e   : > { %3367 = vpow2.f32 %v2838_v57  ;;  %v2824_v31 = vsub.f32 0.0, %v5794_v11 }
 0x73f   : > { %3369 = vpow2.f32 %v2840_v42  ;;  %v2825_v44 = vsub.f32 0.0, %v5796_v13  ;;  %v2787_v63 = vpop.f32.mrb[16].mxu0 }
 0x740   : > { %v2842_v54 = vmul.f32 1.442695, %v2824_v31  ;;  %v5800_v39 = vadd.f32 %v2787_v63, %v2657_v30  ;;  %v2789_v53 = vpop.f32.mrb[17].mxu0 }
 0x741   : > { %v2844_v19 = vmul.f32 1.442695, %v2825_v44  ;;  %v5802_v20 = vadd.f32 %v2789_v53, %v2657_v30 }
 0x742   : > { %3371 = vpow2.f32 %v2842_v54  ;;  %v2826_v56 = vsub.f32 0.0, %v5800_v39 }
 0x743   : > { %3373 = vpow2.f32 %v2844_v19  ;;  %v2827_v10 = vsub.f32 0.0, %v5802_v20  ;;  %v2793_v14 = vpop.f32.mrb[18].mxu0 }
 0x744   : > { %v2846_v25 = vmul.f32 1.442695, %v2826_v56  ;;  %v5806_v59 = vadd.f32 %v2793_v14, %v2662_v52  ;;  %v2795_v58 = vpop.f32.mrb[19].mxu0 }
 0x745   : > { %v2848_v24 = vmul.f32 1.442695, %v2827_v10  ;;  %v5808_v23 = vadd.f32 %v2795_v58, %v2662_v52 }
 0x746   : > { %3375 = vpow2.f32 %v2846_v25  ;;  %v2828_v17 = vsub.f32 0.0, %v5806_v59 }
 0x747   : > { %3377 = vpow2.f32 %v2848_v24  ;;  %v2829_v4 = vsub.f32 0.0, %v5808_v23  ;;  %v2799_v51 = vpop.f32.mrb[20].mxu0 }
 0x748   : > { %v3368_v6 = vpop.eup %3367  ;;  %v2850_v33 = vmul.f32 1.442695, %v2828_v17  ;;  %v5812_v2 = vadd.f32 %v2799_v51, %v2667_v28  ;;  %v2801_v34 = vpop.f32.mrb[21].mxu0 }
 0x749   : > { %v3370_v26 = vpop.eup %3369  ;;  %v2870_v36 = vadd.f32 1.0, %v3368_v6  ;;  %v2852_v40 = vmul.f32 1.442695, %v2829_v4  ;;  %v5814_v1 = vadd.f32 %v2801_v34, %v2667_v28 }
 0x74a   : > { %v2871_v37 = vadd.f32 1.0, %v3370_v26  ;;  %3379 = vpow2.f32 %v2850_v33  ;;  %v2830_v5 = vsub.f32 0.0, %v5812_v2 }
 0x74b   : > { %3381 = vrcp.f32 %v2870_v36  ;;  %v2831_v27 = vsub.f32 0.0, %v5814_v1  ;;  %v2805_v48 = vpop.f32.mrb[22].mxu0 }
 0x74c   : > { %v3372_v62 = vpop.eup %3371  ;;  %3383 = vrcp.f32 %v2871_v37  ;;  %v2854_v38 = vmul.f32 1.442695, %v2830_v5  ;;  %v5818_v22 = vadd.f32 %v2805_v48, %v2672_v55  ;;  %v2807_v8 = vpop.f32.mrb[23].mxu0 }
 0x74d   : > { %v3374_v46 = vpop.eup %3373  ;;  %v2872_v15 = vadd.f32 1.0, %v3372_v62  ;;  %3385 = vpow2.f32 %v2852_v40  ;;  %v2856_v45 = vmul.f32 1.442695, %v2831_v27  ;;  %v5820_v21 = vadd.f32 %v2807_v8, %v2672_v55 }
 0x74e   : > { %v2873_v47 = vadd.f32 1.0, %v3374_v46  ;;  %3387 = vpow2.f32 %v2854_v38  ;;  %v2832_v3 = vsub.f32 0.0, %v5818_v22 }
 0x74f   : > { %3389 = vrcp.f32 %v2872_v15  ;;  %v2833_v60 = vsub.f32 0.0, %v5820_v21  ;;  %v2811_v0 = vpop.f32.mrb[24].mxu0 }
 0x750   : > { %v3376_v43 = vpop.eup %3375  ;;  %3391 = vrcp.f32 %v2873_v47  ;;  %v2858_v32 = vmul.f32 1.442695, %v2832_v3  ;;  %v5824_v9 = vadd.f32 %v2811_v0, %v2677_v35  ;;  %v2813_v16 = vpop.f32.mrb[25].mxu0 }
 0x751   : > { %v3378_v41 = vpop.eup %3377  ;;  %v2874_v12 = vadd.f32 1.0, %v3376_v43  ;;  %3393 = vpow2.f32 %v2856_v45  ;;  %v2860_v18 = vmul.f32 1.442695, %v2833_v60  ;;  %v5826_v50 = vadd.f32 %v2813_v16, %v2677_v35 }
 0x752   : > { %v2875_v7 = vadd.f32 1.0, %v3378_v41  ;;  %3395 = vpow2.f32 %v2858_v32  ;;  %v2834_v57 = vsub.f32 0.0, %v5824_v9 }
 0x753   : > { %3397 = vrcp.f32 %v2874_v12  ;;  %v2835_v42 = vsub.f32 0.0, %v5826_v50  ;;  %v2817_v31 = vpop.f32.mrb[26].mxu0 }
 0x754   : > { %v3380_v30 = vpop.eup %3379  ;;  %3399 = vrcp.f32 %v2875_v7  ;;  %v2862_v44 = vmul.f32 1.442695, %v2834_v57  ;;  %v5830_v63 = vadd.f32 %v2817_v31, %v2682_v49  ;;  %v2819_v54 = vpop.f32.mrb[27].mxu0 }
 0x755   : > { %v3382_v53 = vpop.eup %3381  ;;  %v2876_v19 = vadd.f32 1.0, %v3380_v30  ;;  %3401 = vpow2.f32 %v2860_v18  ;;  %v2864_v56 = vmul.f32 1.442695, %v2835_v42  ;;  %v5839_v52 = vadd.f32 %v2819_v54, %v2682_v49 }
 0x756   : > { %v3384_v10 = vpop.eup %3383  ;;  %v2918_v14 = vmul.f32 %v3382_v53, %v5788_v29  ;;  %3403 = vpow2.f32 %v2862_v44  ;;  %v2836_v25 = vsub.f32 0.0, %v5830_v63 }
 0x757   : > { %v3386_v58 = vpop.eup %3385  ;;  %v2919_v24 = vmul.f32 %v3384_v10, %v5790_v61  ;;  %3405 = vrcp.f32 %v2876_v19  ;;  %v2837_v17 = vsub.f32 0.0, %v5839_v52 }
 0x758   : > { %v3388_v28 = vpop.eup %3387  ;;  %2934 = vst [vmem:[%s5837_s16] sm:$0xff] %v2918_v14  ;;  %v2877_v4 = vadd.f32 1.0, %v3386_v58  ;;  %3407 = vpow2.f32 %v2864_v56  ;;  %v2866_v51 = vmul.f32 1.442695, %v2836_v25 }
 0x759   : > { %v3390_v6 = vpop.eup %3389  ;;  %2935 = vst [vmem:[%s5837_s16 + $0x8] sm:$0xff] %v2919_v24  ;;  %v2878_v33 = vadd.f32 1.0, %v3388_v28  ;;  %v2868_v29 = vmul.f32 1.442695, %v2837_v17 }
 0x75a   : > { %v3392_v34 = vpop.eup %3391  ;;  %v2920_v26 = vmul.f32 %v3390_v6, %v5794_v11  ;;  %3409 = vrcp.f32 %v2877_v4 }
 0x75b   : > { %v3394_v36 = vpop.eup %3393  ;;  %v2921_v61 = vmul.f32 %v3392_v34, %v5796_v13  ;;  %3411 = vrcp.f32 %v2878_v33 }
 0x75c   : > { %v3396_v40 = vpop.eup %3395  ;;  %2936 = vst [vmem:[%s5837_s16 + $0x10] sm:$0xff] %v2920_v26  ;;  %v2879_v37 = vadd.f32 1.0, %v3394_v36  ;;  %3413 = vpow2.f32 %v2866_v51 }
 0x75d   : > { %v3398_v5 = vpop.eup %3397  ;;  %2937 = vst [vmem:[%s5837_s16 + $0x18] sm:$0xff] %v2921_v61  ;;  %v2880_v55 = vadd.f32 1.0, %v3396_v40  ;;  %3415 = vpow2.f32 %v2868_v29 }
 0x75e   : > { %v3400_v27 = vpop.eup %3399  ;;  %v2922_v48 = vmul.f32 %v3398_v5, %v5800_v39  ;;  %3417 = vrcp.f32 %v2879_v37 }
 0x75f   : > { %v3402_v11 = vpop.eup %3401  ;;  %v2923_v62 = vmul.f32 %v3400_v27, %v5802_v20  ;;  %3419 = vrcp.f32 %v2880_v55 }
 0x760   : > { %v3404_v13 = vpop.eup %3403  ;;  %2938 = vst [vmem:[%s5837_s16 + $0x20] sm:$0xff] %v2922_v48  ;;  %v2881_v38 = vadd.f32 1.0, %v3402_v11 }
 0x761   : > { %v3406_v8 = vpop.eup %3405  ;;  %2939 = vst [vmem:[%s5837_s16 + $0x28] sm:$0xff] %v2923_v62  ;;  %v2882_v46 = vadd.f32 1.0, %v3404_v13 }
 0x762   : > { %v3408_v15 = vpop.eup %3407  ;;  %v2924_v45 = vmul.f32 %v3406_v8, %v5806_v59  ;;  %3421 = vrcp.f32 %v2881_v38 }
 0x763   : > { %3423 = vrcp.f32 %v2882_v46  ;;  %v2883_v39 = vadd.f32 1.0, %v3408_v15 }
 0x764   : > { %v3410_v47 = vpop.eup %3409  ;;  %2940 = vst [vmem:[%s5837_s16 + $0x30] sm:$0xff] %v2924_v45 }
 0x765   : > { %v3412_v3 = vpop.eup %3411  ;;  %v2925_v20 = vmul.f32 %v3410_v47, %v5808_v23  ;;  %3425 = vrcp.f32 %v2883_v39 }
 0x766   : > { %v3414_v35 = vpop.eup %3413  ;;  %v2926_v60 = vmul.f32 %v3412_v3, %v5812_v2 }
 0x767   : > { %v3416_v0 = vpop.eup %3415  ;;  %2941 = vst [vmem:[%s5837_s16 + $0x38] sm:$0xff] %v2925_v20  ;;  %v2884_v43 = vadd.f32 1.0, %v3414_v35 }
 0x768   : > { %v3418_v32 = vpop.eup %3417  ;;  %2942 = vst [vmem:[%s5837_s16 + $0x40] sm:$0xff] %v2926_v60  ;;  %v2885_v59 = vadd.f32 1.0, %v3416_v0 }
 0x769   : > { %v3420_v16 = vpop.eup %3419  ;;  %v2927_v41 = vmul.f32 %v3418_v32, %v5814_v1  ;;  %3427 = vrcp.f32 %v2884_v43 }
 0x76a   : > { %v2928_v23 = vmul.f32 %v3420_v16, %v5818_v22  ;;  %3429 = vrcp.f32 %v2885_v59 }
 0x76b   : > { %2943 = vst [vmem:[%s5837_s16 + $0x48] sm:$0xff] %v2927_v41 }
 0x76c   : > { %v3422_v2 = vpop.eup %3421  ;;  %2944 = vst [vmem:[%s5837_s16 + $0x50] sm:$0xff] %v2928_v23 }
 0x76d   : > { %v3424_v12 = vpop.eup %3423  ;;  %v2929_v18 = vmul.f32 %v3422_v2, %v5820_v21 }
 0x76e   : > { %v2930_v7 = vmul.f32 %v3424_v12, %v5824_v9 }
 0x76f   : > { %v3426_v57 = vpop.eup %3425  ;;  %2945 = vst [vmem:[%s5837_s16 + $0x58] sm:$0xff] %v2929_v18 }
 0x770   : > { %2946 = vst [vmem:[%s5837_s16 + $0x60] sm:$0xff] %v2930_v7  ;;  %v2931_v49 = vmul.f32 %v3426_v57, %v5826_v50 }
 0x772   : > { %2947 = vst [vmem:[%s5837_s16 + $0x68] sm:$0xff] %v2931_v49 }
 0x773   : > { %v3428_v1 = vpop.eup %3427 }
 0x774   : > { %v3430_v42 = vpop.eup %3429  ;;  %v2932_v22 = vmul.f32 %v3428_v1, %v5830_v63 }
 0x775   : > { %v2933_v31 = vmul.f32 %v3430_v42, %v5839_v52 }
 0x776   : > { %2948 = vst [vmem:[%s5837_s16 + $0x70] sm:$0xff] %v2932_v22 }
 0x777   : > { %2949 = vst [vmem:[%s5837_s16 + $0x78] sm:$0xff] %v2933_v31 }
 0x778 PF: > { %s24_s29 = sadd.s32 1, %s3439_s29  }
 0x779   : > { %p21_p4 = scmp.ge.s32.totalorder %s24_s29, 4  }
 0x77b   :  { %23 = sbr.rel (!%p21_p4) target bundleno = 11 (0xb), region = 130 }

</bundles_post_ra>
